<compile_context>
chip_gen: v7x
topology: tpu7x:2x2x1
jax: 0.10.0
libtpu: 0.0.40
codegen_flags: <defaults>
</compile_context>

<pallas_src>
import functools

import numpy as np
import jax
import jax.numpy as jnp
from jax.experimental import pallas as pl
from jax.experimental.pallas import tpu as pltpu

_PRIMES = (1, 2654435761, 805459861)   # prime[0] == 1 -> multiply elided in the kernel
_CHUNK = 128                           # buckets per table chunk (one lane-group)


def _hash_embed_kernel(res_ref, x_ref, tab_ref, o_ref, *,
                       log2_hashmap_size, n_feats, box_min, box_max, compute_dtype):
    """One grid step == (one level, one tile of points)."""
    lvl = pl.program_id(0)
    res = res_ref[lvl].astype(jnp.float32)          # per-level resolution (SMEM scalar)
    x = x_ref[...]                                  # (3, TB) f32, original (un-clamped) points
    table2d = tab_ref[0]                            # (F*128, C) table: row f*128+j = feat f of
    tb = x.shape[1]                                 #   bucket c*128+j, col c = chunk index
    C = table2d.shape[1]
    F = n_feats

    # ---- get_voxel_vertices ----
    xc = jnp.clip(x, box_min, box_max)              # torch clamps out-of-box points
    grid_size = (box_max - box_min) / res           # scalar (hoisted out of the vector path)
    inv_grid = 1.0 / grid_size                      # scalar reciprocal
    bl_f = jnp.floor((xc - box_min) / grid_size)    # bottom_left_idx as f32, (3, TB)
    voxel_min = bl_f * grid_size + box_min          # (3, TB)

    # Trilinear weights use the ORIGINAL, un-clamped x (matches the PyTorch module).
    w = (x - voxel_min) * inv_grid                  # (3, TB)
    wx, wy, wz = w[0:1, :], w[1:2, :], w[2:3, :]

    # ---- per-axis hash terms & corner weights, hoisted out of the 8-corner loop ----
    mask = jnp.uint32((1 << log2_hashmap_size) - 1)
    blu = bl_f.astype(jnp.int32).astype(jnp.uint32)
    vx, vy, vz = blu[0:1, :], blu[1:2, :], blu[2:3, :]
    one = jnp.uint32(1)
    p1 = jnp.uint32(_PRIMES[1])
    p2 = jnp.uint32(_PRIMES[2])

    hx = (vx, vx + one)                    # prime[0] == 1: no multiply
    hy = (vy * p1, (vy + one) * p1)
    hz = (vz * p2, (vz + one) * p2)
    cwx = (1.0 - wx, wx)
    cwy = (1.0 - wy, wy)
    cwz = (1.0 - wz, wz)

    iota_c = jax.lax.broadcasted_iota(jnp.int32, (C, 1), 0)       # chunk ids (column)
    iota_j = jax.lax.broadcasted_iota(jnp.int32, (_CHUNK, 1), 0)  # within-chunk ids (column)

    # Small (1, TB) per-feature accumulators -> stay in vregs across the 8 corners.
    acc = [jnp.zeros((1, tb), jnp.float32) for _ in range(F)]

    for ox in (0, 1):               # BOX_OFFSETS order: [[i,j,k] for i for j for k]
        cx = cwx[ox]
        tx = hx[ox]
        for oy in (0, 1):
            cxy = cx * cwy[oy]
            txy = tx ^ hy[oy]
            for oz in (0, 1):
                h = ((txy ^ hz[oz]) & mask).astype(jnp.int32)     # (1, TB) bucket id
                cw = cxy * cwz[oz]                                # (1, TB) corner weight
                hc = h >> 7                                       # chunk index
                hl = h & (_CHUNK - 1)                             # position within chunk

                # Stage 1: weighted chunk one-hot (C, TB) and one small MXU matmul:
                #   m[f*128+j, p] = cw[p] * table[hc[p]*128 + j, f]
                oc = jnp.where(hc == iota_c, cw, 0.0).astype(compute_dtype)
                m = jnp.dot(table2d, oc, preferred_element_type=jnp.float32)  # (F*128, TB)

                # Stage 2: pick the single bucket out of the 128-wide chunk
                # (compare/select on VPU, sublane reduction on XLU).
                sel = hl == iota_j                                # (128, TB) bool
                for f in range(F):
                    mf = m[f * _CHUNK:(f + 1) * _CHUNK, :]
                    acc[f] = acc[f] + jnp.sum(jnp.where(sel, mf, 0.0),
                                              axis=0, keepdims=True)

    o_ref[0] = jnp.concatenate(acc, axis=0).astype(o_ref.dtype)   # (F, TB), B lane-dense


def hash_embedder_forward(x, tables, resolutions_i32, *, log2_hashmap_size,
                          box_min=-3.0, box_max=3.0, tb=256,
                          compute_dtype=jnp.float32):
    """x: (B,3) f32; tables: (L,T,F) f32; resolutions_i32: (L,) i32 -> (B, L*F).

    compute_dtype=jnp.bfloat16 is a drop-in bandwidth/VMEM saver on v6e/v7x (keep f32
    on v5e: no bf16 VPU). MXU accumulation stays f32 either way.
    """
    B = x.shape[0]
    L, T, F = tables.shape
    assert T == (1 << log2_hashmap_size) and log2_hashmap_size >= 7
    C = T // _CHUNK
    nb = pl.cdiv(B, tb)
    Bp = nb * tb

    # Layout plumbing in the wrapper (cheap one-time XLA transposes), lane-dense inside.
    x_t = jnp.transpose(x, (1, 0))                      # (3, B): points on lanes
    if Bp != B:
        x_t = jnp.pad(x_t, ((0, 0), (0, Bp - B)))       # pad points (in-box zeros)
    # (L, T, F) -> (L, F*128, C): row f*128+j / col c holds tables[l, c*128+j, f].
    tables_k = jnp.transpose(tables.reshape(L, C, _CHUNK, F), (0, 3, 2, 1))
    tables_k = tables_k.reshape(L, F * _CHUNK, C).astype(compute_dtype)

    kernel = functools.partial(_hash_embed_kernel,
                               log2_hashmap_size=log2_hashmap_size,
                               n_feats=F,
                               box_min=float(box_min), box_max=float(box_max),
                               compute_dtype=compute_dtype)
    out = pl.pallas_call(
        kernel,
        out_shape=jax.ShapeDtypeStruct((L, F, Bp), jnp.float32),
        grid_spec=pltpu.PrefetchScalarGridSpec(
            num_scalar_prefetch=1,                       # resolutions -> SMEM
            grid=(L, nb),                                # leading L: v7x megacore splits levels
            in_specs=[
                pl.BlockSpec((3, tb), lambda l, j, res: (0, j)),            # this tile's points
                pl.BlockSpec((1, F * _CHUNK, C), lambda l, j, res: (l, 0, 0)),  # level's table
            ],
            out_specs=pl.BlockSpec((1, F, tb), lambda l, j, res: (l, 0, j)),
        ),
        compiler_params=pltpu.CompilerParams(
            dimension_semantics=("parallel", "parallel"),
            vmem_limit_bytes=48 * 1024 * 1024),          # table block + chunk one-hot headroom
    )(resolutions_i32, x_t, tables_k)

    # torch: torch.cat(x_embedded_all, dim=-1) -> (B, L*F), level-major.
    # NOTE: a downstream consumer that accepts the (L, F, B) layout directly can skip
    # this transpose (it is a full extra HBM round-trip of the output at large B).
    out = jnp.transpose(out, (2, 0, 1)).reshape(Bp, L * F)
    return out[:B]


def reference_forward(x, tables, resolutions_f32, log2_hashmap_size,
                      box_min=-3.0, box_max=3.0):
    """Pure-JAX reference mirroring the PyTorch forward (uses jnp.take gather)."""
    L, T, F = tables.shape
    offsets = np.array([[a, b, c] for a in (0, 1) for b in (0, 1) for c in (0, 1)],
                       dtype=np.uint32)                          # (8, 3)
    primes = np.array(_PRIMES, dtype=np.uint32)
    mask = np.uint32((1 << log2_hashmap_size) - 1)
    outs = []
    for i in range(L):
        res = jnp.float32(resolutions_f32[i])
        xc = jnp.clip(x, box_min, box_max)
        grid_size = (box_max - box_min) / res
        bl = jnp.floor((xc - box_min) / grid_size).astype(jnp.int32)
        vmin = bl.astype(jnp.float32) * grid_size + box_min
        vmax = vmin + grid_size
        w = (x - vmin) / (vmax - vmin)
        corners = bl.astype(jnp.uint32)[:, None, :] + offsets[None]       # (B,8,3)
        h = ((corners[..., 0] * primes[0])
             ^ (corners[..., 1] * primes[1])
             ^ (corners[..., 2] * primes[2])) & mask
        idx = h.astype(jnp.int32)                                         # (B,8)
        ve = jnp.take(tables[i], idx, axis=0)                             # (B,8,F)
        wx, wy, wz = w[:, 0:1], w[:, 1:2], w[:, 2:3]
        c00 = ve[:, 0] * (1 - wx) + ve[:, 4] * wx
        c01 = ve[:, 1] * (1 - wx) + ve[:, 5] * wx
        c10 = ve[:, 2] * (1 - wx) + ve[:, 6] * wx
        c11 = ve[:, 3] * (1 - wx) + ve[:, 7] * wx
        c0 = c00 * (1 - wy) + c10 * wy
        c1 = c01 * (1 - wy) + c11 * wy
        outs.append(c0 * (1 - wz) + c1 * wz)
    return jnp.concatenate(outs, axis=-1)


if __name__ == "__main__":
    # Small hyperparameters consistent with the module's constructor args.
    n_levels = 4
    n_features_per_level = 2
    log2_hashmap_size = 12           # TODO(synk): production default is 19 (see header TODO).
    base_resolution = 4
    finest_resolution = 64
    B = 500                          # exercises two 256-point tiles + the padding path

    # Per-level resolutions, computed in float32 exactly like the torch module.
    base = np.float32(base_resolution)
    finest = np.float32(finest_resolution)
    b = np.float32(np.exp((np.log(finest) - np.log(base)) / np.float32(n_levels - 1)))
    resolutions_f32 = np.floor(base * (b ** np.arange(n_levels, dtype=np.float32))
                               ).astype(np.float32)
    resolutions_i32 = jnp.asarray(resolutions_f32.astype(np.int32))

    # Deterministic parameter / input init (f32 tables to match nn.Embedding exactly).
    key = jax.random.PRNGKey(0)
    k_x, k_emb = jax.random.split(key)
    T = 2 ** log2_hashmap_size
    tables = jax.random.uniform(k_emb, (n_levels, T, n_features_per_level),
                                dtype=jnp.float32, minval=-1e-4, maxval=1e-4)
    x = jax.random.uniform(k_x, (B, 3), dtype=jnp.float32, minval=-3.0, maxval=3.0)

    out = hash_embedder_forward(x, tables, resolutions_i32,
                                log2_hashmap_size=log2_hashmap_size)
    out = jax.block_until_ready(out)

    ref = jax.block_until_ready(
        reference_forward(x, tables, resolutions_f32, log2_hashmap_size))

    assert out.shape == (B, n_levels * n_features_per_level), out.shape
    assert np.allclose(np.asarray(out), np.asarray(ref), rtol=2e-2, atol=2e-6), (
        np.max(np.abs(np.asarray(out) - np.asarray(ref))))
    print("KERNEL_OK")
</pallas_src>

<mosaic_0001>
module attributes {stable_mosaic.version = 11 : i64} {
  func.func @_hash_embed_kernel(%arg0: i32, %arg1: i32, %arg2: memref<4xi32, #tpu.memory_space<smem>>, %arg3: memref<3x256xf32, #tpu.memory_space<vmem>>, %arg4: memref<1x256x32xf32, #tpu.memory_space<vmem>>, %arg5: memref<1x2x256xf32, #tpu.memory_space<vmem>>) attributes {dimension_semantics = [#tpu.dimension_semantics<parallel>, #tpu.dimension_semantics<parallel>], iteration_bounds = array<i64: 4, 2>, scalar_prefetch = 1 : i64, scratch_operands = 0 : i64, tpu.core_type = #tpu.core_type<tc>, window_params = [{transform_indices = @transform_0, window_bounds = array<i64: 3, 256>}, {transform_indices = @transform_1, window_bounds = array<i64: 1, 256, 32>}, {transform_indices = @transform_2, window_bounds = array<i64: 1, 2, 256>}]} {
    %0 = arith.index_cast %arg0 : i32 to index
    %1 = memref.load %arg2[%0] : memref<4xi32, #tpu.memory_space<smem>>
    %2 = arith.sitofp %1 : i32 to f32
    %c0 = arith.constant 0 : index
    %c0_0 = arith.constant 0 : index
    %3 = vector.load %arg3[%c0, %c0_0] : memref<3x256xf32, #tpu.memory_space<vmem>>, vector<3x256xf32>
    %c0_1 = arith.constant 0 : index
    %c0_2 = arith.constant 0 : index
    %c0_3 = arith.constant 0 : index
    %4 = vector.load %arg4[%c0_1, %c0_2, %c0_3] : memref<1x256x32xf32, #tpu.memory_space<vmem>>, vector<1x256x32xf32>
    %5 = vector.shape_cast %4 : vector<1x256x32xf32> to vector<256x32xf32>
    %cst = arith.constant -3.000000e+00 : f32
    %cst_4 = arith.constant 3.000000e+00 : f32
    %6 = vector.broadcast %cst : f32 to vector<3x256xf32>
    %7 = arith.maximumf %6, %3 : vector<3x256xf32>
    %8 = vector.broadcast %cst_4 : f32 to vector<3x256xf32>
    %9 = arith.minimumf %8, %7 : vector<3x256xf32>
    %cst_5 = arith.constant 6.000000e+00 : f32
    %10 = arith.divf %cst_5, %2 : f32
    %cst_6 = arith.constant 1.000000e+00 : f32
    %11 = arith.divf %cst_6, %10 : f32
    %cst_7 = arith.constant -3.000000e+00 : f32
    %12 = vector.broadcast %cst_7 : f32 to vector<3x256xf32>
    %13 = arith.subf %9, %12 : vector<3x256xf32>
    %14 = vector.broadcast %10 : f32 to vector<3x256xf32>
    %15 = arith.divf %13, %14 : vector<3x256xf32>
    %16 = math.floor %15 : vector<3x256xf32>
    %17 = vector.broadcast %10 : f32 to vector<3x256xf32>
    %18 = arith.mulf %16, %17 : vector<3x256xf32>
    %cst_8 = arith.constant -3.000000e+00 : f32
    %19 = vector.broadcast %cst_8 : f32 to vector<3x256xf32>
    %20 = arith.addf %18, %19 : vector<3x256xf32>
    %21 = arith.subf %3, %20 : vector<3x256xf32>
    %22 = vector.broadcast %11 : f32 to vector<3x256xf32>
    %23 = arith.mulf %21, %22 : vector<3x256xf32>
    %24 = vector.extract_strided_slice %23 {offsets = [0, 0], sizes = [1, 256], strides = [1, 1]} : vector<3x256xf32> to vector<1x256xf32>
    %25 = vector.extract_strided_slice %23 {offsets = [1, 0], sizes = [1, 256], strides = [1, 1]} : vector<3x256xf32> to vector<1x256xf32>
    %26 = vector.extract_strided_slice %23 {offsets = [2, 0], sizes = [1, 256], strides = [1, 1]} : vector<3x256xf32> to vector<1x256xf32>
    %27 = arith.fptosi %16 : vector<3x256xf32> to vector<3x256xi32>
    %28 = vector.extract_strided_slice %27 {offsets = [0, 0], sizes = [1, 256], strides = [1, 1]} : vector<3x256xi32> to vector<1x256xi32>
    %29 = vector.extract_strided_slice %27 {offsets = [1, 0], sizes = [1, 256], strides = [1, 1]} : vector<3x256xi32> to vector<1x256xi32>
    %30 = vector.extract_strided_slice %27 {offsets = [2, 0], sizes = [1, 256], strides = [1, 1]} : vector<3x256xi32> to vector<1x256xi32>
    %c1_i32 = arith.constant 1 : i32
    %31 = vector.broadcast %c1_i32 : i32 to vector<1x256xi32>
    %32 = arith.addi %28, %31 : vector<1x256xi32>
    %c-1640531535_i32 = arith.constant -1640531535 : i32
    %33 = vector.broadcast %c-1640531535_i32 : i32 to vector<1x256xi32>
    %34 = arith.muli %29, %33 : vector<1x256xi32>
    %c1_i32_9 = arith.constant 1 : i32
    %35 = vector.broadcast %c1_i32_9 : i32 to vector<1x256xi32>
    %36 = arith.addi %29, %35 : vector<1x256xi32>
    %c-1640531535_i32_10 = arith.constant -1640531535 : i32
    %37 = vector.broadcast %c-1640531535_i32_10 : i32 to vector<1x256xi32>
    %38 = arith.muli %36, %37 : vector<1x256xi32>
    %c805459861_i32 = arith.constant 805459861 : i32
    %39 = vector.broadcast %c805459861_i32 : i32 to vector<1x256xi32>
    %40 = arith.muli %30, %39 : vector<1x256xi32>
    %c1_i32_11 = arith.constant 1 : i32
    %41 = vector.broadcast %c1_i32_11 : i32 to vector<1x256xi32>
    %42 = arith.addi %30, %41 : vector<1x256xi32>
    %c805459861_i32_12 = arith.constant 805459861 : i32
    %43 = vector.broadcast %c805459861_i32_12 : i32 to vector<1x256xi32>
    %44 = arith.muli %42, %43 : vector<1x256xi32>
    %cst_13 = arith.constant 1.000000e+00 : f32
    %45 = vector.broadcast %cst_13 : f32 to vector<1x256xf32>
    %46 = arith.subf %45, %24 : vector<1x256xf32>
    %cst_14 = arith.constant 1.000000e+00 : f32
    %47 = vector.broadcast %cst_14 : f32 to vector<1x256xf32>
    %48 = arith.subf %47, %25 : vector<1x256xf32>
    %cst_15 = arith.constant 1.000000e+00 : f32
    %49 = vector.broadcast %cst_15 : f32 to vector<1x256xf32>
    %50 = arith.subf %49, %26 : vector<1x256xf32>
    %51 = tpu.iota {dimensions = array<i32: 0>} : vector<32x1xi32>
    %52 = tpu.iota {dimensions = array<i32: 0>} : vector<128x1xi32>
    %cst_16 = arith.constant 0.000000e+00 : f32
    %53 = vector.broadcast %cst_16 : f32 to vector<1x256xf32>
    %cst_17 = arith.constant 0.000000e+00 : f32
    %54 = vector.broadcast %cst_17 : f32 to vector<1x256xf32>
    %55 = arith.mulf %46, %48 : vector<1x256xf32>
    %56 = arith.xori %28, %34 : vector<1x256xi32>
    %57 = arith.xori %56, %40 : vector<1x256xi32>
    %c4095_i32 = arith.constant 4095 : i32
    %58 = vector.broadcast %c4095_i32 : i32 to vector<1x256xi32>
    %59 = arith.andi %57, %58 : vector<1x256xi32>
    %60 = arith.mulf %55, %50 : vector<1x256xf32>
    %c7_i32 = arith.constant 7 : i32
    %61 = vector.broadcast %c7_i32 : i32 to vector<1x256xi32>
    %62 = arith.shrsi %59, %61 : vector<1x256xi32>
    %c127_i32 = arith.constant 127 : i32
    %63 = vector.broadcast %c127_i32 : i32 to vector<1x256xi32>
    %64 = arith.andi %59, %63 : vector<1x256xi32>
    %65 = vector.broadcast %62 : vector<1x256xi32> to vector<32x256xi32>
    %66 = vector.broadcast %51 : vector<32x1xi32> to vector<32x256xi32>
    %67 = arith.cmpi eq, %65, %66 : vector<32x256xi32>
    %cst_18 = arith.constant 0.000000e+00 : f32
    %68 = vector.shape_cast %60 : vector<1x256xf32> to vector<1x256xf32>
    %69 = vector.broadcast %68 : vector<1x256xf32> to vector<32x256xf32>
    %70 = vector.broadcast %cst_18 : f32 to vector<32x256xf32>
    %71 = arith.select %67, %69, %70 : vector<32x256xi1>, vector<32x256xf32>
    %cst_19 = arith.constant dense<0.000000e+00> : vector<256x256xf32>
    %72 = tpu.matmul %5, %71, %cst_19 {dimension_numbers = #tpu.dot_dimension_numbers<[1], [0], [0], [1], [0, 0, 1, 1], [], []>} : vector<256x32xf32>, vector<32x256xf32>, vector<256x256xf32> -> vector<256x256xf32>
    %73 = vector.broadcast %64 : vector<1x256xi32> to vector<128x256xi32>
    %74 = vector.broadcast %52 : vector<128x1xi32> to vector<128x256xi32>
    %75 = arith.cmpi eq, %73, %74 : vector<128x256xi32>
    %76 = vector.extract_strided_slice %72 {offsets = [0, 0], sizes = [128, 256], strides = [1, 1]} : vector<256x256xf32> to vector<128x256xf32>
    %cst_20 = arith.constant 0.000000e+00 : f32
    %77 = vector.broadcast %cst_20 : f32 to vector<128x256xf32>
    %78 = arith.select %75, %76, %77 : vector<128x256xi1>, vector<128x256xf32>
    %cst_21 = arith.constant dense<0.000000e+00> : vector<256xf32>
    %79 = vector.multi_reduction <add>, %78, %cst_21 [0] : vector<128x256xf32> to vector<256xf32>
    %80 = vector.shape_cast %79 : vector<256xf32> to vector<1x256xf32>
    %81 = arith.addf %53, %80 : vector<1x256xf32>
    %82 = vector.extract_strided_slice %72 {offsets = [128, 0], sizes = [128, 256], strides = [1, 1]} : vector<256x256xf32> to vector<128x256xf32>
    %cst_22 = arith.constant 0.000000e+00 : f32
    %83 = vector.broadcast %cst_22 : f32 to vector<128x256xf32>
    %84 = arith.select %75, %82, %83 : vector<128x256xi1>, vector<128x256xf32>
    %cst_23 = arith.constant dense<0.000000e+00> : vector<256xf32>
    %85 = vector.multi_reduction <add>, %84, %cst_23 [0] : vector<128x256xf32> to vector<256xf32>
    %86 = vector.shape_cast %85 : vector<256xf32> to vector<1x256xf32>
    %87 = arith.addf %54, %86 : vector<1x256xf32>
    %88 = arith.xori %56, %44 : vector<1x256xi32>
    %c4095_i32_24 = arith.constant 4095 : i32
    %89 = vector.broadcast %c4095_i32_24 : i32 to vector<1x256xi32>
    %90 = arith.andi %88, %89 : vector<1x256xi32>
    %91 = arith.mulf %55, %26 : vector<1x256xf32>
    %c7_i32_25 = arith.constant 7 : i32
    %92 = vector.broadcast %c7_i32_25 : i32 to vector<1x256xi32>
    %93 = arith.shrsi %90, %92 : vector<1x256xi32>
    %c127_i32_26 = arith.constant 127 : i32
    %94 = vector.broadcast %c127_i32_26 : i32 to vector<1x256xi32>
    %95 = arith.andi %90, %94 : vector<1x256xi32>
    %96 = vector.broadcast %93 : vector<1x256xi32> to vector<32x256xi32>
    %97 = vector.broadcast %51 : vector<32x1xi32> to vector<32x256xi32>
    %98 = arith.cmpi eq, %96, %97 : vector<32x256xi32>
    %cst_27 = arith.constant 0.000000e+00 : f32
    %99 = vector.shape_cast %91 : vector<1x256xf32> to vector<1x256xf32>
    %100 = vector.broadcast %99 : vector<1x256xf32> to vector<32x256xf32>
    %101 = vector.broadcast %cst_27 : f32 to vector<32x256xf32>
    %102 = arith.select %98, %100, %101 : vector<32x256xi1>, vector<32x256xf32>
    %cst_28 = arith.constant dense<0.000000e+00> : vector<256x256xf32>
    %103 = tpu.matmul %5, %102, %cst_28 {dimension_numbers = #tpu.dot_dimension_numbers<[1], [0], [0], [1], [0, 0, 1, 1], [], []>} : vector<256x32xf32>, vector<32x256xf32>, vector<256x256xf32> -> vector<256x256xf32>
    %104 = vector.broadcast %95 : vector<1x256xi32> to vector<128x256xi32>
    %105 = vector.broadcast %52 : vector<128x1xi32> to vector<128x256xi32>
    %106 = arith.cmpi eq, %104, %105 : vector<128x256xi32>
    %107 = vector.extract_strided_slice %103 {offsets = [0, 0], sizes = [128, 256], strides = [1, 1]} : vector<256x256xf32> to vector<128x256xf32>
    %cst_29 = arith.constant 0.000000e+00 : f32
    %108 = vector.broadcast %cst_29 : f32 to vector<128x256xf32>
    %109 = arith.select %106, %107, %108 : vector<128x256xi1>, vector<128x256xf32>
    %cst_30 = arith.constant dense<0.000000e+00> : vector<256xf32>
    %110 = vector.multi_reduction <add>, %109, %cst_30 [0] : vector<128x256xf32> to vector<256xf32>
    %111 = vector.shape_cast %110 : vector<256xf32> to vector<1x256xf32>
    %112 = arith.addf %81, %111 : vector<1x256xf32>
    %113 = vector.extract_strided_slice %103 {offsets = [128, 0], sizes = [128, 256], strides = [1, 1]} : vector<256x256xf32> to vector<128x256xf32>
    %cst_31 = arith.constant 0.000000e+00 : f32
    %114 = vector.broadcast %cst_31 : f32 to vector<128x256xf32>
    %115 = arith.select %106, %113, %114 : vector<128x256xi1>, vector<128x256xf32>
    %cst_32 = arith.constant dense<0.000000e+00> : vector<256xf32>
    %116 = vector.multi_reduction <add>, %115, %cst_32 [0] : vector<128x256xf32> to vector<256xf32>
    %117 = vector.shape_cast %116 : vector<256xf32> to vector<1x256xf32>
    %118 = arith.addf %87, %117 : vector<1x256xf32>
    %119 = arith.mulf %46, %25 : vector<1x256xf32>
    %120 = arith.xori %28, %38 : vector<1x256xi32>
    %121 = arith.xori %120, %40 : vector<1x256xi32>
    %c4095_i32_33 = arith.constant 4095 : i32
    %122 = vector.broadcast %c4095_i32_33 : i32 to vector<1x256xi32>
    %123 = arith.andi %121, %122 : vector<1x256xi32>
    %124 = arith.mulf %119, %50 : vector<1x256xf32>
    %c7_i32_34 = arith.constant 7 : i32
    %125 = vector.broadcast %c7_i32_34 : i32 to vector<1x256xi32>
    %126 = arith.shrsi %123, %125 : vector<1x256xi32>
    %c127_i32_35 = arith.constant 127 : i32
    %127 = vector.broadcast %c127_i32_35 : i32 to vector<1x256xi32>
    %128 = arith.andi %123, %127 : vector<1x256xi32>
    %129 = vector.broadcast %126 : vector<1x256xi32> to vector<32x256xi32>
    %130 = vector.broadcast %51 : vector<32x1xi32> to vector<32x256xi32>
    %131 = arith.cmpi eq, %129, %130 : vector<32x256xi32>
    %cst_36 = arith.constant 0.000000e+00 : f32
    %132 = vector.shape_cast %124 : vector<1x256xf32> to vector<1x256xf32>
    %133 = vector.broadcast %132 : vector<1x256xf32> to vector<32x256xf32>
    %134 = vector.broadcast %cst_36 : f32 to vector<32x256xf32>
    %135 = arith.select %131, %133, %134 : vector<32x256xi1>, vector<32x256xf32>
    %cst_37 = arith.constant dense<0.000000e+00> : vector<256x256xf32>
    %136 = tpu.matmul %5, %135, %cst_37 {dimension_numbers = #tpu.dot_dimension_numbers<[1], [0], [0], [1], [0, 0, 1, 1], [], []>} : vector<256x32xf32>, vector<32x256xf32>, vector<256x256xf32> -> vector<256x256xf32>
    %137 = vector.broadcast %128 : vector<1x256xi32> to vector<128x256xi32>
    %138 = vector.broadcast %52 : vector<128x1xi32> to vector<128x256xi32>
    %139 = arith.cmpi eq, %137, %138 : vector<128x256xi32>
    %140 = vector.extract_strided_slice %136 {offsets = [0, 0], sizes = [128, 256], strides = [1, 1]} : vector<256x256xf32> to vector<128x256xf32>
    %cst_38 = arith.constant 0.000000e+00 : f32
    %141 = vector.broadcast %cst_38 : f32 to vector<128x256xf32>
    %142 = arith.select %139, %140, %141 : vector<128x256xi1>, vector<128x256xf32>
    %cst_39 = arith.constant dense<0.000000e+00> : vector<256xf32>
    %143 = vector.multi_reduction <add>, %142, %cst_39 [0] : vector<128x256xf32> to vector<256xf32>
    %144 = vector.shape_cast %143 : vector<256xf32> to vector<1x256xf32>
    %145 = arith.addf %112, %144 : vector<1x256xf32>
    %146 = vector.extract_strided_slice %136 {offsets = [128, 0], sizes = [128, 256], strides = [1, 1]} : vector<256x256xf32> to vector<128x256xf32>
    %cst_40 = arith.constant 0.000000e+00 : f32
    %147 = vector.broadcast %cst_40 : f32 to vector<128x256xf32>
    %148 = arith.select %139, %146, %147 : vector<128x256xi1>, vector<128x256xf32>
    %cst_41 = arith.constant dense<0.000000e+00> : vector<256xf32>
    %149 = vector.multi_reduction <add>, %148, %cst_41 [0] : vector<128x256xf32> to vector<256xf32>
    %150 = vector.shape_cast %149 : vector<256xf32> to vector<1x256xf32>
    %151 = arith.addf %118, %150 : vector<1x256xf32>
    %152 = arith.xori %120, %44 : vector<1x256xi32>
    %c4095_i32_42 = arith.constant 4095 : i32
    %153 = vector.broadcast %c4095_i32_42 : i32 to vector<1x256xi32>
    %154 = arith.andi %152, %153 : vector<1x256xi32>
    %155 = arith.mulf %119, %26 : vector<1x256xf32>
    %c7_i32_43 = arith.constant 7 : i32
    %156 = vector.broadcast %c7_i32_43 : i32 to vector<1x256xi32>
    %157 = arith.shrsi %154, %156 : vector<1x256xi32>
    %c127_i32_44 = arith.constant 127 : i32
    %158 = vector.broadcast %c127_i32_44 : i32 to vector<1x256xi32>
    %159 = arith.andi %154, %158 : vector<1x256xi32>
    %160 = vector.broadcast %157 : vector<1x256xi32> to vector<32x256xi32>
    %161 = vector.broadcast %51 : vector<32x1xi32> to vector<32x256xi32>
    %162 = arith.cmpi eq, %160, %161 : vector<32x256xi32>
    %cst_45 = arith.constant 0.000000e+00 : f32
    %163 = vector.shape_cast %155 : vector<1x256xf32> to vector<1x256xf32>
    %164 = vector.broadcast %163 : vector<1x256xf32> to vector<32x256xf32>
    %165 = vector.broadcast %cst_45 : f32 to vector<32x256xf32>
    %166 = arith.select %162, %164, %165 : vector<32x256xi1>, vector<32x256xf32>
    %cst_46 = arith.constant dense<0.000000e+00> : vector<256x256xf32>
    %167 = tpu.matmul %5, %166, %cst_46 {dimension_numbers = #tpu.dot_dimension_numbers<[1], [0], [0], [1], [0, 0, 1, 1], [], []>} : vector<256x32xf32>, vector<32x256xf32>, vector<256x256xf32> -> vector<256x256xf32>
    %168 = vector.broadcast %159 : vector<1x256xi32> to vector<128x256xi32>
    %169 = vector.broadcast %52 : vector<128x1xi32> to vector<128x256xi32>
    %170 = arith.cmpi eq, %168, %169 : vector<128x256xi32>
    %171 = vector.extract_strided_slice %167 {offsets = [0, 0], sizes = [128, 256], strides = [1, 1]} : vector<256x256xf32> to vector<128x256xf32>
    %cst_47 = arith.constant 0.000000e+00 : f32
    %172 = vector.broadcast %cst_47 : f32 to vector<128x256xf32>
    %173 = arith.select %170, %171, %172 : vector<128x256xi1>, vector<128x256xf32>
    %cst_48 = arith.constant dense<0.000000e+00> : vector<256xf32>
    %174 = vector.multi_reduction <add>, %173, %cst_48 [0] : vector<128x256xf32> to vector<256xf32>
    %175 = vector.shape_cast %174 : vector<256xf32> to vector<1x256xf32>
    %176 = arith.addf %145, %175 : vector<1x256xf32>
    %177 = vector.extract_strided_slice %167 {offsets = [128, 0], sizes = [128, 256], strides = [1, 1]} : vector<256x256xf32> to vector<128x256xf32>
    %cst_49 = arith.constant 0.000000e+00 : f32
    %178 = vector.broadcast %cst_49 : f32 to vector<128x256xf32>
    %179 = arith.select %170, %177, %178 : vector<128x256xi1>, vector<128x256xf32>
    %cst_50 = arith.constant dense<0.000000e+00> : vector<256xf32>
    %180 = vector.multi_reduction <add>, %179, %cst_50 [0] : vector<128x256xf32> to vector<256xf32>
    %181 = vector.shape_cast %180 : vector<256xf32> to vector<1x256xf32>
    %182 = arith.addf %151, %181 : vector<1x256xf32>
    %183 = arith.mulf %24, %48 : vector<1x256xf32>
    %184 = arith.xori %32, %34 : vector<1x256xi32>
    %185 = arith.xori %184, %40 : vector<1x256xi32>
    %c4095_i32_51 = arith.constant 4095 : i32
    %186 = vector.broadcast %c4095_i32_51 : i32 to vector<1x256xi32>
    %187 = arith.andi %185, %186 : vector<1x256xi32>
    %188 = arith.mulf %183, %50 : vector<1x256xf32>
    %c7_i32_52 = arith.constant 7 : i32
    %189 = vector.broadcast %c7_i32_52 : i32 to vector<1x256xi32>
    %190 = arith.shrsi %187, %189 : vector<1x256xi32>
    %c127_i32_53 = arith.constant 127 : i32
    %191 = vector.broadcast %c127_i32_53 : i32 to vector<1x256xi32>
    %192 = arith.andi %187, %191 : vector<1x256xi32>
    %193 = vector.broadcast %190 : vector<1x256xi32> to vector<32x256xi32>
    %194 = vector.broadcast %51 : vector<32x1xi32> to vector<32x256xi32>
    %195 = arith.cmpi eq, %193, %194 : vector<32x256xi32>
    %cst_54 = arith.constant 0.000000e+00 : f32
    %196 = vector.shape_cast %188 : vector<1x256xf32> to vector<1x256xf32>
    %197 = vector.broadcast %196 : vector<1x256xf32> to vector<32x256xf32>
    %198 = vector.broadcast %cst_54 : f32 to vector<32x256xf32>
    %199 = arith.select %195, %197, %198 : vector<32x256xi1>, vector<32x256xf32>
    %cst_55 = arith.constant dense<0.000000e+00> : vector<256x256xf32>
    %200 = tpu.matmul %5, %199, %cst_55 {dimension_numbers = #tpu.dot_dimension_numbers<[1], [0], [0], [1], [0, 0, 1, 1], [], []>} : vector<256x32xf32>, vector<32x256xf32>, vector<256x256xf32> -> vector<256x256xf32>
    %201 = vector.broadcast %192 : vector<1x256xi32> to vector<128x256xi32>
    %202 = vector.broadcast %52 : vector<128x1xi32> to vector<128x256xi32>
    %203 = arith.cmpi eq, %201, %202 : vector<128x256xi32>
    %204 = vector.extract_strided_slice %200 {offsets = [0, 0], sizes = [128, 256], strides = [1, 1]} : vector<256x256xf32> to vector<128x256xf32>
    %cst_56 = arith.constant 0.000000e+00 : f32
    %205 = vector.broadcast %cst_56 : f32 to vector<128x256xf32>
    %206 = arith.select %203, %204, %205 : vector<128x256xi1>, vector<128x256xf32>
    %cst_57 = arith.constant dense<0.000000e+00> : vector<256xf32>
    %207 = vector.multi_reduction <add>, %206, %cst_57 [0] : vector<128x256xf32> to vector<256xf32>
    %208 = vector.shape_cast %207 : vector<256xf32> to vector<1x256xf32>
    %209 = arith.addf %176, %208 : vector<1x256xf32>
    %210 = vector.extract_strided_slice %200 {offsets = [128, 0], sizes = [128, 256], strides = [1, 1]} : vector<256x256xf32> to vector<128x256xf32>
    %cst_58 = arith.constant 0.000000e+00 : f32
    %211 = vector.broadcast %cst_58 : f32 to vector<128x256xf32>
    %212 = arith.select %203, %210, %211 : vector<128x256xi1>, vector<128x256xf32>
    %cst_59 = arith.constant dense<0.000000e+00> : vector<256xf32>
    %213 = vector.multi_reduction <add>, %212, %cst_59 [0] : vector<128x256xf32> to vector<256xf32>
    %214 = vector.shape_cast %213 : vector<256xf32> to vector<1x256xf32>
    %215 = arith.addf %182, %214 : vector<1x256xf32>
    %216 = arith.xori %184, %44 : vector<1x256xi32>
    %c4095_i32_60 = arith.constant 4095 : i32
    %217 = vector.broadcast %c4095_i32_60 : i32 to vector<1x256xi32>
    %218 = arith.andi %216, %217 : vector<1x256xi32>
    %219 = arith.mulf %183, %26 : vector<1x256xf32>
    %c7_i32_61 = arith.constant 7 : i32
    %220 = vector.broadcast %c7_i32_61 : i32 to vector<1x256xi32>
    %221 = arith.shrsi %218, %220 : vector<1x256xi32>
    %c127_i32_62 = arith.constant 127 : i32
    %222 = vector.broadcast %c127_i32_62 : i32 to vector<1x256xi32>
    %223 = arith.andi %218, %222 : vector<1x256xi32>
    %224 = vector.broadcast %221 : vector<1x256xi32> to vector<32x256xi32>
    %225 = vector.broadcast %51 : vector<32x1xi32> to vector<32x256xi32>
    %226 = arith.cmpi eq, %224, %225 : vector<32x256xi32>
    %cst_63 = arith.constant 0.000000e+00 : f32
    %227 = vector.shape_cast %219 : vector<1x256xf32> to vector<1x256xf32>
    %228 = vector.broadcast %227 : vector<1x256xf32> to vector<32x256xf32>
    %229 = vector.broadcast %cst_63 : f32 to vector<32x256xf32>
    %230 = arith.select %226, %228, %229 : vector<32x256xi1>, vector<32x256xf32>
    %cst_64 = arith.constant dense<0.000000e+00> : vector<256x256xf32>
    %231 = tpu.matmul %5, %230, %cst_64 {dimension_numbers = #tpu.dot_dimension_numbers<[1], [0], [0], [1], [0, 0, 1, 1], [], []>} : vector<256x32xf32>, vector<32x256xf32>, vector<256x256xf32> -> vector<256x256xf32>
    %232 = vector.broadcast %223 : vector<1x256xi32> to vector<128x256xi32>
    %233 = vector.broadcast %52 : vector<128x1xi32> to vector<128x256xi32>
    %234 = arith.cmpi eq, %232, %233 : vector<128x256xi32>
    %235 = vector.extract_strided_slice %231 {offsets = [0, 0], sizes = [128, 256], strides = [1, 1]} : vector<256x256xf32> to vector<128x256xf32>
    %cst_65 = arith.constant 0.000000e+00 : f32
    %236 = vector.broadcast %cst_65 : f32 to vector<128x256xf32>
    %237 = arith.select %234, %235, %236 : vector<128x256xi1>, vector<128x256xf32>
    %cst_66 = arith.constant dense<0.000000e+00> : vector<256xf32>
    %238 = vector.multi_reduction <add>, %237, %cst_66 [0] : vector<128x256xf32> to vector<256xf32>
    %239 = vector.shape_cast %238 : vector<256xf32> to vector<1x256xf32>
    %240 = arith.addf %209, %239 : vector<1x256xf32>
    %241 = vector.extract_strided_slice %231 {offsets = [128, 0], sizes = [128, 256], strides = [1, 1]} : vector<256x256xf32> to vector<128x256xf32>
    %cst_67 = arith.constant 0.000000e+00 : f32
    %242 = vector.broadcast %cst_67 : f32 to vector<128x256xf32>
    %243 = arith.select %234, %241, %242 : vector<128x256xi1>, vector<128x256xf32>
    %cst_68 = arith.constant dense<0.000000e+00> : vector<256xf32>
    %244 = vector.multi_reduction <add>, %243, %cst_68 [0] : vector<128x256xf32> to vector<256xf32>
    %245 = vector.shape_cast %244 : vector<256xf32> to vector<1x256xf32>
    %246 = arith.addf %215, %245 : vector<1x256xf32>
    %247 = arith.mulf %24, %25 : vector<1x256xf32>
    %248 = arith.xori %32, %38 : vector<1x256xi32>
    %249 = arith.xori %248, %40 : vector<1x256xi32>
    %c4095_i32_69 = arith.constant 4095 : i32
    %250 = vector.broadcast %c4095_i32_69 : i32 to vector<1x256xi32>
    %251 = arith.andi %249, %250 : vector<1x256xi32>
    %252 = arith.mulf %247, %50 : vector<1x256xf32>
    %c7_i32_70 = arith.constant 7 : i32
    %253 = vector.broadcast %c7_i32_70 : i32 to vector<1x256xi32>
    %254 = arith.shrsi %251, %253 : vector<1x256xi32>
    %c127_i32_71 = arith.constant 127 : i32
    %255 = vector.broadcast %c127_i32_71 : i32 to vector<1x256xi32>
    %256 = arith.andi %251, %255 : vector<1x256xi32>
    %257 = vector.broadcast %254 : vector<1x256xi32> to vector<32x256xi32>
    %258 = vector.broadcast %51 : vector<32x1xi32> to vector<32x256xi32>
    %259 = arith.cmpi eq, %257, %258 : vector<32x256xi32>
    %cst_72 = arith.constant 0.000000e+00 : f32
    %260 = vector.shape_cast %252 : vector<1x256xf32> to vector<1x256xf32>
    %261 = vector.broadcast %260 : vector<1x256xf32> to vector<32x256xf32>
    %262 = vector.broadcast %cst_72 : f32 to vector<32x256xf32>
    %263 = arith.select %259, %261, %262 : vector<32x256xi1>, vector<32x256xf32>
    %cst_73 = arith.constant dense<0.000000e+00> : vector<256x256xf32>
    %264 = tpu.matmul %5, %263, %cst_73 {dimension_numbers = #tpu.dot_dimension_numbers<[1], [0], [0], [1], [0, 0, 1, 1], [], []>} : vector<256x32xf32>, vector<32x256xf32>, vector<256x256xf32> -> vector<256x256xf32>
    %265 = vector.broadcast %256 : vector<1x256xi32> to vector<128x256xi32>
    %266 = vector.broadcast %52 : vector<128x1xi32> to vector<128x256xi32>
    %267 = arith.cmpi eq, %265, %266 : vector<128x256xi32>
    %268 = vector.extract_strided_slice %264 {offsets = [0, 0], sizes = [128, 256], strides = [1, 1]} : vector<256x256xf32> to vector<128x256xf32>
    %cst_74 = arith.constant 0.000000e+00 : f32
    %269 = vector.broadcast %cst_74 : f32 to vector<128x256xf32>
    %270 = arith.select %267, %268, %269 : vector<128x256xi1>, vector<128x256xf32>
    %cst_75 = arith.constant dense<0.000000e+00> : vector<256xf32>
    %271 = vector.multi_reduction <add>, %270, %cst_75 [0] : vector<128x256xf32> to vector<256xf32>
    %272 = vector.shape_cast %271 : vector<256xf32> to vector<1x256xf32>
    %273 = arith.addf %240, %272 : vector<1x256xf32>
    %274 = vector.extract_strided_slice %264 {offsets = [128, 0], sizes = [128, 256], strides = [1, 1]} : vector<256x256xf32> to vector<128x256xf32>
    %cst_76 = arith.constant 0.000000e+00 : f32
    %275 = vector.broadcast %cst_76 : f32 to vector<128x256xf32>
    %276 = arith.select %267, %274, %275 : vector<128x256xi1>, vector<128x256xf32>
    %cst_77 = arith.constant dense<0.000000e+00> : vector<256xf32>
    %277 = vector.multi_reduction <add>, %276, %cst_77 [0] : vector<128x256xf32> to vector<256xf32>
    %278 = vector.shape_cast %277 : vector<256xf32> to vector<1x256xf32>
    %279 = arith.addf %246, %278 : vector<1x256xf32>
    %280 = arith.xori %248, %44 : vector<1x256xi32>
    %c4095_i32_78 = arith.constant 4095 : i32
    %281 = vector.broadcast %c4095_i32_78 : i32 to vector<1x256xi32>
    %282 = arith.andi %280, %281 : vector<1x256xi32>
    %283 = arith.mulf %247, %26 : vector<1x256xf32>
    %c7_i32_79 = arith.constant 7 : i32
    %284 = vector.broadcast %c7_i32_79 : i32 to vector<1x256xi32>
    %285 = arith.shrsi %282, %284 : vector<1x256xi32>
    %c127_i32_80 = arith.constant 127 : i32
    %286 = vector.broadcast %c127_i32_80 : i32 to vector<1x256xi32>
    %287 = arith.andi %282, %286 : vector<1x256xi32>
    %288 = vector.broadcast %285 : vector<1x256xi32> to vector<32x256xi32>
    %289 = vector.broadcast %51 : vector<32x1xi32> to vector<32x256xi32>
    %290 = arith.cmpi eq, %288, %289 : vector<32x256xi32>
    %cst_81 = arith.constant 0.000000e+00 : f32
    %291 = vector.shape_cast %283 : vector<1x256xf32> to vector<1x256xf32>
    %292 = vector.broadcast %291 : vector<1x256xf32> to vector<32x256xf32>
    %293 = vector.broadcast %cst_81 : f32 to vector<32x256xf32>
    %294 = arith.select %290, %292, %293 : vector<32x256xi1>, vector<32x256xf32>
    %cst_82 = arith.constant dense<0.000000e+00> : vector<256x256xf32>
    %295 = tpu.matmul %5, %294, %cst_82 {dimension_numbers = #tpu.dot_dimension_numbers<[1], [0], [0], [1], [0, 0, 1, 1], [], []>} : vector<256x32xf32>, vector<32x256xf32>, vector<256x256xf32> -> vector<256x256xf32>
    %296 = vector.broadcast %287 : vector<1x256xi32> to vector<128x256xi32>
    %297 = vector.broadcast %52 : vector<128x1xi32> to vector<128x256xi32>
    %298 = arith.cmpi eq, %296, %297 : vector<128x256xi32>
    %299 = vector.extract_strided_slice %295 {offsets = [0, 0], sizes = [128, 256], strides = [1, 1]} : vector<256x256xf32> to vector<128x256xf32>
    %cst_83 = arith.constant 0.000000e+00 : f32
    %300 = vector.broadcast %cst_83 : f32 to vector<128x256xf32>
    %301 = arith.select %298, %299, %300 : vector<128x256xi1>, vector<128x256xf32>
    %cst_84 = arith.constant dense<0.000000e+00> : vector<256xf32>
    %302 = vector.multi_reduction <add>, %301, %cst_84 [0] : vector<128x256xf32> to vector<256xf32>
    %303 = vector.shape_cast %302 : vector<256xf32> to vector<1x256xf32>
    %304 = arith.addf %273, %303 : vector<1x256xf32>
    %305 = vector.extract_strided_slice %295 {offsets = [128, 0], sizes = [128, 256], strides = [1, 1]} : vector<256x256xf32> to vector<128x256xf32>
    %cst_85 = arith.constant 0.000000e+00 : f32
    %306 = vector.broadcast %cst_85 : f32 to vector<128x256xf32>
    %307 = arith.select %298, %305, %306 : vector<128x256xi1>, vector<128x256xf32>
    %cst_86 = arith.constant dense<0.000000e+00> : vector<256xf32>
    %308 = vector.multi_reduction <add>, %307, %cst_86 [0] : vector<128x256xf32> to vector<256xf32>
    %309 = vector.shape_cast %308 : vector<256xf32> to vector<1x256xf32>
    %310 = arith.addf %279, %309 : vector<1x256xf32>
    %311 = tpu.concatenate %304, %310 in 0 : vector<1x256xf32>, vector<1x256xf32> -> vector<2x256xf32>
    %c0_87 = arith.constant 0 : index
    %c0_88 = arith.constant 0 : index
    %c0_89 = arith.constant 0 : index
    %312 = vector.load %arg5[%c0_87, %c0_88, %c0_89] : memref<1x2x256xf32, #tpu.memory_space<vmem>>, vector<1x2x256xf32>
    %313 = vector.shape_cast %312 : vector<1x2x256xf32> to vector<2x256xf32>
    %314 = vector.shape_cast %311 : vector<2x256xf32> to vector<1x2x256xf32>
    tpu.vector_store %arg5[%c0_87, %c0_88, %c0_89], %314 {strides = array<i32>} : memref<1x2x256xf32, #tpu.memory_space<vmem>>, vector<1x2x256xf32>,
    return
  }
  func.func @transform_0(%arg0: i32, %arg1: i32, %arg2: memref<4xi32, #tpu.memory_space<smem>>) -> (i32, i32) {
    %c0_i32 = arith.constant 0 : i32
    %c0_i32_0 = arith.constant 0 : i32
    return %c0_i32, %arg1 : i32, i32
  }
  func.func @transform_1(%arg0: i32, %arg1: i32, %arg2: memref<4xi32, #tpu.memory_space<smem>>) -> (i32, i32, i32) {
    %c0_i32 = arith.constant 0 : i32
    %c0_i32_0 = arith.constant 0 : i32
    %c0_i32_1 = arith.constant 0 : i32
    return %arg0, %c0_i32, %c0_i32_0 : i32, i32, i32
  }
  func.func @transform_2(%arg0: i32, %arg1: i32, %arg2: memref<4xi32, #tpu.memory_space<smem>>) -> (i32, i32, i32) {
    %c0_i32 = arith.constant 0 : i32
    %c0_i32_0 = arith.constant 0 : i32
    return %arg0, %c0_i32, %arg1 : i32, i32, i32
  }
}

</mosaic_0001>

<bundles_post_ra>
// kernel: tpu_custom_call.1
= control target key start
LH: loop header
LB: loop body
LE: loop exit
PB: predicated region body
PF: predicated region fallthrough
CT: control target
= control target key end

     0   :  { %s9056_s0 = inlined_call_operand.vmem [shape: s32[4], index: 0, kind: input, shape index: {}]   ;;  %s9057_s1 = inlined_call_operand.vmem [shape: f32[3,512], index: 1, kind: input, shape index: {}]   ;;  %s9058_s2 = inlined_call_operand.vmem [shape: f32[4,256,32], index: 2, kind: input, shape index: {}]   ;;  %s9059_s3 = inlined_call_operand.hbm [shape: f32[4,2,512], index: 3, kind: output, shape index: {}]  }
   0x1   :  { %s8_s14 = sshll.u32 %s9056_s0, 4  ;;  %s9_s14 = int_to_ptr.vmem [resolvable:$true] %s8_s14 }
   0x2   :  { %s5195_s15 = scalar_lea.vmem %s9_s14, 16  ;;  %p5200_p1 = scmp.lt.s32.totalorder %s9_s14, %s9_s14 }
   0x3   :  { %p5196_p0 = scmp.ne.s32.totalorder %s9_s14, %s5195_s15  ;;  %p5201_p2 = scmp.lt.s32.totalorder %s5195_s15, %s5195_s15 }
   0x5   :  { %p5202_p3 = por %p5201_p2, %p5200_p1 }
   0x7   :  { %p5203_p4 = pnand %p5202_p3, %p5196_p0 }
   0x9   :  { %5206 = shalt.err (!%p5203_p4)  }
   0xa   :  { %s5305_s16 = smov [#allocation3]  }
   0xb   :  { %11 = dma.vmem_to_smem %s9_s14, 16, %s5305_s16, [#allocation2] }
   0xc   :  { %5267 = dma.done.wait [#allocation2], 16 }
   0xd   :  { %5268 = vsyncadd [#allocation2], 4294967280 }
   0xe   :  { %13 = sfence }
   0xf   :  { %14 = vsyncpa [#allocation5], 0 }
  0x10   :  { %16 = vsyncpa [#allocation5 + $0x1], 0  ;;  %s5331_s17 = smov 0   ;;  %s5333_s18 = smov 0  }
  0x11   :  { %s5335_s0 = smov 0   ;;  %s5337_s19 = smov 0  }
  0x12   :  { %s5339_s20 = smov 0   ;;  %s5341_s21 = smov 0  }
  0x13   :  { %s5343_s22 = smov 0   ;;  %s5345_s23 = smov 0  }
  0x14 LB: > { %s4612_s24 = sadd.s32 4294967295, %s5303_s23   ;;  %s4613_s25 = sadd.s32 4294967294, %s5303_s23   ;;  %s5303_s23 = sphi %s5345_s23, %s22_s23   ;;  %s5299_s22 = sphi %s5343_s22, %s9521_s22   ;;  %s5295_s21 = sphi %s5341_s21, %s9520_s21   ;;  %s5291_s20 = sphi %s5339_s20, %s9519_s20   ;;  %s5287_s19 = sphi %s5337_s19, %s9518_s19   ;;  %s5283_s0 = sphi %s5335_s0, %s9517_s0   ;;  %s5279_s18 = sphi %s5333_s18, %s9516_s18   ;;  %s5275_s17 = sphi %s5331_s17, %s9515_s17  }
  0x15   : > { %s31_s26 = sadd.s32 1, %s5295_s21  ;;  %s34_s27 = sadd.s32 1, %s5299_s22 }
  0x16   : > { %p32_p5 = scmp.ge.s32.totalorder %s31_s26, 2  ;;  %p105_p6 = scmp.ne.s32.totalorder %s5283_s0, %s5279_s18 }
  0x17   : > { %p106_p7 = scmp.eq.s32.totalorder %s4612_s24, 7  ;;  %p111_p10 = scmp.ne.s32.totalorder %s5279_s18, %s5275_s17 }
  0x18   : > { %s9523_s26 = smov (%p32_p5, %s31_s26), 0  ;;  %s9525_s27 = smov (!%p32_p5, %s34_s27), %s5299_s22 }
  0x19   : > { %s91_s28 = ssub.s32 %s5295_s21, %s9523_s26  ;;  %p5382_p8 = por %p106_p7, %p105_p6 }
  0x1a   : > { %p36_p9 = scmp.ge.s32.totalorder %s9525_s27, 4  ;;  %p112_p11 = scmp.eq.s32.totalorder %s4613_s25, 7 }
  0x1b   : > { %p4616_p12 = scmp.ge.s32.totalorder %s5303_s23, 1  ;;  %p147_p0 = scmp.lt.s32.totalorder %s5303_s23, 9 }
  0x1c   : > { %s9527_s27 = smov (%p36_p9, %s9525_s27), 0  ;;  %p5391_p13 = por %p112_p11, %p111_p10 }
  0x1d   : > { %s90_s4 = ssub.s32 %s5299_s22, %s9527_s27  ;;  %s95_s5 = sadd.s32 1, %s5283_s0 }
  0x1e   : > { %s92_s6 = sor.u32 %s91_s28, %s90_s4  ;;  %p148_p1 = pnand %p4616_p12, %p147_p0 }
  0x1f   : > { %p93_p2 = scmp.eq.s32.totalorder %s92_s6, 0 }
  0x20   : > { %151 = sbr.rel (%p148_p1) target bundleno = 957 (0x3bd), region = 28 }
  0x21   : > { %s5400_s7 = scalar_select %p93_p2, %s5283_s0, %s95_s5  }
  0x27   : > { %s186_s8 = sld [smem:[#allocation3 + %s5291_s20]]  ;;  %v9073_v2 = vmov 0.0   ;;  %s5406_s10 = sshll.u32 %s5287_s19, 1  ;;  %v247_v15 = vlaneseq }
  0x28   : > { %494 = vmatprep.mubr.f32.mxu0 %v9073_v2  ;;  %1013 = vmatprep.mubr.f32.mxu1 %v9073_v2  ;;  %p175_p3 = scmp.lt.s32.totalorder %s5406_s10, 3  ;;  %p180_p4 = scmp.lt.s32.totalorder %s5291_s20, 3 }
  0x29   : > { %v5419_v23 = vshrl.u32 %v247_v15, 7 }
  0x2a   : > { %s176_s11 = scalar_select %p175_p3, %s5406_s10, 3 }
  0x2b   : > { %v5422_v33 = vsub.s32 4, %v5419_v23  ;;  %s5603_s25 = scalar_select %p180_p4, %s5291_s20, 3 }
  0x2c   : > { %s4619_s12 = sshll.u32 %s176_s11, 2  ;;  %s4947_s11 = sshll.u32 %s5291_s20, 2 }
  0x2d   : > { %s187_s9 = scvt.s32.f32 %s186_s8  ;;  %s178_s16 = scalar_lea.vmem %s9057_s1, %s4619_s12 }
  0x2e   : > { %v5415_v4 = vld [vmem:[%s178_s16] sm:$0x77]  ;;  %s4951_s28 = sshll.u32 %s5603_s25, 8  ;;  %s171_s8 = sand.u32 1, %s5279_s18  }
  0x2f   : > { %v223_v0 = vstv %s187_s9  ;;  %v4622_v5 = vclamps-f32 %v5415_v4, 3.0  ;;  %s5695_s6 = scalar_lea.vmem %s9058_s2, %s4951_s28  ;;  %s4617_s9 = sshll.u32 %s171_s8, 2 }
  0x30   : > { %5127 = vrcp.f32 %v223_v0  ;;  %s4523_s12 = sadd.s32 %s4947_s11, %s5406_s10  ;;  %s173_s14 = scalar_lea.vmem [#allocation4], %s4617_s9 }
  0x31   : > { %v4623_v6 = vadd.f32 3.0, %v4622_v5  ;;  %s4527_s15 = sshll.u32 %s173_s14, 4  ;;  %s4511_s10 = scalar_lea.sflag [#allocation5], %s171_s8  ;;  %s9005_s15 = int_to_ptr.vmem [resolvable:$true] %s4527_s15 }
  0x32   : > { %s5307_s25 = smov [#allocation4]  }
  0x33   : > { %s5211_s28 = sshll.u32 %s5307_s25, 4  ;;  %s5212_s28 = int_to_ptr.vmem [resolvable:$false] %s5211_s28 }
  0x34   : > { %s5213_s4 = scalar_lea.vmem %s5212_s28, 128  ;;  %p5214_p9 = scmp.lt.s32.totalorder %s9005_s15, %s5212_s28 }
  0x3a   : > { %v5128_v1 = vpop.eup %5127 }
  0x3b   : > { %5048 = vpush %v5128_v1 }
  0x6c   : > { %s5049_s13 = spop %5048 }
  0x6d   : > { %s226_s24 = smul.f32 6.0, %s5049_s13  ;;  %s4948_s13 = sshll.u32 %s4523_s12, 5 }
  0x6f   : > { %v5413_v3 = vstv %s226_s24  ;;  %s9003_s24 = scalar_lea.hbm %s9059_s3, %s4948_s13 }
  0x70   : > { %5129 = vrcp.f32 %v5413_v3 }
  0x7a   : > { %v5130_v7 = vpop.eup %5129 }
  0x7b   : > { %v233_v8 = vmul.f32 %v5130_v7, %v4623_v6  ;;  %5050 = vpush %v5130_v7  ;;  %v5493_v7 = vsub.s32 0, %v5419_v23 }
  0x7d   : > { %v234_v9 = vfloor.f32 %v233_v8 }
  0x7f   : > { %v5052_v10 = vtrunc.f32 %v234_v9  ;;  %v235_v0 = vmul.f32 %v234_v9, %v5413_v3 }
  0x81   : > { %v5053_v11 = vcvt.f32.s32 %v5052_v10  ;;  %v236_v10 = vadd.f32 -3.0, %v235_v0 }
  0x83   : > { %v241_v12 = vadd.s32 1, %v5053_v11  ;;  %v242_v13 = vmul.u32 2654435761, %v5053_v11  ;;  %v244_v14 = vmul.u32 805459861, %v5053_v11  ;;  %v237_v15 = vsub.f32 %v5415_v4, %v236_v10 }
  0x85   : > { %v243_v16 = vmul.u32 2654435761, %v241_v12  ;;  %v245_v17 = vmul.u32 805459861, %v241_v12  ;;  %v269_v18 = vrot.slane %v242_v13, 5  ;;  %v272_v19 = vrot.slane %v244_v14, 6 }
  0x87   : > { %v270_v20 = vrot.slane %v269_v18, 4  ;;  %v887_v21 = vrot.slane %v245_v17, 6  ;;  %v1410_v22 = vrot.slane %v243_v16, 5  ;;  %v273_v24 = vrot.slane %v272_v19, 4 }
  0x89   : > { %v271_v25 = vxor.u32 %v5053_v11, %v270_v20  ;;  %v888_v26 = vrot.slane %v887_v21, 4  ;;  %v1411_v27 = vrot.slane %v1410_v22, 4  ;;  %v2440_v28 = vxor.u32 %v270_v20, %v241_v12 }
  0x8a   : > { %v5517_v21 = vadd.s32 8, %v5419_v23  ;;  %v5520_v22 = vadd.s32 16, %v5419_v23 }
  0x8b   : > { %v274_v29 = vxor.u32 %v273_v24, %v271_v25  ;;  %v889_v30 = vxor.u32 %v888_v26, %v271_v25  ;;  %v1412_v31 = vxor.u32 %v5053_v11, %v1411_v27  ;;  %v2441_v32 = vxor.u32 %v2440_v28, %v273_v24 }
  0x8c   : > { %v2954_v34 = vxor.u32 %v2440_v28, %v888_v26  ;;  %v3468_v35 = vxor.u32 %v1411_v27, %v241_v12 }
  0x8d   : > { %v5424_v36 = vand.u32 4095, %v274_v29  ;;  %v5426_v37 = vand.u32 4095, %v889_v30  ;;  %v1413_v38 = vxor.u32 %v1412_v31, %v273_v24  ;;  %v1926_v39 = vxor.u32 %v1412_v31, %v888_v26 }
  0x8e   : > { %v5428_v40 = vand.u32 4095, %v2441_v32  ;;  %v5430_v41 = vand.u32 4095, %v2954_v34  ;;  %v3469_v42 = vxor.u32 %v3468_v35, %v273_v24  ;;  %v3982_v43 = vxor.u32 %v3468_v35, %v888_v26 }
  0x8f   : > { %v9069_v44 = vand.u32 127, %v5424_v36  ;;  %v9068_v45 = vand.u32 127, %v5426_v37  ;;  %v5434_v46 = vand.u32 4095, %v1413_v38  ;;  %v5436_v47 = vand.u32 4095, %v1926_v39 }
  0x90   : > { %9274 = vst [vmem:[#allocation8_spill] sm:$0xff] %v5428_v40  ;;  %9275 = vst [vmem:[#allocation9_spill] sm:$0xff] %v5430_v41  ;;  %v9063_v48 = vand.u32 127, %v5428_v40  ;;  %v9062_v51 = vand.u32 127, %v5430_v41  ;;  %v5457_v55 = vand.u32 4095, %v3469_v42  ;;  %v5459_v56 = vand.u32 4095, %v3982_v43 }
  0x91   : > { %v5442_v49 = vrot.slane %v9069_v44, %v5422_v33  ;;  %v5447_v50 = vrot.slane %v9068_v45, %v5422_v33  ;;  %v9065_v52 = vand.u32 127, %v5434_v46  ;;  %v9064_v53 = vand.u32 127, %v5436_v47  ;;  %v6030_v45 = vld [vmem:[%s5695_s6 + $0xc8] sm:$0xff]  ;;  %v6039_v44 = vld [vmem:[%s5695_s6 + $0xd0] sm:$0xff] }
  0x92   : > { %v5455_v54 = vrot.slane %v9063_v48, %v5422_v33  ;;  %v5474_v59 = vrot.slane %v9062_v51, %v5422_v33  ;;  %v9061_v60 = vand.u32 127, %v5457_v55  ;;  %v9060_v61 = vand.u32 127, %v5459_v56  ;;  %v5976_v51 = vld [vmem:[%s5695_s6 + $0x98] sm:$0xff]  ;;  %v5985_v48 = vld [vmem:[%s5695_s6 + $0xa0] sm:$0xff] }
  0x93   : > { %v5464_v57 = vrot.slane %v9065_v52, %v5422_v33  ;;  %v5469_v58 = vrot.slane %v9064_v53, %v5422_v33  ;;  %v280_v1 = vshra.s32 %v5424_v36, 7  ;;  %v9067_v5 = vshra.s32 %v5457_v55, 7  ;;  %v5994_v53 = vld [vmem:[%s5695_s6 + $0xa8] sm:$0xff]  ;;  %v6003_v52 = vld [vmem:[%s5695_s6 + $0xb0] sm:$0xff] }
  0x94   : > { %9276 = vst [vmem:[#allocation10_spill] sm:$0xff] %v5455_v54  ;;  %9278 = vst [vmem:[#allocation12_spill] sm:$0xff] %v5474_v59  ;;  %v5481_v62 = vrot.slane %v9061_v60, %v5422_v33  ;;  %v5486_v63 = vrot.slane %v9060_v61, %v5422_v33  ;;  %v9066_v6 = vshra.s32 %v5459_v56, 7  ;;  %v896_v8 = vshra.s32 %v5426_v37, 7  ;;  %v5967_v60 = vld [vmem:[%s5695_s6 + $0x90] sm:$0xff] }
  0x95   : > { %9277 = vst [vmem:[#allocation11_spill] sm:$0xff] %v5469_v58  ;;  %v289_v11 = vrot.slane %v280_v1, %v5422_v33  ;;  %v5500_v12 = vrot.slane %v9067_v5, %v5422_v33  ;;  %v285_v13 = vrot.slane %v280_v1, %v5493_v7  ;;  %v1416_v16 = vshra.s32 %v5434_v46, 7  ;;  %v6021_v5 = vld [vmem:[%s5695_s6 + $0xc0] sm:$0xff]  ;;  %v6081_v54 = vld [vmem:[%s5695_s6 + $0xf0] sm:$0xff] }
  0x96   : > { %9279 = vst [vmem:[#allocation13_spill] sm:$0xff] %v5481_v62  ;;  %9280 = vst [vmem:[#allocation14_spill] sm:$0xff] %v5486_v63  ;;  %v5505_v3 = vrot.slane %v9066_v6, %v5422_v33  ;;  %v905_v9 = vrot.slane %v896_v8, %v5422_v33  ;;  %v901_v14 = vrot.slane %v896_v8, %v5493_v7  ;;  %v1929_v17 = vshra.s32 %v5436_v47, 7  ;;  %v6012_v6 = vld [vmem:[%s5695_s6 + $0xb8] sm:$0xff] }
  0x97   : > { %v5514_v19 = vrot.slane %v289_v11, %v5493_v7  ;;  %v5526_v4 = vrot.slane %v285_v13, %v5493_v7  ;;  %v5532_v26 = vadd.s32 24, %v5419_v23  ;;  %v1425_v29 = vrot.slane %v1416_v16, %v5422_v33 }
  0x98   : > { %v5523_v24 = vrot.slane %v905_v9, %v5493_v7  ;;  %v5529_v25 = vrot.slane %v901_v14, %v5493_v7  ;;  %v1938_v30 = vrot.slane %v1929_v17, %v5422_v33  ;;  %v1421_v32 = vrot.slane %v1416_v16, %v5493_v7 }
  0x99   : > { %vm299_vm0 = vcmp.eq.s32.totalorder %v5514_v19, %v5419_v23  ;;  %v1934_v34 = vrot.slane %v1929_v17, %v5493_v7  ;;  %vm301_vm1 = vcmp.eq.s32.totalorder %v5514_v19, %v5517_v21  ;;  %vm298_vm4 = vcmp.eq.s32.totalorder %v5526_v4, %v5419_v23 }
  0x9a   : > { %vm915_vm2 = vcmp.eq.s32.totalorder %v5523_v24, %v5419_v23  ;;  %vm917_vm3 = vcmp.eq.s32.totalorder %v5523_v24, %v5517_v21  ;;  %vm300_vm5 = vcmp.eq.s32.totalorder %v5526_v4, %v5517_v21  ;;  %vm914_vm6 = vcmp.eq.s32.totalorder %v5529_v25, %v5419_v23  ;;  %vm5613_vm15 = vmpackc.low %vm301_vm1, %vm299_vm0 }
  0x9b   : > { %vm916_vm7 = vcmp.eq.s32.totalorder %v5529_v25, %v5517_v21  ;;  %vm303_vm8 = vcmp.eq.s32.totalorder %v5514_v19, %v5520_v22  ;;  %vm305_vm9 = vcmp.eq.s32.totalorder %v5514_v19, %v5532_v26  ;;  %vm919_vm10 = vcmp.eq.s32.totalorder %v5523_v24, %v5520_v22  ;;  %vm5626_vm14 = vmpackc.low %vm917_vm3, %vm915_vm2 }
  0x9c   : > { %vm921_vm11 = vcmp.eq.s32.totalorder %v5523_v24, %v5532_v26  ;;  %v5580_v17 = vrot.slane %v1425_v29, %v5493_v7  ;;  %vm4956_vm2 = vmpackc.low %vm300_vm5, %vm298_vm4  ;;  %v9289_v62 = vshra.s32 %v5430_v41, 7 }
  0x9d   : > { %vm4968_vm3 = vmpackc.low %vm916_vm7, %vm914_vm6 }
  0x9e   : > { %vm1435_vm0 = vcmp.eq.s32.totalorder %v5580_v17, %v5419_v23  ;;  %vm1437_vm1 = vcmp.eq.s32.totalorder %v5580_v17, %v5517_v21  ;;  %vm4959_vm4 = vmpackc.low %vm305_vm9, %vm303_vm8  ;;  %vm9285_vm8 = vcmp.eq.s32.totalorder %v5526_v4, %v5520_v22  ;;  %vm9286_vm9 = vcmp.eq.s32.totalorder %v5526_v4, %v5532_v26 }
  0x9f   : > { %vm4971_vm5 = vmpackc.low %vm921_vm11, %vm919_vm10  ;;  %vm9287_vm11 = vcmp.eq.s32.totalorder %v5529_v25, %v5520_v22  ;;  %v2962_v59 = vrot.slane %v9289_v62, %v5493_v7 }
  0xa1   : > { %v2970_v62 = vrot.slane %v2962_v59, %v5493_v7 }
  0xac   : > { %s5051_s19 = spop %5050 }
  0xad   : > { %v238_v18 = vstv %s5051_s19  ;;  %s5207_s19 = scalar_lea.vmem %s9005_s15, 64 }
  0xae   : > { %v239_v20 = vmul.f32 %v238_v18, %v237_v15  ;;  %v5583_v18 = vrot.slane %v1938_v30, %v5493_v7  ;;  %p5208_p5 = scmp.ne.s32.totalorder %s9005_s15, %s5207_s19  ;;  %p5215_p10 = scmp.lt.s32.totalorder %s5213_s4, %s5207_s19 }
  0xb0   : > { %v246_v27 = vsub.f32 1.0, %v239_v20  ;;  %v1406_v28 = vrot.slane %v239_v20, 5  ;;  %v892_v31 = vrot.slane %v239_v20, 6  ;;  %vm1948_vm13 = vcmp.eq.s32.totalorder %v5583_v18, %v5419_v23  ;;  %p5209_p6 = pnand %p5208_p5, %p5382_p8  ;;  %p5216_p11 = por %p5215_p10, %p5214_p9 }
  0xb1   : > { %vm1950_vm12 = vcmp.eq.s32.totalorder %v5583_v18, %v5517_v21 }
  0xb2   : > { %v1407_v35 = vrot.slane %v1406_v28, 4  ;;  %v265_v38 = vrot.slane %v246_v27, 5  ;;  %v276_v39 = vrot.slane %v246_v27, 6  ;;  %v893_v8 = vrot.slane %v892_v31, 4  ;;  %p5210_p7 = pneg %p5209_p6 }
  0xb3   : > { %v5589_v28 = vrot.slane %v1934_v34, %v5493_v7  ;;  %v2444_v31 = vshra.s32 %v5428_v40, 7  ;;  %v9070_v34 = vshra.s32 %v5430_v41, 7  ;;  %v6096_v41 = vld [vmem:[%s5695_s6 + $0xf8] sm:$0xff] }
  0xb4   : > { %v3467_v42 = vmul.f32 %v1407_v35, %v239_v20  ;;  %v266_v43 = vrot.slane %v265_v38, 4  ;;  %v277_v0 = vrot.slane %v276_v39, 4  ;;  %v1409_v1 = vmul.f32 %v1407_v35, %v246_v27  ;;  %p5217_p12 = pnand %p5216_p11, %p5210_p7 }
  0xb5   : > { %v2453_v19 = vrot.slane %v2444_v31, %v5422_v33  ;;  %vm1947_vm10 = vcmp.eq.s32.totalorder %v5589_v28, %v5419_v23  ;;  %v2966_v24 = vrot.slane %v9070_v34, %v5422_v33  ;;  %v6066_v34 = vld [vmem:[%s5695_s6 + $0xe8] sm:$0xff]  ;;  %v2449_v63 = vrot.slane %v2444_v31, %v5493_v7 }
  0xb6   : > { %v268_v10 = vmul.f32 %v266_v43, %v246_v27  ;;  %v5566_v11 = vmul.f32 %v1409_v1, %v277_v0  ;;  %v5568_v9 = vmul.f32 %v1409_v1, %v893_v8  ;;  %v5571_v13 = vmul.f32 %v3467_v42, %v277_v0 }
  0xb7   : > { %v5573_v14 = vmul.f32 %v3467_v42, %v893_v8  ;;  %v5586_v27 = vrot.slane %v1421_v32, %v5493_v7  ;;  %v2439_v42 = vmul.f32 %v266_v43, %v239_v20  ;;  %v2457_v58 = vrot.slane %v2449_v63, %v5493_v7 }
  0xb8   : > { %v279_v15 = vmul.f32 %v277_v0, %v268_v10  ;;  %v895_v16 = vmul.f32 %v893_v8, %v268_v10  ;;  %v1450_v30 = vrot.slane %v5566_v11, %v5422_v33  ;;  %v1963_v32 = vrot.slane %v5568_v9, %v5422_v33 }
  0xb9   : > { %v5657_v61 = vmul.f32 %v2439_v42, %v893_v8  ;;  %vm1434_vm6 = vcmp.eq.s32.totalorder %v5586_v27, %v5419_v23  ;;  %vm1436_vm7 = vcmp.eq.s32.totalorder %v5586_v27, %v5517_v21  ;;  %v6057_v8 = vld [vmem:[%s5695_s6 + $0xe0] sm:$0xff] }
  0xba   : > { %v314_v35 = vrot.slane %v279_v15, %v5422_v33  ;;  %v930_v38 = vrot.slane %v895_v16, %v5422_v33  ;;  %v310_v39 = vrot.slane %v279_v15, %v5493_v7  ;;  %v926_v29 = vrot.slane %v895_v16, %v5493_v7 }
  0xbb   : > { %v2991_v20 = vrot.slane %v5657_v61, %v5422_v33  ;;  %v5740_v16 = vrot.slane %v2453_v19, %v5493_v7  ;;  %v5859_v19 = vld [vmem:[%s5695_s6 + $0x30] sm:$0xff]  ;;  %v2987_v31 = vrot.slane %v5657_v61, %v5493_v7 }
  0xbc   : > { %v324_v1 = vrot.slane %v314_v35, %v5493_v7  ;;  %v940_v43 = vrot.slane %v930_v38, %v5493_v7  ;;  %v320_v10 = vrot.slane %v310_v39, %v5493_v7  ;;  %v936_v15 = vrot.slane %v926_v29, %v5493_v7 }
  0xbd   : > { %v2997_v63 = vrot.slane %v2987_v31, %v5493_v7 }
  0xbe   : > { %v4952_v35 = vpack.c.bf16 %v324_v1, %v324_v1  ;;  %v4964_v38 = vpack.c.bf16 %v940_v43, %v940_v43  ;;  %v4955_v39 = vpack.c.bf16 %v320_v10, %v320_v10  ;;  %v4967_v29 = vpack.c.bf16 %v936_v15, %v936_v15  ;;  %v5733_v15 = vld [vmem:[%s5695_s6] sm:$0xff] }
  0xbf   : > { %v1446_v1 = vrot.slane %v5566_v11, %v5493_v7  ;;  %v1959_v43 = vrot.slane %v5568_v9, %v5493_v7  ;;  %v5655_v10 = vmul.f32 %v2439_v42, %v277_v0  ;;  %v1460_v11 = vrot.slane %v1450_v30, %v5493_v7  ;;  %v6048_v9 = vld [vmem:[%s5695_s6 + $0xd8] sm:$0xff] }
  0xc0   : > { %4954 = vmatprep.subr.msk.bf16.mxu0 %vm5613_vm15, %v4952_v35  ;;  %4966 = vmatprep.subr.msk.bf16.mxu1 %vm5626_vm14, %v4964_v38  ;;  %v1973_v0 = vrot.slane %v1963_v32, %v5493_v7  ;;  %vm4962_vm14 = vmpackc.low %vm9286_vm9, %vm9285_vm8  ;;  %vm9288_vm15 = vcmp.eq.s32.totalorder %v5529_v25, %v5532_v26  ;;  %vm333_vm9 = vcmask 261120  }
  0xc1   : > { %4957 = vmatpush1.bf16.msk.msra.mxu0 %vm4956_vm2, %v4955_v39  ;;  %4969 = vmatpush1.bf16.msk.msra.mxu1 %vm4968_vm3, %v4967_v29  ;;  %vm4974_vm2 = vmpackc.low %vm9288_vm15, %vm9287_vm11  ;;  %v1456_v4 = vrot.slane %v1446_v1, %v5493_v7  ;;  %vm1949_vm3 = vcmp.eq.s32.totalorder %v5589_v28, %v5517_v21  ;;  %v1969_v42 = vrot.slane %v1959_v43, %v5493_v7  ;;  %v5786_v43 = vld [vmem:[%s5695_s6 + $0x8] sm:$0xff] }
  0xc2   : > { %4960 = vmatprep.subr.msk.bf16.mxu0 %vm4959_vm4, %v4952_v35  ;;  %4972 = vmatprep.subr.msk.bf16.mxu1 %vm4971_vm5, %v4964_v38  ;;  %vm1439_vm4 = vcmp.eq.s32.totalorder %v5580_v17, %v5520_v22  ;;  %v4976_v30 = vpack.c.bf16 %v1460_v11, %v1460_v11  ;;  %vm4977_vm5 = vmpackc.low %vm1437_vm1, %vm1435_vm0  ;;  %v4988_v25 = vpack.c.bf16 %v1973_v0, %v1973_v0  ;;  %v5841_v11 = vld [vmem:[%s5695_s6 + $0x20] sm:$0xff]  ;;  %v5850_v0 = vld [vmem:[%s5695_s6 + $0x28] sm:$0xff] }
  0xc3   : > { %v2478_v32 = vrot.slane %v5655_v10, %v5422_v33  ;;  %vm4989_vm8 = vmpackc.low %vm1950_vm12, %vm1948_vm13  ;;  %vm1441_vm0 = vcmp.eq.s32.totalorder %v5580_v17, %v5532_v26  ;;  %vm1952_vm1 = vcmp.eq.s32.totalorder %v5583_v18, %v5520_v22  ;;  %vm1954_vm13 = vcmp.eq.s32.totalorder %v5583_v18, %v5532_v26 }
  0xc4   : > { %vm4980_vm12 = vmpackc.low %vm1436_vm7, %vm1434_vm6  ;;  %v5753_v35 = vrot.slane %v2966_v24, %v5493_v7  ;;  %v4979_v38 = vpack.c.bf16 %v1456_v4, %v1456_v4  ;;  %vm1440_vm6 = vcmp.eq.s32.totalorder %v5586_v27, %v5532_v26  ;;  %vm1951_vm7 = vcmp.eq.s32.totalorder %v5589_v28, %v5520_v22  ;;  %v5868_v24 = vld [vmem:[%s5695_s6 + $0x38] sm:$0xff]  ;;  %v5877_v4 = vld [vmem:[%s5695_s6 + $0x40] sm:$0xff] }
  0xc5   : > { %4963 = vmatpush1.bf16.msk.msra.mxu0 %vm4962_vm14, %v4955_v39  ;;  %4975 = vmatpush1.bf16.msk.msra.mxu1 %vm4974_vm2, %v4967_v29  ;;  %vm1438_vm14 = vcmp.eq.s32.totalorder %v5586_v27, %v5520_v22  ;;  %v4991_v39 = vpack.c.bf16 %v1969_v42, %v1969_v42  ;;  %vm4992_vm11 = vmpackc.low %vm1949_vm3, %vm1947_vm10  ;;  %vm1953_vm10 = vcmp.eq.s32.totalorder %v5589_v28, %v5532_v26  ;;  %v5819_v27 = vld [vmem:[%s5695_s6 + $0x10] sm:$0xff]  ;;  %v5832_v28 = vld [vmem:[%s5695_s6 + $0x18] sm:$0xff] }
  0xc6   : > { %4978 = vmatprep.subr.msk.bf16.mxu0 %vm4977_vm5, %v4976_v30  ;;  %4990 = vmatprep.subr.msk.bf16.mxu1 %vm4989_vm8, %v4988_v25  ;;  %vm4983_vm15 = vmpackc.low %vm1441_vm0, %vm1439_vm4  ;;  %v2488_v29 = vrot.slane %v2478_v32, %v5493_v7  ;;  %v3001_v1 = vrot.slane %v2991_v20, %v5493_v7  ;;  %vm2463_vm3 = vcmp.eq.s32.totalorder %v5740_v16, %v5419_v23  ;;  %v5886_v42 = vld [vmem:[%s5695_s6 + $0x48] sm:$0xff]  ;;  %v5913_v32 = vld [vmem:[%s5695_s6 + $0x60] sm:$0xff] }
  0xc7   : > { %vm4995_vm2 = vmpackc.low %vm1954_vm13, %vm1952_vm1  ;;  %vm2465_vm4 = vcmp.eq.s32.totalorder %v5740_v16, %v5517_v21  ;;  %vm2976_vm8 = vcmp.eq.s32.totalorder %v5753_v35, %v5419_v23  ;;  %vm2978_vm0 = vcmp.eq.s32.totalorder %v5753_v35, %v5517_v21  ;;  %v5922_v20 = vld [vmem:[%s5695_s6 + $0x68] sm:$0xff]  ;;  %v2474_v40 = vrot.slane %v5655_v10, %v5493_v7 }
  0xc8   : > { %4632 = vmatmul.mubr.msk.f32.vlgmr.msra.gmra.mrb[0].mxu0 %vm333_vm9, %v5733_v15  ;;  %4672 = vmatmul.mubr.msk.f32.vlgmr.msra.gmra.mrb[0].mxu1 %vm333_vm9, %v5733_v15  ;;  %vm4986_vm5 = vmpackc.low %vm1440_vm6, %vm1438_vm14  ;;  %v5814_v17 = vpack.c.bf16 %v2488_v29, %v2488_v29  ;;  %v5816_v18 = vpack.c.bf16 %v3001_v1, %v3001_v1  ;;  %v5949_v29 = vld [vmem:[%s5695_s6 + $0x80] sm:$0xff]  ;;  %v5958_v1 = vld [vmem:[%s5695_s6 + $0x88] sm:$0xff]  ;;  %vm2462_vm14 = vcmp.eq.s32.totalorder %v2457_v58, %v5419_v23 }
  0xc9   : > { %4981 = vmatpush1.bf16.msk.msra.mxu0 %vm4980_vm12, %v4979_v38  ;;  %4993 = vmatpush1.bf16.msk.msra.mxu1 %vm4992_vm11, %v4991_v39  ;;  %vm4998_vm1 = vmpackc.low %vm1953_vm10, %vm1951_vm7  ;;  %vm2464_vm11 = vcmp.eq.s32.totalorder %v2457_v58, %v5517_v21  ;;  %v2484_v61 = vrot.slane %v2474_v40, %v5493_v7  ;;  %vm2975_vm6 = vcmp.eq.s32.totalorder %v2970_v62, %v5419_v23 }
  0xca   : > { %4984 = vmatprep.subr.msk.bf16.mxu0 %vm4983_vm15, %v4976_v30  ;;  %4996 = vmatprep.subr.msk.bf16.mxu1 %vm4995_vm2, %v4988_v25  ;;  %vm5001_vm12 = vmpackc.low %vm2465_vm4, %vm2463_vm3  ;;  %v5895_v30 = vld [vmem:[%s5695_s6 + $0x50] sm:$0xff]  ;;  %v5904_v25 = vld [vmem:[%s5695_s6 + $0x58] sm:$0xff]  ;;  %vm2977_vm7 = vcmp.eq.s32.totalorder %v2970_v62, %v5517_v21  ;;  %vm2467_vm15 = vcmp.eq.s32.totalorder %v5740_v16, %v5520_v22  ;;  %vm2469_vm10 = vcmp.eq.s32.totalorder %v5740_v16, %v5532_v26 }
  0xcb   : > { %500 = vmatprep.mubr.f32.mxu0 %v9073_v2  ;;  %1019 = vmatprep.mubr.f32.mxu1 %v9073_v2  ;;  %vm5013_vm13 = vmpackc.low %vm2978_vm0, %vm2976_vm8  ;;  %v6116_v40 = vrot.slane %v5500_v12, %v5493_v7  ;;  %vm2980_vm3 = vcmp.eq.s32.totalorder %v5753_v35, %v5520_v22  ;;  %vm2982_vm4 = vcmp.eq.s32.totalorder %v5753_v35, %v5532_v26  ;;  %v9296_v35 = vand.u32 127, %v5426_v37 }
  0xcc   : > { %4633 = vmatmul.mubr.msk.f32.gmra.mrb[2].mxu0 %vm333_vm9, %v5786_v43  ;;  %4673 = vmatmul.mubr.msk.f32.gmra.mrb[2].mxu1 %vm333_vm9, %v5786_v43  ;;  %vm6118_vm2 = vmpackc.low %vm2464_vm11, %vm2462_vm14  ;;  %v6129_v10 = vrot.slane %v5505_v3, %v5493_v7  ;;  %v5003_v31 = vpack.c.bf16 %v2484_v61, %v2484_v61  ;;  %vm2468_vm0 = vcmp.eq.s32.totalorder %v2457_v58, %v5532_v26 }
  0xcd   : > { %4987 = vmatpush1.bf16.msk.msra.mxu0 %vm4986_vm5, %v4979_v38  ;;  %4999 = vmatpush1.bf16.msk.msra.mxu1 %vm4998_vm1, %v4991_v39  ;;  %v5931_v38 = vld [vmem:[%s5695_s6 + $0x70] sm:$0xff]  ;;  %v5940_v39 = vld [vmem:[%s5695_s6 + $0x78] sm:$0xff]  ;;  %vm2466_vm5 = vcmp.eq.s32.totalorder %v2457_v58, %v5520_v22  ;;  %vm5016_vm8 = vmpackc.low %vm2977_vm7, %vm2975_vm6  ;;  %vm2979_vm1 = vcmp.eq.s32.totalorder %v2970_v62, %v5520_v22  ;;  %v9292_v12 = vrot.slane %v5571_v13, %v5422_v33 }
  0xce   : > { %5002 = vmatprep.subr.msk.bf16.mxu0 %vm5001_vm12, %v5814_v17  ;;  %5014 = vmatprep.subr.msk.bf16.mxu1 %vm5013_vm13, %v5816_v18  ;;  %vm5007_vm12 = vmpackc.low %vm2469_vm10, %vm2467_vm15  ;;  %vm2981_vm13 = vcmp.eq.s32.totalorder %v2970_v62, %v5532_v26  ;;  %v9293_v61 = vrot.slane %v5573_v14, %v5422_v33  ;;  %vm3491_vm11 = vcmp.eq.s32.totalorder %v6116_v40, %v5419_v23  ;;  %v9294_v33 = vmov 0.0  }
  0xcf   : > { %506 = vmatprep.mubr.f32.mxu0 %v9073_v2  ;;  %1025 = vmatprep.mubr.f32.mxu1 %v9073_v2  ;;  %v3516_v3 = vrot.slane %v9292_v12, %v5493_v7  ;;  %vm5019_vm14 = vmpackc.low %vm2982_vm4, %vm2980_vm3  ;;  %vm3493_vm6 = vcmp.eq.s32.totalorder %v6116_v40, %v5517_v21  ;;  %vm4004_vm15 = vcmp.eq.s32.totalorder %v6129_v10, %v5419_v23 }
  0xd0   : > { %4634 = vmatmul.mubr.msk.f32.gmra.mrb[4].mxu0 %vm333_vm9, %v5819_v27  ;;  %4674 = vmatmul.mubr.msk.f32.gmra.mrb[4].mxu1 %vm333_vm9, %v5819_v27  ;;  %vm5010_vm7 = vmpackc.low %vm2468_vm0, %vm2466_vm5  ;;  %vm4006_vm10 = vcmp.eq.s32.totalorder %v6129_v10, %v5517_v21  ;;  %v6311_v37 = vrot.slane %v5442_v49, %v5493_v7 }
  0xd1   : > { %512 = vmatprep.mubr.f32.mxu0 %v9073_v2  ;;  %1031 = vmatprep.mubr.f32.mxu1 %v9073_v2  ;;  %v6181_v58 = vpack.c.bf16 %v3516_v3, %v3516_v3  ;;  %vm5025_vm3 = vmpackc.low %vm3493_vm6, %vm3491_vm11 }
  0xd2   : > { %vm5037_vm4 = vmpackc.low %vm4006_vm10, %vm4004_vm15  ;;  %vm9112_vm0 = vcmp.eq.s32.totalorder %v6311_v37, %v5419_v23  ;;  %vm9092_vm15 = vcmp.eq.s32.totalorder %v6311_v37, %v5520_v22 }
  0xd4   : > { %4635 = vmatmul.mubr.msk.f32.gmra.mrb[6].mxu0 %vm333_vm9, %v5832_v28  ;;  %4675 = vmatmul.mubr.msk.f32.gmra.mrb[6].mxu1 %vm333_vm9, %v5832_v28 }
  0xd5   : > { %518 = vmatprep.mubr.f32.mxu0 %v9073_v2  ;;  %1037 = vmatprep.mubr.f32.mxu1 %v9073_v2 }
  0xd8   : > { %4636 = vmatmul.mubr.msk.f32.gmra.mrb[8].mxu0 %vm333_vm9, %v5841_v11  ;;  %4676 = vmatmul.mubr.msk.f32.gmra.mrb[8].mxu1 %vm333_vm9, %v5841_v11 }
  0xd9   : > { %524 = vmatprep.mubr.f32.mxu0 %v9073_v2  ;;  %1043 = vmatprep.mubr.f32.mxu1 %v9073_v2 }
  0xdc   : > { %4637 = vmatmul.mubr.msk.f32.gmra.mrb[10].mxu0 %vm333_vm9, %v5850_v0  ;;  %4677 = vmatmul.mubr.msk.f32.gmra.mrb[10].mxu1 %vm333_vm9, %v5850_v0 }
  0xdd   : > { %530 = vmatprep.mubr.f32.mxu0 %v9073_v2  ;;  %1049 = vmatprep.mubr.f32.mxu1 %v9073_v2 }
  0xe0   : > { %4638 = vmatmul.mubr.msk.f32.gmra.mrb[12].mxu0 %vm333_vm9, %v5859_v19  ;;  %4678 = vmatmul.mubr.msk.f32.gmra.mrb[12].mxu1 %vm333_vm9, %v5859_v19 }
  0xe1   : > { %536 = vmatprep.mubr.f32.mxu0 %v9073_v2  ;;  %1055 = vmatprep.mubr.f32.mxu1 %v9073_v2 }
  0xe4   : > { %4639 = vmatmul.mubr.msk.f32.gmra.mrb[14].mxu0 %vm333_vm9, %v5868_v24  ;;  %4679 = vmatmul.mubr.msk.f32.gmra.mrb[14].mxu1 %vm333_vm9, %v5868_v24 }
  0xe5   : > { %542 = vmatprep.mubr.f32.mxu0 %v9073_v2  ;;  %1061 = vmatprep.mubr.f32.mxu1 %v9073_v2 }
  0xe8   : > { %4640 = vmatmul.mubr.msk.f32.gmra.mrb[16].mxu0 %vm333_vm9, %v5877_v4  ;;  %4680 = vmatmul.mubr.msk.f32.gmra.mrb[16].mxu1 %vm333_vm9, %v5877_v4 }
  0xe9   : > { %548 = vmatprep.mubr.f32.mxu0 %v9073_v2  ;;  %1067 = vmatprep.mubr.f32.mxu1 %v9073_v2 }
  0xec   : > { %4641 = vmatmul.mubr.msk.f32.gmra.mrb[18].mxu0 %vm333_vm9, %v5886_v42  ;;  %4681 = vmatmul.mubr.msk.f32.gmra.mrb[18].mxu1 %vm333_vm9, %v5886_v42 }
  0xed   : > { %554 = vmatprep.mubr.f32.mxu0 %v9073_v2  ;;  %1073 = vmatprep.mubr.f32.mxu1 %v9073_v2 }
  0xf0   : > { %4642 = vmatmul.mubr.msk.f32.gmra.mrb[20].mxu0 %vm333_vm9, %v5895_v30  ;;  %4682 = vmatmul.mubr.msk.f32.gmra.mrb[20].mxu1 %vm333_vm9, %v5895_v30 }
  0xf1   : > { %560 = vmatprep.mubr.f32.mxu0 %v9073_v2  ;;  %1079 = vmatprep.mubr.f32.mxu1 %v9073_v2 }
  0xf4   : > { %4643 = vmatmul.mubr.msk.f32.gmra.mrb[22].mxu0 %vm333_vm9, %v5904_v25  ;;  %4683 = vmatmul.mubr.msk.f32.gmra.mrb[22].mxu1 %vm333_vm9, %v5904_v25 }
  0xf5   : > { %566 = vmatprep.mubr.f32.mxu0 %v9073_v2  ;;  %1085 = vmatprep.mubr.f32.mxu1 %v9073_v2 }
  0xf8   : > { %4644 = vmatmul.mubr.msk.f32.gmra.mrb[24].mxu0 %vm333_vm9, %v5913_v32  ;;  %4684 = vmatmul.mubr.msk.f32.gmra.mrb[24].mxu1 %vm333_vm9, %v5913_v32 }
  0xf9   : > { %572 = vmatprep.mubr.f32.mxu0 %v9073_v2  ;;  %1091 = vmatprep.mubr.f32.mxu1 %v9073_v2 }
  0xfc   : > { %4645 = vmatmul.mubr.msk.f32.gmra.mrb[26].mxu0 %vm333_vm9, %v5922_v20  ;;  %4685 = vmatmul.mubr.msk.f32.gmra.mrb[26].mxu1 %vm333_vm9, %v5922_v20 }
  0xfd   : > { %578 = vmatprep.mubr.f32.mxu0 %v9073_v2  ;;  %1097 = vmatprep.mubr.f32.mxu1 %v9073_v2 }
 0x100   : > { %4646 = vmatmul.mubr.msk.f32.gmra.mrb[28].mxu0 %vm333_vm9, %v5931_v38  ;;  %4686 = vmatmul.mubr.msk.f32.gmra.mrb[28].mxu1 %vm333_vm9, %v5931_v38 }
 0x101   : > { %584 = vmatprep.mubr.f32.mxu0 %v9073_v2  ;;  %1103 = vmatprep.mubr.f32.mxu1 %v9073_v2 }
 0x104   : > { %4647 = vmatmul.mubr.msk.f32.gmra.mrb[30].mxu0 %vm333_vm9, %v5940_v39  ;;  %4687 = vmatmul.mubr.msk.f32.gmra.mrb[30].mxu1 %vm333_vm9, %v5940_v39 }
 0x105   : > { %590 = vmatprep.mubr.f32.mxu0 %v9073_v2  ;;  %1109 = vmatprep.mubr.f32.mxu1 %v9073_v2 }
 0x108   : > { %4648 = vmatmul.mubr.msk.f32.gmra.mrb[32].mxu0 %vm333_vm9, %v5949_v29  ;;  %4688 = vmatmul.mubr.msk.f32.gmra.mrb[32].mxu1 %vm333_vm9, %v5949_v29 }
 0x109   : > { %596 = vmatprep.mubr.f32.mxu0 %v9073_v2  ;;  %1115 = vmatprep.mubr.f32.mxu1 %v9073_v2 }
 0x10c   : > { %4649 = vmatmul.mubr.msk.f32.gmra.mrb[34].mxu0 %vm333_vm9, %v5958_v1  ;;  %4689 = vmatmul.mubr.msk.f32.gmra.mrb[34].mxu1 %vm333_vm9, %v5958_v1 }
 0x10d   : > { %602 = vmatprep.mubr.f32.mxu0 %v9073_v2  ;;  %1121 = vmatprep.mubr.f32.mxu1 %v9073_v2 }
 0x110   : > { %4650 = vmatmul.mubr.msk.f32.gmra.mrb[36].mxu0 %vm333_vm9, %v5967_v60  ;;  %4690 = vmatmul.mubr.msk.f32.gmra.mrb[36].mxu1 %vm333_vm9, %v5967_v60 }
 0x111   : > { %608 = vmatprep.mubr.f32.mxu0 %v9073_v2  ;;  %1127 = vmatprep.mubr.f32.mxu1 %v9073_v2 }
 0x114   : > { %4651 = vmatmul.mubr.msk.f32.gmra.mrb[38].mxu0 %vm333_vm9, %v5976_v51  ;;  %4691 = vmatmul.mubr.msk.f32.gmra.mrb[38].mxu1 %vm333_vm9, %v5976_v51 }
 0x115   : > { %614 = vmatprep.mubr.f32.mxu0 %v9073_v2  ;;  %1133 = vmatprep.mubr.f32.mxu1 %v9073_v2 }
 0x118   : > { %4652 = vmatmul.mubr.msk.f32.gmra.mrb[40].mxu0 %vm333_vm9, %v5985_v48  ;;  %4692 = vmatmul.mubr.msk.f32.gmra.mrb[40].mxu1 %vm333_vm9, %v5985_v48 }
 0x119   : > { %620 = vmatprep.mubr.f32.mxu0 %v9073_v2  ;;  %1139 = vmatprep.mubr.f32.mxu1 %v9073_v2 }
 0x11c   : > { %4653 = vmatmul.mubr.msk.f32.gmra.mrb[42].mxu0 %vm333_vm9, %v5994_v53  ;;  %4693 = vmatmul.mubr.msk.f32.gmra.mrb[42].mxu1 %vm333_vm9, %v5994_v53 }
 0x11d   : > { %626 = vmatprep.mubr.f32.mxu0 %v9073_v2  ;;  %1145 = vmatprep.mubr.f32.mxu1 %v9073_v2 }
 0x120   : > { %4654 = vmatmul.mubr.msk.f32.gmra.mrb[44].mxu0 %vm333_vm9, %v6003_v52  ;;  %4694 = vmatmul.mubr.msk.f32.gmra.mrb[44].mxu1 %vm333_vm9, %v6003_v52 }
 0x121   : > { %632 = vmatprep.mubr.f32.mxu0 %v9073_v2  ;;  %1151 = vmatprep.mubr.f32.mxu1 %v9073_v2 }
 0x124   : > { %4655 = vmatmul.mubr.msk.f32.gmra.mrb[46].mxu0 %vm333_vm9, %v6012_v6  ;;  %4695 = vmatmul.mubr.msk.f32.gmra.mrb[46].mxu1 %vm333_vm9, %v6012_v6 }
 0x125   : > { %638 = vmatprep.mubr.f32.mxu0 %v9073_v2  ;;  %1157 = vmatprep.mubr.f32.mxu1 %v9073_v2 }
 0x128   : > { %4656 = vmatmul.mubr.msk.f32.gmra.mrb[48].mxu0 %vm333_vm9, %v6021_v5  ;;  %4696 = vmatmul.mubr.msk.f32.gmra.mrb[48].mxu1 %vm333_vm9, %v6021_v5 }
 0x129   : > { %644 = vmatprep.mubr.f32.mxu0 %v9073_v2  ;;  %1163 = vmatprep.mubr.f32.mxu1 %v9073_v2 }
 0x12c   : > { %4657 = vmatmul.mubr.msk.f32.gmra.mrb[50].mxu0 %vm333_vm9, %v6030_v45  ;;  %4697 = vmatmul.mubr.msk.f32.gmra.mrb[50].mxu1 %vm333_vm9, %v6030_v45 }
 0x12d   : > { %650 = vmatprep.mubr.f32.mxu0 %v9073_v2  ;;  %1169 = vmatprep.mubr.f32.mxu1 %v9073_v2 }
 0x130   : > { %4658 = vmatmul.mubr.msk.f32.gmra.mrb[52].mxu0 %vm333_vm9, %v6039_v44  ;;  %4698 = vmatmul.mubr.msk.f32.gmra.mrb[52].mxu1 %vm333_vm9, %v6039_v44 }
 0x131   : > { %656 = vmatprep.mubr.f32.mxu0 %v9073_v2  ;;  %1175 = vmatprep.mubr.f32.mxu1 %v9073_v2 }
 0x134   : > { %4659 = vmatmul.mubr.msk.f32.gmra.mrb[54].mxu0 %vm333_vm9, %v6048_v9  ;;  %4699 = vmatmul.mubr.msk.f32.gmra.mrb[54].mxu1 %vm333_vm9, %v6048_v9 }
 0x135   : > { %662 = vmatprep.mubr.f32.mxu0 %v9073_v2  ;;  %1181 = vmatprep.mubr.f32.mxu1 %v9073_v2 }
 0x138   : > { %4660 = vmatmul.mubr.msk.f32.gmra.mrb[56].mxu0 %vm333_vm9, %v6057_v8  ;;  %4700 = vmatmul.mubr.msk.f32.gmra.mrb[56].mxu1 %vm333_vm9, %v6057_v8 }
 0x139   : > { %668 = vmatprep.mubr.f32.mxu0 %v9073_v2  ;;  %1187 = vmatprep.mubr.f32.mxu1 %v9073_v2 }
 0x13c   : > { %4661 = vmatmul.mubr.msk.f32.gmra.mrb[58].mxu0 %vm333_vm9, %v6066_v34  ;;  %4701 = vmatmul.mubr.msk.f32.gmra.mrb[58].mxu1 %vm333_vm9, %v6066_v34 }
 0x13d   : > { %674 = vmatprep.mubr.f32.mxu0 %v9073_v2  ;;  %1193 = vmatprep.mubr.f32.mxu1 %v9073_v2 }
 0x140   : > { %4662 = vmatmul.mubr.msk.f32.gmra.mrb[60].mxu0 %vm333_vm9, %v6081_v54  ;;  %4702 = vmatmul.mubr.msk.f32.gmra.mrb[60].mxu1 %vm333_vm9, %v6081_v54 }
 0x141   : > { %680 = vmatprep.mubr.f32.mxu0 %v9073_v2  ;;  %1199 = vmatprep.mubr.f32.mxu1 %v9073_v2 }
 0x144   : > { %4663 = vmatmul.mubr.msk.f32.gmra.mrb[62].mxu0 %vm333_vm9, %v6096_v41  ;;  %4703 = vmatmul.mubr.msk.f32.gmra.mrb[62].mxu1 %vm333_vm9, %v6096_v41 }
 0x145   : > { %1533 = vmatprep.mubr.f32.mxu0 %v9073_v2  ;;  %2046 = vmatprep.mubr.f32.mxu1 %v9073_v2  ;;  %v5015_v2 = vpack.c.bf16 %v2997_v63, %v2997_v63  ;;  %v4029_v63 = vrot.slane %v9293_v61, %v5493_v7 }
 0x148   : > { %4712 = vmatmul.mubr.msk.f32.vlgmr.msra.gmra.mrb[64].mxu0 %vm333_vm9, %v5733_v15  ;;  %4752 = vmatmul.mubr.msk.f32.vlgmr.msra.gmra.mrb[64].mxu1 %vm333_vm9, %v5733_v15  ;;  %v6183_v15 = vpack.c.bf16 %v4029_v63, %v4029_v63 }
 0x149   : > { %5005 = vmatpush1.bf16.msk.msra.mxu0 %vm6118_vm2, %v5003_v31  ;;  %5017 = vmatpush1.bf16.msk.msra.mxu1 %vm5016_vm8, %v5015_v2  ;;  %vm5022_vm2 = vmpackc.low %vm2981_vm13, %vm2979_vm1 }
 0x14a   : > { %5008 = vmatprep.subr.msk.bf16.mxu0 %vm5007_vm12, %v5814_v17  ;;  %5020 = vmatprep.subr.msk.bf16.mxu1 %vm5019_vm14, %v5816_v18  ;;  %v6315_v17 = vrot.slane %v5447_v50, %v5493_v7  ;;  %vm9100_vm14 = vcmp.eq.s32.totalorder %v6311_v37, %v5517_v21 }
 0x14b   : > { %1539 = vmatprep.mubr.f32.mxu0 %v9294_v33  ;;  %2052 = vmatprep.mubr.f32.mxu1 %v9294_v33 }
 0x14c   : > { %4713 = vmatmul.mubr.msk.f32.gmra.mrb[66].mxu0 %vm333_vm9, %v5786_v43  ;;  %4753 = vmatmul.mubr.msk.f32.gmra.mrb[66].mxu1 %vm333_vm9, %v5786_v43  ;;  %v1209_v43 = vrot.slane %v9296_v35, %v5493_v7  ;;  %vm9107_vm1 = vcmp.eq.s32.totalorder %v6315_v17, %v5419_v23  ;;  %vm9099_vm11 = vcmp.eq.s32.totalorder %v6315_v17, %v5517_v21 }
 0x14d   : > { %5011 = vmatpush1.bf16.msk.msra.mxu0 %vm5010_vm7, %v5003_v31  ;;  %5023 = vmatpush1.bf16.msk.msra.mxu1 %vm5022_vm2, %v5015_v2  ;;  %v9295_v2 = vand.u32 127, %v5424_v36  ;;  %vm9075_vm10 = vcmp.eq.s32.totalorder %v6315_v17, %v5520_v22 }
 0x14e   : > { %5026 = vmatprep.subr.msk.bf16.mxu0 %vm5025_vm3, %v6181_v58  ;;  %5038 = vmatprep.subr.msk.bf16.mxu1 %vm5037_vm4, %v6183_v15  ;;  %v6307_v36 = vrot.slane %v1209_v43, %v5493_v7  ;;  %v6406_v43 = vadd.s32 32, %v5419_v23  ;;  %vm9079_vm4 = vcmp.eq.s32.totalorder %v6311_v37, %v5532_v26 }
 0x14f   : > { %1545 = vmatprep.mubr.f32.mxu0 %v9294_v33  ;;  %2058 = vmatprep.mubr.f32.mxu1 %v9294_v33  ;;  %v690_v16 = vrot.slane %v9295_v2, %v5493_v7 }
 0x150   : > { %4714 = vmatmul.mubr.msk.f32.gmra.mrb[68].mxu0 %vm333_vm9, %v5819_v27  ;;  %4754 = vmatmul.mubr.msk.f32.gmra.mrb[68].mxu1 %vm333_vm9, %v5819_v27  ;;  %vm9113_vm8 = vcmp.eq.s32.totalorder %v6307_v36, %v5419_v23  ;;  %vm9105_vm13 = vcmp.eq.s32.totalorder %v6307_v36, %v5517_v21  ;;  %vm9093_vm7 = vcmp.eq.s32.totalorder %v6307_v36, %v5520_v22 }
 0x151   : > { %1551 = vmatprep.mubr.f32.mxu0 %v9294_v33  ;;  %2064 = vmatprep.mubr.f32.mxu1 %v9294_v33  ;;  %vm9076_vm3 = vcmp.eq.s32.totalorder %v6307_v36, %v5532_v26 }
 0x154   : > { %4715 = vmatmul.mubr.msk.f32.gmra.mrb[70].mxu0 %vm333_vm9, %v5832_v28  ;;  %4755 = vmatmul.mubr.msk.f32.gmra.mrb[70].mxu1 %vm333_vm9, %v5832_v28 }
 0x155   : > { %1557 = vmatprep.mubr.f32.mxu0 %v9294_v33  ;;  %2070 = vmatprep.mubr.f32.mxu1 %v9294_v33 }
 0x158   : > { %4716 = vmatmul.mubr.msk.f32.gmra.mrb[72].mxu0 %vm333_vm9, %v5841_v11  ;;  %4756 = vmatmul.mubr.msk.f32.gmra.mrb[72].mxu1 %vm333_vm9, %v5841_v11 }
 0x159   : > { %1563 = vmatprep.mubr.f32.mxu0 %v9294_v33  ;;  %2076 = vmatprep.mubr.f32.mxu1 %v9294_v33 }
 0x15c   : > { %4717 = vmatmul.mubr.msk.f32.gmra.mrb[74].mxu0 %vm333_vm9, %v5850_v0  ;;  %4757 = vmatmul.mubr.msk.f32.gmra.mrb[74].mxu1 %vm333_vm9, %v5850_v0 }
 0x15d   : > { %1569 = vmatprep.mubr.f32.mxu0 %v9294_v33  ;;  %2082 = vmatprep.mubr.f32.mxu1 %v9294_v33 }
 0x160   : > { %4718 = vmatmul.mubr.msk.f32.gmra.mrb[76].mxu0 %vm333_vm9, %v5859_v19  ;;  %4758 = vmatmul.mubr.msk.f32.gmra.mrb[76].mxu1 %vm333_vm9, %v5859_v19 }
 0x161   : > { %1575 = vmatprep.mubr.f32.mxu0 %v9294_v33  ;;  %2088 = vmatprep.mubr.f32.mxu1 %v9294_v33 }
 0x164   : > { %4719 = vmatmul.mubr.msk.f32.gmra.mrb[78].mxu0 %vm333_vm9, %v5868_v24  ;;  %4759 = vmatmul.mubr.msk.f32.gmra.mrb[78].mxu1 %vm333_vm9, %v5868_v24 }
 0x165   : > { %1581 = vmatprep.mubr.f32.mxu0 %v9294_v33  ;;  %2094 = vmatprep.mubr.f32.mxu1 %v9294_v33 }
 0x168   : > { %4720 = vmatmul.mubr.msk.f32.gmra.mrb[80].mxu0 %vm333_vm9, %v5877_v4  ;;  %4760 = vmatmul.mubr.msk.f32.gmra.mrb[80].mxu1 %vm333_vm9, %v5877_v4 }
 0x169   : > { %1587 = vmatprep.mubr.f32.mxu0 %v9294_v33  ;;  %2100 = vmatprep.mubr.f32.mxu1 %v9294_v33 }
 0x16c   : > { %4721 = vmatmul.mubr.msk.f32.gmra.mrb[82].mxu0 %vm333_vm9, %v5886_v42  ;;  %4761 = vmatmul.mubr.msk.f32.gmra.mrb[82].mxu1 %vm333_vm9, %v5886_v42 }
 0x16d   : > { %1593 = vmatprep.mubr.f32.mxu0 %v9294_v33  ;;  %2106 = vmatprep.mubr.f32.mxu1 %v9294_v33 }
 0x170   : > { %4722 = vmatmul.mubr.msk.f32.gmra.mrb[84].mxu0 %vm333_vm9, %v5895_v30  ;;  %4762 = vmatmul.mubr.msk.f32.gmra.mrb[84].mxu1 %vm333_vm9, %v5895_v30 }
 0x171   : > { %1599 = vmatprep.mubr.f32.mxu0 %v9294_v33  ;;  %2112 = vmatprep.mubr.f32.mxu1 %v9294_v33 }
 0x174   : > { %4723 = vmatmul.mubr.msk.f32.gmra.mrb[86].mxu0 %vm333_vm9, %v5904_v25  ;;  %4763 = vmatmul.mubr.msk.f32.gmra.mrb[86].mxu1 %vm333_vm9, %v5904_v25 }
 0x175   : > { %1605 = vmatprep.mubr.f32.mxu0 %v9294_v33  ;;  %2118 = vmatprep.mubr.f32.mxu1 %v9294_v33 }
 0x178   : > { %4724 = vmatmul.mubr.msk.f32.gmra.mrb[88].mxu0 %vm333_vm9, %v5913_v32  ;;  %4764 = vmatmul.mubr.msk.f32.gmra.mrb[88].mxu1 %vm333_vm9, %v5913_v32 }
 0x179   : > { %1611 = vmatprep.mubr.f32.mxu0 %v9294_v33  ;;  %2124 = vmatprep.mubr.f32.mxu1 %v9294_v33 }
 0x17c   : > { %4725 = vmatmul.mubr.msk.f32.gmra.mrb[90].mxu0 %vm333_vm9, %v5922_v20  ;;  %4765 = vmatmul.mubr.msk.f32.gmra.mrb[90].mxu1 %vm333_vm9, %v5922_v20 }
 0x17d   : > { %1617 = vmatprep.mubr.f32.mxu0 %v9294_v33  ;;  %2130 = vmatprep.mubr.f32.mxu1 %v9294_v33 }
 0x180   : > { %4726 = vmatmul.mubr.msk.f32.gmra.mrb[92].mxu0 %vm333_vm9, %v5931_v38  ;;  %4766 = vmatmul.mubr.msk.f32.gmra.mrb[92].mxu1 %vm333_vm9, %v5931_v38 }
 0x181   : > { %1623 = vmatprep.mubr.f32.mxu0 %v9294_v33  ;;  %2136 = vmatprep.mubr.f32.mxu1 %v9294_v33 }
 0x184   : > { %4727 = vmatmul.mubr.msk.f32.gmra.mrb[94].mxu0 %vm333_vm9, %v5940_v39  ;;  %4767 = vmatmul.mubr.msk.f32.gmra.mrb[94].mxu1 %vm333_vm9, %v5940_v39 }
 0x185   : > { %1629 = vmatprep.mubr.f32.mxu0 %v9294_v33  ;;  %2142 = vmatprep.mubr.f32.mxu1 %v9294_v33 }
 0x188   : > { %4728 = vmatmul.mubr.msk.f32.gmra.mrb[96].mxu0 %vm333_vm9, %v5949_v29  ;;  %4768 = vmatmul.mubr.msk.f32.gmra.mrb[96].mxu1 %vm333_vm9, %v5949_v29 }
 0x189   : > { %1635 = vmatprep.mubr.f32.mxu0 %v9294_v33  ;;  %2148 = vmatprep.mubr.f32.mxu1 %v9294_v33 }
 0x18c   : > { %4729 = vmatmul.mubr.msk.f32.gmra.mrb[98].mxu0 %vm333_vm9, %v5958_v1  ;;  %4769 = vmatmul.mubr.msk.f32.gmra.mrb[98].mxu1 %vm333_vm9, %v5958_v1 }
 0x18d   : > { %1641 = vmatprep.mubr.f32.mxu0 %v9294_v33  ;;  %2154 = vmatprep.mubr.f32.mxu1 %v9294_v33 }
 0x190   : > { %4730 = vmatmul.mubr.msk.f32.gmra.mrb[100].mxu0 %vm333_vm9, %v5967_v60  ;;  %4770 = vmatmul.mubr.msk.f32.gmra.mrb[100].mxu1 %vm333_vm9, %v5967_v60  ;;  %v6304_v60 = vrot.slane %v690_v16, %v5493_v7 }
 0x191   : > { %1647 = vmatprep.mubr.f32.mxu0 %v9294_v33  ;;  %2160 = vmatprep.mubr.f32.mxu1 %v9294_v33 }
 0x192   : > { %vm703_vm5 = vcmp.eq.s32.totalorder %v6304_v60, %v5419_v23  ;;  %vm9106_vm12 = vcmp.eq.s32.totalorder %v6304_v60, %v5517_v21  ;;  %vm9094_vm6 = vcmp.eq.s32.totalorder %v6304_v60, %v5520_v22  ;;  %vm9077_vm2 = vcmp.eq.s32.totalorder %v6304_v60, %v5532_v26 }
 0x194   : > { %4731 = vmatmul.mubr.msk.f32.gmra.mrb[102].mxu0 %vm333_vm9, %v5976_v51  ;;  %4771 = vmatmul.mubr.msk.f32.gmra.mrb[102].mxu1 %vm333_vm9, %v5976_v51 }
 0x195   : > { %1653 = vmatprep.mubr.f32.mxu0 %v9294_v33  ;;  %2166 = vmatprep.mubr.f32.mxu1 %v9294_v33 }
 0x198   : > { %4732 = vmatmul.mubr.msk.f32.gmra.mrb[104].mxu0 %vm333_vm9, %v5985_v48  ;;  %4772 = vmatmul.mubr.msk.f32.gmra.mrb[104].mxu1 %vm333_vm9, %v5985_v48 }
 0x199   : > { %1659 = vmatprep.mubr.f32.mxu0 %v9294_v33  ;;  %2172 = vmatprep.mubr.f32.mxu1 %v9294_v33 }
 0x19b   : > { %v496_v51 = vpop.f32.mrb[0].mxu0  ;;  %v1015_v49 = vpop.f32.mrb[0].mxu1 }
 0x19c   : > { %v735_v50 = vsel %vm703_vm5, %v496_v51, 0.0  ;;  %v1254_v48 = vsel %vm9113_vm8, %v1015_v49, 0.0  ;;  %v498_v18 = vpop.f32.mrb[1].mxu0  ;;  %v1017_v27 = vpop.f32.mrb[1].mxu1  ;;  %4733 = vmatmul.mubr.msk.f32.gmra.mrb[106].mxu0 %vm333_vm9, %v5994_v53  ;;  %4773 = vmatmul.mubr.msk.f32.gmra.mrb[106].mxu1 %vm333_vm9, %v5994_v53 }
 0x19d   : > { %v736_v28 = vsel %vm9112_vm0, %v498_v18, 0.0  ;;  %v1255_v11 = vsel %vm9107_vm1, %v1017_v27, 0.0  ;;  %1665 = vmatprep.mubr.f32.mxu0 %v9294_v33  ;;  %2178 = vmatprep.mubr.f32.mxu1 %v9294_v33 }
 0x19f   : > { %v502_v0 = vpop.f32.mrb[2].mxu0  ;;  %v1021_v19 = vpop.f32.mrb[2].mxu1 }
 0x1a0   : > { %v737_v53 = vsel %vm9106_vm12, %v502_v0, 0.0  ;;  %v1256_v24 = vsel %vm9105_vm13, %v1021_v19, 0.0  ;;  %v504_v4 = vpop.f32.mrb[3].mxu0  ;;  %v1023_v42 = vpop.f32.mrb[3].mxu1  ;;  %4734 = vmatmul.mubr.msk.f32.gmra.mrb[108].mxu0 %vm333_vm9, %v6003_v52  ;;  %4774 = vmatmul.mubr.msk.f32.gmra.mrb[108].mxu1 %vm333_vm9, %v6003_v52 }
 0x1a1   : > { %v767_v30 = vadd.f32 %v737_v53, %v735_v50  ;;  %v1286_v25 = vadd.f32 %v1256_v24, %v1254_v48  ;;  %v738_v32 = vsel %vm9100_vm14, %v504_v4, 0.0  ;;  %v1257_v20 = vsel %vm9099_vm11, %v1023_v42, 0.0  ;;  %1671 = vmatprep.mubr.f32.mxu0 %v9294_v33  ;;  %2184 = vmatprep.mubr.f32.mxu1 %v9294_v33 }
 0x1a2   : > { %v788_v38 = vadd.f32 %v738_v32, %v736_v28  ;;  %v1307_v39 = vadd.f32 %v1257_v20, %v1255_v11  ;;  %v6435_v24 = vadd.s32 40, %v5419_v23 }
 0x1a3   : > { %v508_v29 = vpop.f32.mrb[4].mxu0  ;;  %v1027_v52 = vpop.f32.mrb[4].mxu1 }
 0x1a4   : > { %v739_v1 = vsel %vm9094_vm6, %v508_v29, 0.0  ;;  %v1258_v62 = vsel %vm9093_vm7, %v1027_v52, 0.0  ;;  %v510_v59 = vpop.f32.mrb[5].mxu0  ;;  %v1029_v31 = vpop.f32.mrb[5].mxu1  ;;  %4735 = vmatmul.mubr.msk.f32.gmra.mrb[110].mxu0 %vm333_vm9, %v6012_v6  ;;  %4775 = vmatmul.mubr.msk.f32.gmra.mrb[110].mxu1 %vm333_vm9, %v6012_v6 }
 0x1a5   : > { %v768_v12 = vadd.f32 %v767_v30, %v739_v1  ;;  %v1287_v3 = vadd.f32 %v1286_v25, %v1258_v62  ;;  %v740_v61 = vsel %vm9092_vm15, %v510_v59, 0.0  ;;  %v1259_v63 = vsel %vm9075_vm10, %v1029_v31, 0.0  ;;  %1677 = vmatprep.mubr.f32.mxu0 %v9294_v33  ;;  %2190 = vmatprep.mubr.f32.mxu1 %v9294_v33 }
 0x1a6   : > { %v789_v2 = vadd.f32 %v788_v38, %v740_v61  ;;  %v1308_v16 = vadd.f32 %v1307_v39, %v1259_v63  ;;  %vm9078_vm10 = vcmp.eq.s32.totalorder %v6315_v17, %v5532_v26  ;;  %v6460_v1 = vadd.s32 48, %v5419_v23 }
 0x1a7   : > { %v514_v35 = vpop.f32.mrb[6].mxu0  ;;  %v1033_v6 = vpop.f32.mrb[6].mxu1  ;;  %v6470_v31 = vadd.s32 64, %v5419_v23 }
 0x1a8   : > { %v741_v51 = vsel %vm9077_vm2, %v514_v35, 0.0  ;;  %v1260_v49 = vsel %vm9076_vm3, %v1033_v6, 0.0  ;;  %v516_v50 = vpop.f32.mrb[7].mxu0  ;;  %v1035_v48 = vpop.f32.mrb[7].mxu1  ;;  %4736 = vmatmul.mubr.msk.f32.gmra.mrb[112].mxu0 %vm333_vm9, %v6021_v5  ;;  %4776 = vmatmul.mubr.msk.f32.gmra.mrb[112].mxu1 %vm333_vm9, %v6021_v5  ;;  %vm9083_vm3 = vcmp.eq.s32.totalorder %v6304_v60, %v6406_v43  ;;  %vm9082_vm2 = vcmp.eq.s32.totalorder %v6307_v36, %v6406_v43 }
 0x1a9   : > { %v769_v18 = vadd.f32 %v768_v12, %v741_v51  ;;  %v1288_v27 = vadd.f32 %v1287_v3, %v1260_v49  ;;  %v742_v28 = vsel %vm9079_vm4, %v516_v50, 0.0  ;;  %v1261_v11 = vsel %vm9078_vm10, %v1035_v48, 0.0  ;;  %1683 = vmatprep.mubr.f32.mxu0 %v9294_v33  ;;  %2196 = vmatprep.mubr.f32.mxu1 %v9294_v33 }
 0x1aa   : > { %v790_v0 = vadd.f32 %v789_v2, %v742_v28  ;;  %v1309_v19 = vadd.f32 %v1308_v16, %v1261_v11  ;;  %vm9080_vm10 = vcmp.eq.s32.totalorder %v6311_v37, %v6406_v43  ;;  %vm9081_vm4 = vcmp.eq.s32.totalorder %v6315_v17, %v6406_v43 }
 0x1ab   : > { %v520_v53 = vpop.f32.mrb[8].mxu0  ;;  %v1039_v5 = vpop.f32.mrb[8].mxu1  ;;  %v6473_v12 = vadd.s32 72, %v5419_v23  ;;  %v6498_v48 = vadd.s32 80, %v5419_v23  ;;  %v6510_v11 = vadd.s32 96, %v5419_v23  ;;  %vm9102_vm15 = vcmp.eq.s32.totalorder %v6304_v60, %v6470_v31 }
 0x1ac   : > { %v743_v4 = vsel %vm9083_vm3, %v520_v53, 0.0  ;;  %v1262_v42 = vsel %vm9082_vm2, %v1039_v5, 0.0  ;;  %v522_v30 = vpop.f32.mrb[9].mxu0  ;;  %v1041_v25 = vpop.f32.mrb[9].mxu1  ;;  %4737 = vmatmul.mubr.msk.f32.gmra.mrb[114].mxu0 %vm333_vm9, %v6030_v45  ;;  %4777 = vmatmul.mubr.msk.f32.gmra.mrb[114].mxu1 %vm333_vm9, %v6030_v45  ;;  %v6463_v45 = vadd.s32 56, %v5419_v23  ;;  %vm9084_vm2 = vcmp.eq.s32.totalorder %v6311_v37, %v6435_v24 }
 0x1ad   : > { %v770_v32 = vadd.f32 %v769_v18, %v743_v4  ;;  %v1289_v20 = vadd.f32 %v1288_v27, %v1262_v42  ;;  %v744_v38 = vsel %vm9080_vm10, %v522_v30, 0.0  ;;  %v1263_v39 = vsel %vm9081_vm4, %v1041_v25, 0.0  ;;  %1689 = vmatprep.mubr.f32.mxu0 %v9294_v33  ;;  %2202 = vmatprep.mubr.f32.mxu1 %v9294_v33 }
 0x1ae   : > { %v791_v29 = vadd.f32 %v790_v0, %v744_v38  ;;  %v1310_v52 = vadd.f32 %v1309_v19, %v1263_v39  ;;  %vm9087_vm10 = vcmp.eq.s32.totalorder %v6304_v60, %v6435_v24  ;;  %vm9086_vm4 = vcmp.eq.s32.totalorder %v6307_v36, %v6435_v24 }
 0x1af   : > { %v526_v62 = vpop.f32.mrb[10].mxu0  ;;  %v1045_v59 = vpop.f32.mrb[10].mxu1  ;;  %vm9085_vm3 = vcmp.eq.s32.totalorder %v6315_v17, %v6435_v24  ;;  %v3502_v18 = vrot.slane %v5571_v13, %v5493_v7  ;;  %vm9101_vm7 = vcmp.eq.s32.totalorder %v6307_v36, %v6470_v31  ;;  %vm9103_vm6 = vcmp.eq.s32.totalorder %v6311_v37, %v6470_v31 }
 0x1b0   : > { %v745_v3 = vsel %vm9087_vm10, %v526_v62, 0.0  ;;  %v1264_v61 = vsel %vm9086_vm4, %v1045_v59, 0.0  ;;  %v528_v63 = vpop.f32.mrb[11].mxu0  ;;  %v1047_v2 = vpop.f32.mrb[11].mxu1  ;;  %4738 = vmatmul.mubr.msk.f32.gmra.mrb[116].mxu0 %vm333_vm9, %v6039_v44  ;;  %4778 = vmatmul.mubr.msk.f32.gmra.mrb[116].mxu1 %vm333_vm9, %v6039_v44  ;;  %v6501_v44 = vadd.s32 88, %v5419_v23  ;;  %vm9089_vm4 = vcmp.eq.s32.totalorder %v6311_v37, %v6460_v1 }
 0x1b1   : > { %v771_v16 = vadd.f32 %v770_v32, %v745_v3  ;;  %v1290_v35 = vadd.f32 %v1289_v20, %v1264_v61  ;;  %v746_v6 = vsel %vm9084_vm2, %v528_v63, 0.0  ;;  %v1265_v51 = vsel %vm9085_vm3, %v1047_v2, 0.0  ;;  %1695 = vmatprep.mubr.f32.mxu0 %v9294_v33  ;;  %2208 = vmatprep.mubr.f32.mxu1 %v9294_v33 }
 0x1b2   : > { %v792_v49 = vadd.f32 %v791_v29, %v746_v6  ;;  %v1311_v50 = vadd.f32 %v1310_v52, %v1265_v51  ;;  %vm9091_vm2 = vcmp.eq.s32.totalorder %v6304_v60, %v6460_v1  ;;  %vm9088_vm3 = vcmp.eq.s32.totalorder %v6307_v36, %v6460_v1 }
 0x1b3   : > { %v532_v27 = vpop.f32.mrb[12].mxu0  ;;  %v1051_v28 = vpop.f32.mrb[12].mxu1  ;;  %vm9090_vm10 = vcmp.eq.s32.totalorder %v6315_v17, %v6460_v1  ;;  %v4015_v32 = vrot.slane %v5573_v14, %v5493_v7  ;;  %vm9108_vm11 = vcmp.eq.s32.totalorder %v6315_v17, %v6473_v12  ;;  %v9297_v51 = vshra.s32 %v5457_v55, 7 }
 0x1b4   : > { %v747_v0 = vsel %vm9091_vm2, %v532_v27, 0.0  ;;  %v1266_v19 = vsel %vm9088_vm3, %v1051_v28, 0.0  ;;  %v534_v53 = vpop.f32.mrb[13].mxu0  ;;  %v1053_v5 = vpop.f32.mrb[13].mxu1  ;;  %4739 = vmatmul.mubr.msk.f32.gmra.mrb[118].mxu0 %vm333_vm9, %v6048_v9  ;;  %4779 = vmatmul.mubr.msk.f32.gmra.mrb[118].mxu1 %vm333_vm9, %v6048_v9  ;;  %vm9096_vm3 = vcmp.eq.s32.totalorder %v6304_v60, %v6463_v45  ;;  %vm9098_vm2 = vcmp.eq.s32.totalorder %v6315_v17, %v6463_v45 }
 0x1b5   : > { %v772_v4 = vadd.f32 %v771_v16, %v747_v0  ;;  %v1291_v42 = vadd.f32 %v1290_v35, %v1266_v19  ;;  %v748_v30 = vsel %vm9089_vm4, %v534_v53, 0.0  ;;  %v1267_v25 = vsel %vm9090_vm10, %v1053_v5, 0.0  ;;  %1701 = vmatprep.mubr.f32.mxu0 %v9294_v33  ;;  %2214 = vmatprep.mubr.f32.mxu1 %v9294_v33 }
 0x1b6   : > { %v793_v20 = vadd.f32 %v792_v49, %v748_v30  ;;  %v1312_v38 = vadd.f32 %v1311_v50, %v1267_v25  ;;  %vm9095_vm4 = vcmp.eq.s32.totalorder %v6307_v36, %v6463_v45  ;;  %vm9097_vm10 = vcmp.eq.s32.totalorder %v6311_v37, %v6463_v45 }
 0x1b7   : > { %v538_v9 = vpop.f32.mrb[14].mxu0  ;;  %v1057_v39 = vpop.f32.mrb[14].mxu1  ;;  %v3477_v49 = vrot.slane %v9297_v51, %v5493_v7  ;;  %vm9117_vm14 = vcmp.eq.s32.totalorder %v6304_v60, %v6498_v48  ;;  %v9298_v19 = vshra.s32 %v5459_v56, 7  ;;  %vm9118_vm13 = vcmp.eq.s32.totalorder %v6307_v36, %v6501_v44 }
 0x1b8   : > { %v749_v29 = vsel %vm9096_vm3, %v538_v9, 0.0  ;;  %v1268_v52 = vsel %vm9095_vm4, %v1057_v39, 0.0  ;;  %v540_v62 = vpop.f32.mrb[15].mxu0  ;;  %v1059_v59 = vpop.f32.mrb[15].mxu1  ;;  %4740 = vmatmul.mubr.msk.f32.gmra.mrb[120].mxu0 %vm333_vm9, %v6057_v8  ;;  %4780 = vmatmul.mubr.msk.f32.gmra.mrb[120].mxu1 %vm333_vm9, %v6057_v8  ;;  %vm9104_vm4 = vcmp.eq.s32.totalorder %v6315_v17, %v6470_v31  ;;  %vm9111_vm3 = vcmp.eq.s32.totalorder %v6304_v60, %v6473_v12 }
 0x1b9   : > { %v773_v3 = vadd.f32 %v772_v4, %v749_v29  ;;  %v1292_v61 = vadd.f32 %v1291_v42, %v1268_v52  ;;  %v750_v63 = vsel %vm9097_vm10, %v540_v62, 0.0  ;;  %v1269_v2 = vsel %vm9098_vm2, %v1059_v59, 0.0  ;;  %1707 = vmatprep.mubr.f32.mxu0 %v9294_v33  ;;  %2220 = vmatprep.mubr.f32.mxu1 %v9294_v33 }
 0x1ba   : > { %v794_v8 = vadd.f32 %v793_v20, %v750_v63  ;;  %v1313_v16 = vadd.f32 %v1312_v38, %v1269_v2  ;;  %vm9110_vm10 = vcmp.eq.s32.totalorder %v6307_v36, %v6473_v12  ;;  %vm9109_vm2 = vcmp.eq.s32.totalorder %v6311_v37, %v6473_v12 }
 0x1bb   : > { %v544_v35 = vpop.f32.mrb[16].mxu0  ;;  %v1063_v6 = vpop.f32.mrb[16].mxu1  ;;  %v3990_v53 = vrot.slane %v9298_v19, %v5493_v7  ;;  %v6615_v9 = vrot.slane %v3477_v49, %v5493_v7  ;;  %vm726_vm12 = vcmp.eq.s32.totalorder %v6311_v37, %v6501_v44  ;;  %vm1245_vm1 = vcmp.eq.s32.totalorder %v6315_v17, %v6501_v44 }
 0x1bc   : > { %v751_v50 = vsel %vm9102_vm15, %v544_v35, 0.0  ;;  %v1270_v27 = vsel %vm9101_vm7, %v1063_v6, 0.0  ;;  %v546_v28 = vpop.f32.mrb[17].mxu0  ;;  %v1065_v0 = vpop.f32.mrb[17].mxu1  ;;  %4741 = vmatmul.mubr.msk.f32.gmra.mrb[122].mxu0 %vm333_vm9, %v6066_v34  ;;  %4781 = vmatmul.mubr.msk.f32.gmra.mrb[122].mxu1 %vm333_vm9, %v6066_v34  ;;  %vm9114_vm7 = vcmp.eq.s32.totalorder %v6307_v36, %v6498_v48  ;;  %vm9116_vm15 = vcmp.eq.s32.totalorder %v6311_v37, %v6498_v48 }
 0x1bd   : > { %v774_v5 = vadd.f32 %v773_v3, %v751_v50  ;;  %v1293_v4 = vadd.f32 %v1292_v61, %v1270_v27  ;;  %v752_v42 = vsel %vm9103_vm6, %v546_v28, 0.0  ;;  %v1271_v30 = vsel %vm9104_vm4, %v1065_v0, 0.0  ;;  %1713 = vmatprep.mubr.f32.mxu0 %v9294_v33  ;;  %2226 = vmatprep.mubr.f32.mxu1 %v9294_v33 }
 0x1be   : > { %v795_v34 = vadd.f32 %v794_v8, %v752_v42  ;;  %v1314_v25 = vadd.f32 %v1313_v16, %v1271_v30  ;;  %vm9115_vm6 = vcmp.eq.s32.totalorder %v6315_v17, %v6498_v48  ;;  %vm725_vm4 = vcmp.eq.s32.totalorder %v6304_v60, %v6501_v44 }
 0x1bf   : > { %v550_v20 = vpop.f32.mrb[18].mxu0  ;;  %v1069_v38 = vpop.f32.mrb[18].mxu1  ;;  %v6632_v59 = vrot.slane %v3990_v53, %v5493_v7  ;;  %v3512_v16 = vrot.slane %v3502_v18, %v5493_v7  ;;  %v4025_v35 = vrot.slane %v4015_v32, %v5493_v7 }
 0x1c0   : > { %v753_v39 = vsel %vm9111_vm3, %v550_v20, 0.0  ;;  %v1272_v29 = vsel %vm9110_vm10, %v1069_v38, 0.0  ;;  %v552_v52 = vpop.f32.mrb[19].mxu0  ;;  %v1071_v62 = vpop.f32.mrb[19].mxu1  ;;  %4742 = vmatmul.mubr.msk.f32.gmra.mrb[124].mxu0 %vm333_vm9, %v6081_v54  ;;  %4782 = vmatmul.mubr.msk.f32.gmra.mrb[124].mxu1 %vm333_vm9, %v6081_v54  ;;  %vm3495_vm10 = vcmp.eq.s32.totalorder %v6116_v40, %v5520_v22  ;;  %vm3497_vm3 = vcmp.eq.s32.totalorder %v6116_v40, %v5532_v26  ;;  %v5131_v38 = vld [vmem:[%s5695_s6] sm:$0xff] }
 0x1c1   : > { %v775_v3 = vadd.f32 %v774_v5, %v753_v39  ;;  %v1294_v61 = vadd.f32 %v1293_v4, %v1272_v29  ;;  %v754_v63 = vsel %vm9109_vm2, %v552_v52, 0.0  ;;  %v1273_v2 = vsel %vm9108_vm11, %v1071_v62, 0.0  ;;  %1719 = vmatprep.mubr.f32.mxu0 %v9294_v33  ;;  %2232 = vmatprep.mubr.f32.mxu1 %v9294_v33 }
 0x1c2   : > { %v796_v54 = vadd.f32 %v795_v34, %v754_v63  ;;  %v1315_v8 = vadd.f32 %v1314_v25, %v1273_v2  ;;  %vm3490_vm11 = vcmp.eq.s32.totalorder %v6615_v9, %v5419_v23  ;;  %vm3492_vm2 = vcmp.eq.s32.totalorder %v6615_v9, %v5517_v21 }
 0x1c3   : > { %v556_v6 = vpop.f32.mrb[20].mxu0  ;;  %v1075_v51 = vpop.f32.mrb[20].mxu1  ;;  %vm4003_vm0 = vcmp.eq.s32.totalorder %v6632_v59, %v5419_v23  ;;  %vm4005_vm8 = vcmp.eq.s32.totalorder %v6632_v59, %v5517_v21  ;;  %v5027_v4 = vpack.c.bf16 %v3512_v16, %v3512_v16  ;;  %v5039_v42 = vpack.c.bf16 %v4025_v35, %v4025_v35  ;;  %v5132_v16 = vld [vmem:[%s5695_s6 + $0x8] sm:$0xff] }
 0x1c4   : > { %v755_v13 = vsel %vm9117_vm14, %v556_v6, 0.0  ;;  %v1274_v14 = vsel %vm9114_vm7, %v1075_v51, 0.0  ;;  %v558_v18 = vpop.f32.mrb[21].mxu0  ;;  %v1077_v32 = vpop.f32.mrb[21].mxu1  ;;  %4743 = vmatmul.mubr.msk.f32.gmra.mrb[126].mxu0 %vm333_vm9, %v6096_v41  ;;  %4783 = vmatmul.mubr.msk.f32.gmra.mrb[126].mxu1 %vm333_vm9, %v6096_v41  ;;  %vm6686_vm7 = vmpackc.low %vm3497_vm3, %vm3495_vm10  ;;  %vm3494_vm10 = vcmp.eq.s32.totalorder %v6615_v9, %v5520_v22  ;;  %vm3496_vm3 = vcmp.eq.s32.totalorder %v6615_v9, %v5532_v26 }
 0x1c5   : > { %v776_v49 = vadd.f32 %v775_v3, %v755_v13  ;;  %v1295_v50 = vadd.f32 %v1294_v61, %v1274_v14  ;;  %v756_v27 = vsel %vm9116_vm15, %v558_v18, 0.0  ;;  %v1275_v28 = vsel %vm9115_vm6, %v1077_v32, 0.0  ;;  %2561 = vmatprep.mubr.f32.mxu0 %v9294_v33  ;;  %3074 = vmatprep.mubr.f32.mxu1 %v9294_v33  ;;  %vm6700_vm14 = vmpackc.low %vm3492_vm2, %vm3490_vm11 }
 0x1c6   : > { %v797_v41 = vadd.f32 %v796_v54, %v756_v27  ;;  %v1316_v0 = vadd.f32 %v1315_v8, %v1275_v28  ;;  %vm4008_vm6 = vcmp.eq.s32.totalorder %v6129_v10, %v5520_v22  ;;  %vm4010_vm15 = vcmp.eq.s32.totalorder %v6129_v10, %v5532_v26  ;;  %vm5040_vm11 = vmpackc.low %vm4005_vm8, %vm4003_vm0 }
 0x1c7   : > { %v562_v53 = vpop.f32.mrb[22].mxu0  ;;  %v1081_v5 = vpop.f32.mrb[22].mxu1  ;;  %vm4007_vm2 = vcmp.eq.s32.totalorder %v6632_v59, %v5520_v22  ;;  %vm5043_vm8 = vmpackc.low %vm4010_vm15, %vm4008_vm6  ;;  %vm727_vm0 = vcmp.eq.s32.totalorder %v6304_v60, %v6510_v11  ;;  %vm1247_vm15 = vcmp.eq.s32.totalorder %v6315_v17, %v6510_v11 }
 0x1c8   : > { %v757_v30 = vsel %vm725_vm4, %v562_v53, 0.0  ;;  %v1276_v34 = vsel %vm9118_vm13, %v1081_v5, 0.0  ;;  %v564_v25 = vpop.f32.mrb[23].mxu0  ;;  %v1083_v20 = vpop.f32.mrb[23].mxu1  ;;  %4792 = vmatmul.mubr.msk.f32.vlgmr.msra.gmra.mrb[128].mxu0 %vm333_vm9, %v5131_v38  ;;  %4832 = vmatmul.mubr.msk.f32.vlgmr.msra.gmra.mrb[128].mxu1 %vm333_vm9, %v5131_v38  ;;  %vm4009_vm13 = vcmp.eq.s32.totalorder %v6632_v59, %v5532_v26  ;;  %vm6757_vm6 = vmpackc.low %vm3496_vm3, %vm3494_vm10 }
 0x1c9   : > { %v777_v39 = vadd.f32 %v776_v49, %v757_v30  ;;  %v1296_v29 = vadd.f32 %v1295_v50, %v1276_v34  ;;  %v758_v52 = vsel %vm726_vm12, %v564_v25, 0.0  ;;  %v1277_v62 = vsel %vm1245_vm1, %v1083_v20, 0.0  ;;  %5029 = vmatpush1.bf16.msk.msra.mxu0 %vm6700_vm14, %v5027_v4  ;;  %5041 = vmatpush1.bf16.msk.msra.mxu1 %vm5040_vm11, %v5039_v42  ;;  %vm5046_vm10 = vmpackc.low %vm4009_vm13, %vm4007_vm2 }
 0x1ca   : > { %v798_v3 = vadd.f32 %v797_v41, %v758_v52  ;;  %v1317_v61 = vadd.f32 %v1316_v0, %v1277_v62  ;;  %5032 = vmatprep.subr.msk.bf16.mxu0 %vm6686_vm7, %v6181_v58  ;;  %5044 = vmatprep.subr.msk.bf16.mxu1 %vm5043_vm8, %v6183_v15  ;;  %vm1246_vm14 = vcmp.eq.s32.totalorder %v6307_v36, %v6510_v11  ;;  %v6762_v58 = vadd.s32 104, %v5419_v23  ;;  %v5133_v0 = vld [vmem:[%s5695_s6 + $0x10] sm:$0xff]  ;;  %v5134_v52 = vld [vmem:[%s5695_s6 + $0x18] sm:$0xff] }
 0x1cb   : > { %v568_v63 = vpop.f32.mrb[24].mxu0  ;;  %v1087_v2 = vpop.f32.mrb[24].mxu1  ;;  %2567 = vmatprep.mubr.f32.mxu0 %v9294_v33  ;;  %3080 = vmatprep.mubr.f32.mxu1 %v9294_v33  ;;  %vm728_vm7 = vcmp.eq.s32.totalorder %v6311_v37, %v6510_v11  ;;  %v6798_v49 = vadd.s32 112, %v5419_v23  ;;  %v6826_v25 = vadd.s32 120, %v5419_v23 }
 0x1cc   : > { %v759_v15 = vsel %vm727_vm0, %v568_v63, 0.0  ;;  %v1278_v54 = vsel %vm1246_vm14, %v1087_v2, 0.0  ;;  %v570_v8 = vpop.f32.mrb[25].mxu0  ;;  %v1089_v9 = vpop.f32.mrb[25].mxu1  ;;  %4793 = vmatmul.mubr.msk.f32.gmra.mrb[130].mxu0 %vm333_vm9, %v5132_v16  ;;  %4833 = vmatmul.mubr.msk.f32.gmra.mrb[130].mxu1 %vm333_vm9, %v5132_v16  ;;  %vm729_vm13 = vcmp.eq.s32.totalorder %v6304_v60, %v6762_v58  ;;  %vm1248_vm3 = vcmp.eq.s32.totalorder %v6307_v36, %v6762_v58 }
 0x1cd   : > { %v778_v35 = vadd.f32 %v777_v39, %v759_v15  ;;  %v1297_v6 = vadd.f32 %v1296_v29, %v1278_v54  ;;  %v760_v51 = vsel %vm728_vm7, %v570_v8, 0.0  ;;  %v1279_v13 = vsel %vm1247_vm15, %v1089_v9, 0.0  ;;  %5035 = vmatpush1.bf16.msk.msra.mxu0 %vm6757_vm6, %v5027_v4  ;;  %5047 = vmatpush1.bf16.msk.msra.mxu1 %vm5046_vm10, %v5039_v42 }
 0x1ce   : > { %v799_v14 = vadd.f32 %v798_v3, %v760_v51  ;;  %v1318_v18 = vadd.f32 %v1317_v61, %v1279_v13  ;;  %2573 = vmatprep.mubr.f32.mxu0 %v9294_v33  ;;  %3086 = vmatprep.mubr.f32.mxu1 %v9294_v33  ;;  %vm730_vm11 = vcmp.eq.s32.totalorder %v6311_v37, %v6762_v58 }
 0x1cf   : > { %v574_v59 = vpop.f32.mrb[26].mxu0  ;;  %v1093_v32 = vpop.f32.mrb[26].mxu1  ;;  %vm9119_vm2 = vcmp.eq.s32.totalorder %v6315_v17, %v6762_v58  ;;  %vm9121_vm8 = vcmp.eq.s32.totalorder %v6304_v60, %v6798_v49  ;;  %vm9120_vm6 = vcmp.eq.s32.totalorder %v6307_v36, %v6798_v49  ;;  %vm9123_vm10 = vcmp.eq.s32.totalorder %v6311_v37, %v6798_v49 }
 0x1d0   : > { %v761_v50 = vsel %vm729_vm13, %v574_v59, 0.0  ;;  %v1280_v27 = vsel %vm1248_vm3, %v1093_v32, 0.0  ;;  %v576_v28 = vpop.f32.mrb[27].mxu0  ;;  %v1095_v41 = vpop.f32.mrb[27].mxu1  ;;  %4794 = vmatmul.mubr.msk.f32.gmra.mrb[132].mxu0 %vm333_vm9, %v5133_v0  ;;  %4834 = vmatmul.mubr.msk.f32.gmra.mrb[132].mxu1 %vm333_vm9, %v5133_v0 }
 0x1d1   : > { %v779_v19 = vadd.f32 %v778_v35, %v761_v50  ;;  %v1298_v53 = vadd.f32 %v1297_v6, %v1280_v27  ;;  %v762_v5 = vsel %vm730_vm11, %v576_v28, 0.0  ;;  %v1281_v4 = vsel %vm9119_vm2, %v1095_v41, 0.0  ;;  %2579 = vmatprep.mubr.f32.mxu0 %v9294_v33  ;;  %3092 = vmatprep.mubr.f32.mxu1 %v9294_v33  ;;  %v5135_v6 = vld [vmem:[%s5695_s6 + $0x20] sm:$0xff] }
 0x1d2   : > { %v800_v40 = vadd.f32 %v799_v14, %v762_v5  ;;  %v1319_v42 = vadd.f32 %v1318_v18, %v1281_v4  ;;  %vm9122_vm2 = vcmp.eq.s32.totalorder %v6315_v17, %v6798_v49 }
 0x1d3   : > { %v580_v30 = vpop.f32.mrb[28].mxu0  ;;  %v1099_v34 = vpop.f32.mrb[28].mxu1 }
 0x1d4   : > { %v763_v20 = vsel %vm9121_vm8, %v580_v30, 0.0  ;;  %v1282_v38 = vsel %vm9120_vm6, %v1099_v34, 0.0  ;;  %v582_v39 = vpop.f32.mrb[29].mxu0  ;;  %v1101_v29 = vpop.f32.mrb[29].mxu1  ;;  %4795 = vmatmul.mubr.msk.f32.gmra.mrb[134].mxu0 %vm333_vm9, %v5134_v52  ;;  %4835 = vmatmul.mubr.msk.f32.gmra.mrb[134].mxu1 %vm333_vm9, %v5134_v52  ;;  %vm733_vm6 = vcmp.eq.s32.totalorder %v6304_v60, %v6826_v25  ;;  %vm9126_vm8 = vcmp.eq.s32.totalorder %v6307_v36, %v6826_v25 }
 0x1d5   : > { %v780_v62 = vadd.f32 %v779_v19, %v763_v20  ;;  %v1299_v3 = vadd.f32 %v1298_v53, %v1282_v38  ;;  %v764_v61 = vsel %vm9123_vm10, %v582_v39, 0.0  ;;  %v1283_v63 = vsel %vm9122_vm2, %v1101_v29, 0.0  ;;  %2585 = vmatprep.mubr.f32.mxu0 %v9294_v33  ;;  %3098 = vmatprep.mubr.f32.mxu1 %v9294_v33 }
 0x1d6   : > { %v801_v2 = vadd.f32 %v800_v40, %v764_v61  ;;  %v1320_v10 = vadd.f32 %v1319_v42, %v1283_v63  ;;  %vm9124_vm2 = vcmp.eq.s32.totalorder %v6311_v37, %v6826_v25  ;;  %vm9125_vm10 = vcmp.eq.s32.totalorder %v6315_v17, %v6826_v25  ;;  %v5136_v42 = vld [vmem:[%s5695_s6 + $0x28] sm:$0xff] }
 0x1d7   : > { %v586_v15 = vpop.f32.mrb[30].mxu0  ;;  %v1105_v54 = vpop.f32.mrb[30].mxu1 }
 0x1d8   : > { %v765_v8 = vsel %vm733_vm6, %v586_v15, 0.0  ;;  %v1284_v9 = vsel %vm9126_vm8, %v1105_v54, 0.0  ;;  %v588_v16 = vpop.f32.mrb[31].mxu0  ;;  %v1107_v35 = vpop.f32.mrb[31].mxu1  ;;  %4796 = vmatmul.mubr.msk.f32.gmra.mrb[136].mxu0 %vm333_vm9, %v5135_v6  ;;  %4836 = vmatmul.mubr.msk.f32.gmra.mrb[136].mxu1 %vm333_vm9, %v5135_v6  ;;  %vm9321_vm8 = vcmp.eq.s32.totalorder %v6307_v36, %v6406_v43 }
 0x1d9   : > { %v781_v51 = vadd.f32 %v780_v62, %v765_v8  ;;  %v1300_v13 = vadd.f32 %v1299_v3, %v1284_v9  ;;  %v766_v14 = vsel %vm9124_vm2, %v588_v16, 0.0  ;;  %v1285_v18 = vsel %vm9125_vm10, %v1107_v35, 0.0  ;;  %2591 = vmatprep.mubr.f32.mxu0 %v9294_v33  ;;  %3104 = vmatprep.mubr.f32.mxu1 %v9294_v33  ;;  %v5137_v9 = vld [vmem:[%s5695_s6 + $0x30] sm:$0xff] }
 0x1da   : > { %v802_v59 = vadd.f32 %v801_v2, %v766_v14  ;;  %v1321_v32 = vadd.f32 %v1320_v10, %v1285_v18  ;;  %vm9305_vm2 = vcmp.eq.s32.totalorder %v6307_v36, %v5419_v23  ;;  %vm9306_vm10 = vcmp.eq.s32.totalorder %v6311_v37, %v5419_v23 }
 0x1db   : > { %v782_v50 = vrot.slane %v781_v51, 4  ;;  %v1301_v27 = vrot.slane %v1300_v13, 4  ;;  %v592_v28 = vpop.f32.mrb[32].mxu0  ;;  %v1111_v41 = vpop.f32.mrb[32].mxu1 }
 0x1dc   : > { %v803_v0 = vrot.slane %v802_v59, 4  ;;  %v1322_v19 = vrot.slane %v1321_v32, 4  ;;  %v811_v53 = vsel %vm703_vm5, %v592_v28, 0.0  ;;  %v1330_v5 = vsel %vm9305_vm2, %v1111_v41, 0.0  ;;  %v594_v4 = vpop.f32.mrb[33].mxu0  ;;  %v1113_v40 = vpop.f32.mrb[33].mxu1  ;;  %4797 = vmatmul.mubr.msk.f32.gmra.mrb[138].mxu0 %vm333_vm9, %v5136_v42  ;;  %4837 = vmatmul.mubr.msk.f32.gmra.mrb[138].mxu1 %vm333_vm9, %v5136_v42 }
 0x1dd   : > { %v783_v30 = vadd.f32 %v782_v50, %v781_v51  ;;  %v1302_v34 = vadd.f32 %v1301_v27, %v1300_v13  ;;  %v812_v20 = vsel %vm9306_vm10, %v594_v4, 0.0  ;;  %vm9307_vm5 = vcmp.eq.s32.totalorder %v6315_v17, %v5419_v23  ;;  %2597 = vmatprep.mubr.f32.mxu0 %v9294_v33  ;;  %3110 = vmatprep.mubr.f32.mxu1 %v9294_v33 }
 0x1de   : > { %v1331_v38 = vsel %vm9307_vm5, %v1113_v40, 0.0  ;;  %v804_v39 = vadd.f32 %v803_v0, %v802_v59  ;;  %v1323_v29 = vadd.f32 %v1322_v19, %v1321_v32  ;;  %vm9308_vm2 = vcmp.eq.s32.totalorder %v6304_v60, %v5517_v21 }
 0x1df   : > { %v784_v52 = vrot.slane %v783_v30, 2  ;;  %v1303_v62 = vrot.slane %v1302_v34, 2  ;;  %v598_v3 = vpop.f32.mrb[34].mxu0  ;;  %v1117_v61 = vpop.f32.mrb[34].mxu1  ;;  %vm9309_vm10 = vcmp.eq.s32.totalorder %v6307_v36, %v5517_v21  ;;  %vm9310_vm5 = vcmp.eq.s32.totalorder %v6311_v37, %v5517_v21 }
 0x1e0   : > { %v805_v63 = vrot.slane %v804_v39, 2  ;;  %v1324_v2 = vrot.slane %v1323_v29, 2  ;;  %v813_v10 = vsel %vm9308_vm2, %v598_v3, 0.0  ;;  %v1332_v15 = vsel %vm9309_vm10, %v1117_v61, 0.0  ;;  %v600_v54 = vpop.f32.mrb[35].mxu0  ;;  %v1119_v8 = vpop.f32.mrb[35].mxu1  ;;  %4798 = vmatmul.mubr.msk.f32.gmra.mrb[140].mxu0 %vm333_vm9, %v5137_v9  ;;  %4838 = vmatmul.mubr.msk.f32.gmra.mrb[140].mxu1 %vm333_vm9, %v5137_v9 }
 0x1e1   : > { %v785_v16 = vadd.f32 %v784_v52, %v783_v30  ;;  %v1304_v35 = vadd.f32 %v1303_v62, %v1302_v34  ;;  %v843_v6 = vadd.f32 %v813_v10, %v811_v53  ;;  %v1362_v51 = vadd.f32 %v1332_v15, %v1330_v5  ;;  %2603 = vmatprep.mubr.f32.mxu0 %v9294_v33  ;;  %v5138_v30 = vld [vmem:[%s5695_s6 + $0x38] sm:$0xff] }
 0x1e2   : > { %v806_v13 = vadd.f32 %v805_v63, %v804_v39  ;;  %v1325_v14 = vadd.f32 %v1324_v2, %v1323_v29  ;;  %v814_v18 = vsel %vm9310_vm5, %v600_v54, 0.0  ;;  %vm9311_vm2 = vcmp.eq.s32.totalorder %v6315_v17, %v5517_v21  ;;  %3116 = vmatprep.mubr.f32.mxu1 %v9294_v33 }
 0x1e3   : > { %v1333_v59 = vsel %vm9311_vm2, %v1119_v8, 0.0  ;;  %v786_v32 = vrot.slane %v785_v16, 1  ;;  %v1305_v50 = vrot.slane %v1304_v35, 1  ;;  %v864_v27 = vadd.f32 %v814_v18, %v812_v20  ;;  %v604_v41 = vpop.f32.mrb[36].mxu0  ;;  %v1123_v0 = vpop.f32.mrb[36].mxu1 }
 0x1e4   : > { %v1383_v28 = vadd.f32 %v1333_v59, %v1331_v38  ;;  %v807_v19 = vrot.slane %v806_v13, 1  ;;  %v1326_v53 = vrot.slane %v1325_v14, 1  ;;  %vm9312_vm10 = vcmp.eq.s32.totalorder %v6304_v60, %v5520_v22  ;;  %v606_v40 = vpop.f32.mrb[37].mxu0  ;;  %v1125_v42 = vpop.f32.mrb[37].mxu1  ;;  %4799 = vmatmul.mubr.msk.f32.gmra.mrb[142].mxu0 %vm333_vm9, %v5138_v30  ;;  %4839 = vmatmul.mubr.msk.f32.gmra.mrb[142].mxu1 %vm333_vm9, %v5138_v30 }
 0x1e5   : > { %v815_v5 = vsel %vm9312_vm10, %v604_v41, 0.0  ;;  %vm9313_vm5 = vcmp.eq.s32.totalorder %v6307_v36, %v5520_v22  ;;  %v787_v34 = vadd.f32 %v786_v32, %v785_v16  ;;  %v1306_v20 = vadd.f32 %v1305_v50, %v1304_v35  ;;  %2609 = vmatprep.mubr.f32.mxu0 %v9294_v33  ;;  %3122 = vmatprep.mubr.f32.mxu1 %v9294_v33 }
 0x1e6   : > { %v1334_v4 = vsel %vm9313_vm5, %v1123_v0, 0.0  ;;  %v844_v38 = vadd.f32 %v843_v6, %v815_v5  ;;  %v808_v29 = vadd.f32 %v807_v19, %v806_v13  ;;  %v1327_v52 = vadd.f32 %v1326_v53, %v1325_v14  ;;  %v5139_v6 = vld [vmem:[%s5695_s6 + $0x40] sm:$0xff]  ;;  %v5140_v53 = vld [vmem:[%s5695_s6 + $0x48] sm:$0xff] }
 0x1e7   : > { %v1363_v39 = vadd.f32 %v1362_v51, %v1334_v4  ;;  %vm9314_vm2 = vcmp.eq.s32.totalorder %v6311_v37, %v5520_v22  ;;  %vm9315_vm10 = vcmp.eq.s32.totalorder %v6315_v17, %v5520_v22  ;;  %v6925_v61 = vadd.f32 %v1306_v20, %v787_v34  ;;  %v610_v10 = vpop.f32.mrb[38].mxu0  ;;  %v1129_v15 = vpop.f32.mrb[38].mxu1 }
 0x1e8   : > { %v816_v62 = vsel %vm9314_vm2, %v606_v40, 0.0  ;;  %v1335_v3 = vsel %vm9315_vm10, %v1125_v42, 0.0  ;;  %v6927_v54 = vadd.f32 %v1327_v52, %v808_v29  ;;  %vm9316_vm5 = vcmp.eq.s32.totalorder %v6304_v60, %v5532_v26  ;;  %v612_v16 = vpop.f32.mrb[39].mxu0  ;;  %v1131_v35 = vpop.f32.mrb[39].mxu1  ;;  %4800 = vmatmul.mubr.msk.f32.gmra.mrb[144].mxu0 %vm333_vm9, %v5139_v6  ;;  %4840 = vmatmul.mubr.msk.f32.gmra.mrb[144].mxu1 %vm333_vm9, %v5139_v6 }
 0x1e9   : > { %v865_v63 = vadd.f32 %v864_v27, %v816_v62  ;;  %v1384_v2 = vadd.f32 %v1383_v28, %v1335_v3  ;;  %v817_v8 = vsel %vm9316_vm5, %v610_v10, 0.0  ;;  %vm9317_vm2 = vcmp.eq.s32.totalorder %v6307_v36, %v5532_v26  ;;  %2615 = vmatprep.mubr.f32.mxu0 %v9294_v33  ;;  %3128 = vmatprep.mubr.f32.mxu1 %v9294_v33  ;;  %v5141_v3 = vld [vmem:[%s5695_s6 + $0x50] sm:$0xff] }
 0x1ea   : > { %v1336_v9 = vsel %vm9317_vm2, %v1129_v15, 0.0  ;;  %v845_v51 = vadd.f32 %v844_v38, %v817_v8  ;;  %vm9318_vm10 = vcmp.eq.s32.totalorder %v6311_v37, %v5532_v26  ;;  %vm9319_vm5 = vcmp.eq.s32.totalorder %v6315_v17, %v5532_v26 }
 0x1eb   : > { %v1364_v13 = vadd.f32 %v1363_v39, %v1336_v9  ;;  %v818_v14 = vsel %vm9318_vm10, %v612_v16, 0.0  ;;  %v1337_v18 = vsel %vm9319_vm5, %v1131_v35, 0.0  ;;  %v616_v50 = vpop.f32.mrb[40].mxu0  ;;  %v1135_v27 = vpop.f32.mrb[40].mxu1  ;;  %vm9320_vm2 = vcmp.eq.s32.totalorder %v6304_v60, %v6406_v43 }
 0x1ec   : > { %v866_v59 = vadd.f32 %v865_v63, %v818_v14  ;;  %v1385_v32 = vadd.f32 %v1384_v2, %v1337_v18  ;;  %v819_v28 = vsel %vm9320_vm2, %v616_v50, 0.0  ;;  %v1338_v41 = vsel %vm9321_vm8, %v1135_v27, 0.0  ;;  %v618_v0 = vpop.f32.mrb[41].mxu0  ;;  %v1137_v19 = vpop.f32.mrb[41].mxu1  ;;  %4801 = vmatmul.mubr.msk.f32.gmra.mrb[146].mxu0 %vm333_vm9, %v5140_v53  ;;  %4841 = vmatmul.mubr.msk.f32.gmra.mrb[146].mxu1 %vm333_vm9, %v5140_v53  ;;  %v5142_v18 = vld [vmem:[%s5695_s6 + $0x58] sm:$0xff] }
 0x1ed   : > { %v846_v5 = vadd.f32 %v845_v51, %v819_v28  ;;  %v1365_v4 = vadd.f32 %v1364_v13, %v1338_v41  ;;  %vm9322_vm10 = vcmp.eq.s32.totalorder %v6311_v37, %v6406_v43  ;;  %vm9323_vm5 = vcmp.eq.s32.totalorder %v6315_v17, %v6406_v43  ;;  %2621 = vmatprep.mubr.f32.mxu0 %v9294_v33 }
 0x1ee   : > { %v820_v40 = vsel %vm9322_vm10, %v618_v0, 0.0  ;;  %v1339_v42 = vsel %vm9323_vm5, %v1137_v19, 0.0  ;;  %3134 = vmatprep.mubr.f32.mxu1 %v9294_v33  ;;  %vm9324_vm8 = vcmp.eq.s32.totalorder %v6304_v60, %v6435_v24  ;;  %vm9325_vm2 = vcmp.eq.s32.totalorder %v6307_v36, %v6435_v24 }
 0x1ef   : > { %v867_v30 = vadd.f32 %v866_v59, %v820_v40  ;;  %v1386_v34 = vadd.f32 %v1385_v32, %v1339_v42  ;;  %v622_v20 = vpop.f32.mrb[42].mxu0  ;;  %v1141_v38 = vpop.f32.mrb[42].mxu1  ;;  %vm9326_vm10 = vcmp.eq.s32.totalorder %v6311_v37, %v6435_v24  ;;  %vm9327_vm5 = vcmp.eq.s32.totalorder %v6315_v17, %v6435_v24  ;;  %v5143_v42 = vld [vmem:[%s5695_s6 + $0x60] sm:$0xff] }
 0x1f0   : > { %v821_v39 = vsel %vm9324_vm8, %v622_v20, 0.0  ;;  %v1340_v29 = vsel %vm9325_vm2, %v1141_v38, 0.0  ;;  %v624_v52 = vpop.f32.mrb[43].mxu0  ;;  %v1143_v62 = vpop.f32.mrb[43].mxu1  ;;  %4802 = vmatmul.mubr.msk.f32.gmra.mrb[148].mxu0 %vm333_vm9, %v5141_v3  ;;  %4842 = vmatmul.mubr.msk.f32.gmra.mrb[148].mxu1 %vm333_vm9, %v5141_v3  ;;  %vm9328_vm8 = vcmp.eq.s32.totalorder %v6304_v60, %v6460_v1  ;;  %vm9329_vm2 = vcmp.eq.s32.totalorder %v6307_v36, %v6460_v1 }
 0x1f1   : > { %v847_v63 = vadd.f32 %v846_v5, %v821_v39  ;;  %v1366_v2 = vadd.f32 %v1365_v4, %v1340_v29  ;;  %v822_v10 = vsel %vm9326_vm10, %v624_v52, 0.0  ;;  %v1341_v15 = vsel %vm9327_vm5, %v1143_v62, 0.0  ;;  %2627 = vmatprep.mubr.f32.mxu0 %v9294_v33  ;;  %3140 = vmatprep.mubr.f32.mxu1 %v9294_v33 }
 0x1f2   : > { %v868_v8 = vadd.f32 %v867_v30, %v822_v10  ;;  %v1387_v9 = vadd.f32 %v1386_v34, %v1341_v15  ;;  %vm9330_vm10 = vcmp.eq.s32.totalorder %v6311_v37, %v6460_v1  ;;  %vm9331_vm5 = vcmp.eq.s32.totalorder %v6315_v17, %v6460_v1  ;;  %v5144_v15 = vld [vmem:[%s5695_s6 + $0x68] sm:$0xff] }
 0x1f3   : > { %v628_v16 = vpop.f32.mrb[44].mxu0  ;;  %v1147_v35 = vpop.f32.mrb[44].mxu1 }
 0x1f4   : > { %v823_v6 = vsel %vm9328_vm8, %v628_v16, 0.0  ;;  %v1342_v51 = vsel %vm9329_vm2, %v1147_v35, 0.0  ;;  %v630_v13 = vpop.f32.mrb[45].mxu0  ;;  %v1149_v14 = vpop.f32.mrb[45].mxu1  ;;  %4803 = vmatmul.mubr.msk.f32.gmra.mrb[150].mxu0 %vm333_vm9, %v5142_v18  ;;  %4843 = vmatmul.mubr.msk.f32.gmra.mrb[150].mxu1 %vm333_vm9, %v5142_v18  ;;  %vm9332_vm8 = vcmp.eq.s32.totalorder %v6304_v60, %v6463_v45  ;;  %vm9333_vm2 = vcmp.eq.s32.totalorder %v6307_v36, %v6463_v45 }
 0x1f5   : > { %v848_v59 = vadd.f32 %v847_v63, %v823_v6  ;;  %v1367_v32 = vadd.f32 %v1366_v2, %v1342_v51  ;;  %v824_v50 = vsel %vm9330_vm10, %v630_v13, 0.0  ;;  %v1343_v27 = vsel %vm9331_vm5, %v1149_v14, 0.0  ;;  %2633 = vmatprep.mubr.f32.mxu0 %v9294_v33  ;;  %3146 = vmatprep.mubr.f32.mxu1 %v9294_v33 }
 0x1f6   : > { %v869_v28 = vadd.f32 %v868_v8, %v824_v50  ;;  %v1388_v41 = vadd.f32 %v1387_v9, %v1343_v27  ;;  %vm9334_vm10 = vcmp.eq.s32.totalorder %v6311_v37, %v6463_v45  ;;  %vm9335_vm5 = vcmp.eq.s32.totalorder %v6315_v17, %v6463_v45  ;;  %v5145_v27 = vld [vmem:[%s5695_s6 + $0x70] sm:$0xff] }
 0x1f7   : > { %v634_v0 = vpop.f32.mrb[46].mxu0  ;;  %v1153_v19 = vpop.f32.mrb[46].mxu1 }
 0x1f8   : > { %v825_v53 = vsel %vm9332_vm8, %v634_v0, 0.0  ;;  %v1344_v5 = vsel %vm9333_vm2, %v1153_v19, 0.0  ;;  %v636_v4 = vpop.f32.mrb[47].mxu0  ;;  %v1155_v40 = vpop.f32.mrb[47].mxu1  ;;  %4804 = vmatmul.mubr.msk.f32.gmra.mrb[152].mxu0 %vm333_vm9, %v5143_v42  ;;  %4844 = vmatmul.mubr.msk.f32.gmra.mrb[152].mxu1 %vm333_vm9, %v5143_v42  ;;  %vm9336_vm8 = vcmp.eq.s32.totalorder %v6304_v60, %v6470_v31  ;;  %vm9337_vm2 = vcmp.eq.s32.totalorder %v6307_v36, %v6470_v31 }
 0x1f9   : > { %v849_v30 = vadd.f32 %v848_v59, %v825_v53  ;;  %v1368_v34 = vadd.f32 %v1367_v32, %v1344_v5  ;;  %v826_v20 = vsel %vm9334_vm10, %v636_v4, 0.0  ;;  %v1345_v38 = vsel %vm9335_vm5, %v1155_v40, 0.0  ;;  %2639 = vmatprep.mubr.f32.mxu0 %v9294_v33  ;;  %3152 = vmatprep.mubr.f32.mxu1 %v9294_v33 }
 0x1fa   : > { %v870_v39 = vadd.f32 %v869_v28, %v826_v20  ;;  %v1389_v29 = vadd.f32 %v1388_v41, %v1345_v38  ;;  %vm9338_vm10 = vcmp.eq.s32.totalorder %v6311_v37, %v6470_v31  ;;  %vm9339_vm5 = vcmp.eq.s32.totalorder %v6315_v17, %v6470_v31  ;;  %v5146_v38 = vld [vmem:[%s5695_s6 + $0x78] sm:$0xff] }
 0x1fb   : > { %v640_v52 = vpop.f32.mrb[48].mxu0  ;;  %v1159_v62 = vpop.f32.mrb[48].mxu1 }
 0x1fc   : > { %v827_v3 = vsel %vm9336_vm8, %v640_v52, 0.0  ;;  %v1346_v63 = vsel %vm9337_vm2, %v1159_v62, 0.0  ;;  %v642_v2 = vpop.f32.mrb[49].mxu0  ;;  %v1161_v10 = vpop.f32.mrb[49].mxu1  ;;  %4805 = vmatmul.mubr.msk.f32.gmra.mrb[154].mxu0 %vm333_vm9, %v5144_v15  ;;  %4845 = vmatmul.mubr.msk.f32.gmra.mrb[154].mxu1 %vm333_vm9, %v5144_v15  ;;  %vm9340_vm8 = vcmp.eq.s32.totalorder %v6304_v60, %v6473_v12  ;;  %vm9341_vm2 = vcmp.eq.s32.totalorder %v6307_v36, %v6473_v12 }
 0x1fd   : > { %v850_v8 = vadd.f32 %v849_v30, %v827_v3  ;;  %v1369_v9 = vadd.f32 %v1368_v34, %v1346_v63  ;;  %v828_v16 = vsel %vm9338_vm10, %v642_v2, 0.0  ;;  %v1347_v35 = vsel %vm9339_vm5, %v1161_v10, 0.0  ;;  %2645 = vmatprep.mubr.f32.mxu0 %v9294_v33  ;;  %3158 = vmatprep.mubr.f32.mxu1 %v9294_v33 }
 0x1fe   : > { %v871_v6 = vadd.f32 %v870_v39, %v828_v16  ;;  %v1390_v51 = vadd.f32 %v1389_v29, %v1347_v35  ;;  %vm9342_vm10 = vcmp.eq.s32.totalorder %v6311_v37, %v6473_v12  ;;  %vm9343_vm5 = vcmp.eq.s32.totalorder %v6315_v17, %v6473_v12  ;;  %v5147_v35 = vld [vmem:[%s5695_s6 + $0x80] sm:$0xff] }
 0x1ff   : > { %v646_v13 = vpop.f32.mrb[50].mxu0  ;;  %v1165_v14 = vpop.f32.mrb[50].mxu1 }
 0x200   : > { %v829_v18 = vsel %vm9340_vm8, %v646_v13, 0.0  ;;  %v1348_v59 = vsel %vm9341_vm2, %v1165_v14, 0.0  ;;  %v648_v32 = vpop.f32.mrb[51].mxu0  ;;  %v1167_v50 = vpop.f32.mrb[51].mxu1  ;;  %4806 = vmatmul.mubr.msk.f32.gmra.mrb[156].mxu0 %vm333_vm9, %v5145_v27  ;;  %4846 = vmatmul.mubr.msk.f32.gmra.mrb[156].mxu1 %vm333_vm9, %v5145_v27  ;;  %vm9344_vm8 = vcmp.eq.s32.totalorder %v6304_v60, %v6498_v48  ;;  %vm9345_vm2 = vcmp.eq.s32.totalorder %v6307_v36, %v6498_v48 }
 0x201   : > { %v851_v28 = vadd.f32 %v850_v8, %v829_v18  ;;  %v1370_v41 = vadd.f32 %v1369_v9, %v1348_v59  ;;  %v830_v0 = vsel %vm9342_vm10, %v648_v32, 0.0  ;;  %v1349_v19 = vsel %vm9343_vm5, %v1167_v50, 0.0  ;;  %2651 = vmatprep.mubr.f32.mxu0 %v9294_v33  ;;  %3164 = vmatprep.mubr.f32.mxu1 %v9294_v33 }
 0x202   : > { %v872_v53 = vadd.f32 %v871_v6, %v830_v0  ;;  %v1391_v5 = vadd.f32 %v1390_v51, %v1349_v19  ;;  %vm9346_vm10 = vcmp.eq.s32.totalorder %v6311_v37, %v6498_v48  ;;  %vm9347_vm5 = vcmp.eq.s32.totalorder %v6315_v17, %v6498_v48  ;;  %v5148_v19 = vld [vmem:[%s5695_s6 + $0x88] sm:$0xff] }
 0x203   : > { %v652_v4 = vpop.f32.mrb[52].mxu0  ;;  %v1171_v40 = vpop.f32.mrb[52].mxu1 }
 0x204   : > { %v831_v42 = vsel %vm9344_vm8, %v652_v4, 0.0  ;;  %v1350_v30 = vsel %vm9345_vm2, %v1171_v40, 0.0  ;;  %v654_v34 = vpop.f32.mrb[53].mxu0  ;;  %v1173_v20 = vpop.f32.mrb[53].mxu1  ;;  %4807 = vmatmul.mubr.msk.f32.gmra.mrb[158].mxu0 %vm333_vm9, %v5146_v38  ;;  %4847 = vmatmul.mubr.msk.f32.gmra.mrb[158].mxu1 %vm333_vm9, %v5146_v38  ;;  %vm9348_vm8 = vcmp.eq.s32.totalorder %v6307_v36, %v6501_v44  ;;  %v9350_v38 = vand.u32 127, %v5436_v47 }
 0x205   : > { %v852_v39 = vadd.f32 %v851_v28, %v831_v42  ;;  %v1371_v29 = vadd.f32 %v1370_v41, %v1350_v30  ;;  %v832_v52 = vsel %vm9346_vm10, %v654_v34, 0.0  ;;  %v1351_v62 = vsel %vm9347_vm5, %v1173_v20, 0.0  ;;  %2657 = vmatprep.mubr.f32.mxu0 %v9294_v33  ;;  %3170 = vmatprep.mubr.f32.mxu1 %v9294_v33 }
 0x206   : > { %v873_v3 = vadd.f32 %v872_v53, %v832_v52  ;;  %v1392_v63 = vadd.f32 %v1391_v5, %v1351_v62  ;;  %v9349_v34 = vand.u32 127, %v5434_v46  ;;  %vm9359_vm5 = vcmp.eq.s32.totalorder %v6315_v17, %v6826_v25 }
 0x207   : > { %v658_v2 = vpop.f32.mrb[54].mxu0  ;;  %v1177_v10 = vpop.f32.mrb[54].mxu1 }
 0x208   : > { %v833_v15 = vsel %vm725_vm4, %v658_v2, 0.0  ;;  %v1352_v8 = vsel %vm9348_vm8, %v1177_v10, 0.0  ;;  %v660_v9 = vpop.f32.mrb[55].mxu0  ;;  %v1179_v16 = vpop.f32.mrb[55].mxu1  ;;  %4808 = vmatmul.mubr.msk.f32.gmra.mrb[160].mxu0 %vm333_vm9, %v5147_v35  ;;  %4848 = vmatmul.mubr.msk.f32.gmra.mrb[160].mxu1 %vm333_vm9, %v5147_v35  ;;  %v1729_v20 = vrot.slane %v9349_v34, %v5493_v7  ;;  %v5149_v10 = vld [vmem:[%s5695_s6 + $0x90] sm:$0xff]  ;;  %vm9354_vm4 = vcmp.eq.s32.totalorder %v6307_v36, %v6798_v49 }
 0x209   : > { %v853_v6 = vadd.f32 %v852_v39, %v833_v15  ;;  %v1372_v51 = vadd.f32 %v1371_v29, %v1352_v8  ;;  %v834_v13 = vsel %vm726_vm12, %v660_v9, 0.0  ;;  %v1353_v14 = vsel %vm1245_vm1, %v1179_v16, 0.0  ;;  %2663 = vmatprep.mubr.f32.mxu0 %v9294_v33  ;;  %3176 = vmatprep.mubr.f32.mxu1 %v9294_v33 }
 0x20a   : > { %v874_v18 = vadd.f32 %v873_v3, %v834_v13  ;;  %v1393_v59 = vadd.f32 %v1392_v63, %v1353_v14  ;;  %v2242_v39 = vrot.slane %v9350_v38, %v5493_v7  ;;  %vm9351_vm1 = vcmp.eq.s32.totalorder %v6315_v17, %v6762_v58  ;;  %v9352_v13 = vld [vmem:[#allocation11_spill] sm:$0xff] }
 0x20b   : > { %v664_v32 = vpop.f32.mrb[56].mxu0  ;;  %v1183_v50 = vpop.f32.mrb[56].mxu1  ;;  %v7123_v35 = vrot.slane %v1729_v20, %v5493_v7  ;;  %v7134_v14 = vrot.slane %v9352_v13, %v5493_v7  ;;  %vm9353_vm12 = vcmp.eq.s32.totalorder %v6304_v60, %v6798_v49 }
 0x20c   : > { %v835_v27 = vsel %vm727_vm0, %v664_v32, 0.0  ;;  %v1354_v28 = vsel %vm1246_vm14, %v1183_v50, 0.0  ;;  %v666_v41 = vpop.f32.mrb[57].mxu0  ;;  %v1185_v0 = vpop.f32.mrb[57].mxu1  ;;  %4809 = vmatmul.mubr.msk.f32.gmra.mrb[162].mxu0 %vm333_vm9, %v5148_v19  ;;  %4849 = vmatmul.mubr.msk.f32.gmra.mrb[162].mxu1 %vm333_vm9, %v5148_v19  ;;  %vm9355_vm0 = vcmp.eq.s32.totalorder %v6311_v37, %v6798_v49  ;;  %vm9356_vm14 = vcmp.eq.s32.totalorder %v6315_v17, %v6798_v49 }
 0x20d   : > { %v854_v53 = vadd.f32 %v853_v6, %v835_v27  ;;  %v1373_v5 = vadd.f32 %v1372_v51, %v1354_v28  ;;  %v836_v4 = vsel %vm728_vm7, %v666_v41, 0.0  ;;  %v1355_v40 = vsel %vm1247_vm15, %v1185_v0, 0.0  ;;  %2669 = vmatprep.mubr.f32.mxu0 %v9294_v33  ;;  %3182 = vmatprep.mubr.f32.mxu1 %v9294_v33  ;;  %v5150_v28 = vld [vmem:[%s5695_s6 + $0x98] sm:$0xff] }
 0x20e   : > { %v875_v42 = vadd.f32 %v874_v18, %v836_v4  ;;  %v1394_v30 = vadd.f32 %v1393_v59, %v1355_v40  ;;  %v7127_v6 = vrot.slane %v5464_v57, %v5493_v7  ;;  %v7130_v51 = vrot.slane %v2242_v39, %v5493_v7  ;;  %v5151_v39 = vld [vmem:[%s5695_s6 + $0xa0] sm:$0xff] }
 0x20f   : > { %v670_v29 = vpop.f32.mrb[58].mxu0  ;;  %v1189_v52 = vpop.f32.mrb[58].mxu1  ;;  %vm1742_vm7 = vcmp.eq.s32.totalorder %v7123_v35, %v5419_v23  ;;  %vm1744_vm2 = vcmp.eq.s32.totalorder %v7123_v35, %v5517_v21 }
 0x210   : > { %v837_v62 = vsel %vm729_vm13, %v670_v29, 0.0  ;;  %v1356_v3 = vsel %vm1248_vm3, %v1189_v52, 0.0  ;;  %v672_v63 = vpop.f32.mrb[59].mxu0  ;;  %v1191_v2 = vpop.f32.mrb[59].mxu1  ;;  %4810 = vmatmul.mubr.msk.f32.gmra.mrb[164].mxu0 %vm333_vm9, %v5149_v10  ;;  %4850 = vmatmul.mubr.msk.f32.gmra.mrb[164].mxu1 %vm333_vm9, %v5149_v10  ;;  %vm2255_vm15 = vcmp.eq.s32.totalorder %v7130_v51, %v5419_v23  ;;  %vm1743_vm13 = vcmp.eq.s32.totalorder %v7127_v6, %v5419_v23 }
 0x211   : > { %v855_v46 = vadd.f32 %v854_v53, %v837_v62  ;;  %v1374_v47 = vadd.f32 %v1373_v5, %v1356_v3  ;;  %v838_v15 = vsel %vm730_vm11, %v672_v63, 0.0  ;;  %v1357_v8 = vsel %vm9351_vm1, %v1191_v2, 0.0  ;;  %2675 = vmatprep.mubr.f32.mxu0 %v9294_v33  ;;  %3188 = vmatprep.mubr.f32.mxu1 %v9294_v33 }
 0x212   : > { %v876_v9 = vadd.f32 %v875_v42, %v838_v15  ;;  %v1395_v16 = vadd.f32 %v1394_v30, %v1357_v8  ;;  %vm2256_vm3 = vcmp.eq.s32.totalorder %v7134_v14, %v5419_v23  ;;  %vm9357_vm11 = vcmp.eq.s32.totalorder %v6307_v36, %v6826_v25 }
 0x213   : > { %v676_v18 = vpop.f32.mrb[60].mxu0  ;;  %v1195_v59 = vpop.f32.mrb[60].mxu1  ;;  %vm2257_vm10 = vcmp.eq.s32.totalorder %v7130_v51, %v5517_v21  ;;  %vm1745_vm8 = vcmp.eq.s32.totalorder %v7127_v6, %v5517_v21  ;;  %vm2258_vm1 = vcmp.eq.s32.totalorder %v7134_v14, %v5517_v21 }
 0x214   : > { %v839_v32 = vsel %vm9353_vm12, %v676_v18, 0.0  ;;  %v1358_v50 = vsel %vm9354_vm4, %v1195_v59, 0.0  ;;  %v678_v27 = vpop.f32.mrb[61].mxu0  ;;  %v1197_v57 = vpop.f32.mrb[61].mxu1  ;;  %4811 = vmatmul.mubr.msk.f32.gmra.mrb[166].mxu0 %vm333_vm9, %v5150_v28  ;;  %4851 = vmatmul.mubr.msk.f32.gmra.mrb[166].mxu1 %vm333_vm9, %v5150_v28  ;;  %vm1746_vm12 = vcmp.eq.s32.totalorder %v7123_v35, %v5520_v22  ;;  %vm2259_vm4 = vcmp.eq.s32.totalorder %v7130_v51, %v5520_v22 }
 0x215   : > { %v856_v41 = vadd.f32 %v855_v46, %v839_v32  ;;  %v1375_v0 = vadd.f32 %v1374_v47, %v1358_v50  ;;  %v840_v19 = vsel %vm9355_vm0, %v678_v27, 0.0  ;;  %v1359_v53 = vsel %vm9356_vm14, %v1197_v57, 0.0  ;;  %2681 = vmatprep.mubr.f32.mxu0 %v9294_v33  ;;  %3194 = vmatprep.mubr.f32.mxu1 %v9294_v33 }
 0x216   : > { %v877_v5 = vadd.f32 %v876_v9, %v840_v19  ;;  %v1396_v4 = vadd.f32 %v1395_v16, %v1359_v53  ;;  %v5152_v16 = vld [vmem:[%s5695_s6 + $0xa8] sm:$0xff]  ;;  %vm1747_vm0 = vcmp.eq.s32.totalorder %v7127_v6, %v5520_v22  ;;  %vm9127_vm14 = vcmp.eq.s32.totalorder %v7134_v14, %v5520_v22 }
 0x217   : > { %v682_v40 = vpop.f32.mrb[62].mxu0  ;;  %v1201_v42 = vpop.f32.mrb[62].mxu1 }
 0x218   : > { %v841_v30 = vsel %vm733_vm6, %v682_v40, 0.0  ;;  %v1360_v34 = vsel %vm9357_vm11, %v1201_v42, 0.0  ;;  %v684_v20 = vpop.f32.mrb[63].mxu0  ;;  %v1203_v38 = vpop.f32.mrb[63].mxu1  ;;  %4812 = vmatmul.mubr.msk.f32.gmra.mrb[168].mxu0 %vm333_vm9, %v5151_v39  ;;  %4852 = vmatmul.mubr.msk.f32.gmra.mrb[168].mxu1 %vm333_vm9, %v5151_v39  ;;  %vm9358_vm6 = vcmp.eq.s32.totalorder %v6311_v37, %v6826_v25  ;;  %vm9129_vm11 = vcmp.eq.s32.totalorder %v7123_v35, %v5532_v26 }
 0x219   : > { %v857_v29 = vadd.f32 %v856_v41, %v841_v30  ;;  %v1376_v60 = vadd.f32 %v1375_v0, %v1360_v34  ;;  %v842_v36 = vsel %vm9358_vm6, %v684_v20, 0.0  ;;  %v1361_v52 = vsel %vm9359_vm5, %v1203_v38, 0.0  ;;  %2687 = vmatprep.mubr.f32.mxu0 %v9294_v33  ;;  %3200 = vmatprep.mubr.f32.mxu1 %v9294_v33  ;;  %v5153_v30 = vld [vmem:[%s5695_s6 + $0xb0] sm:$0xff] }
 0x21a   : > { %v878_v62 = vadd.f32 %v877_v5, %v842_v36  ;;  %v1397_v3 = vadd.f32 %v1396_v4, %v1361_v52  ;;  %vm9128_vm6 = vcmp.eq.s32.totalorder %v7130_v51, %v5532_v26  ;;  %vm9131_vm5 = vcmp.eq.s32.totalorder %v7127_v6, %v5532_v26 }
 0x21b   : > { %v858_v63 = vrot.slane %v857_v29, 4  ;;  %v1377_v37 = vrot.slane %v1376_v60, 4  ;;  %v1535_v2 = vpop.f32.mrb[64].mxu0  ;;  %v2048_v10 = vpop.f32.mrb[64].mxu1 }
 0x21c   : > { %v879_v17 = vrot.slane %v878_v62, 4  ;;  %v1398_v46 = vrot.slane %v1397_v3, 4  ;;  %v1774_v47 = vsel %vm1742_vm7, %v1535_v2, 0.0  ;;  %v2287_v15 = vsel %vm2255_vm15, %v2048_v10, 0.0  ;;  %v1537_v8 = vpop.f32.mrb[65].mxu0  ;;  %v2050_v9 = vpop.f32.mrb[65].mxu1  ;;  %4813 = vmatmul.mubr.msk.f32.gmra.mrb[170].mxu0 %vm333_vm9, %v5152_v16  ;;  %4853 = vmatmul.mubr.msk.f32.gmra.mrb[170].mxu1 %vm333_vm9, %v5152_v16 }
 0x21d   : > { %v859_v13 = vadd.f32 %v858_v63, %v857_v29  ;;  %v1378_v18 = vadd.f32 %v1377_v37, %v1376_v60  ;;  %v1775_v59 = vsel %vm1743_vm13, %v1537_v8, 0.0  ;;  %v2288_v32 = vsel %vm2256_vm3, %v2050_v9, 0.0  ;;  %2693 = vmatprep.mubr.f32.mxu0 %v9294_v33  ;;  %3206 = vmatprep.mubr.f32.mxu1 %v9294_v33  ;;  %v5154_v16 = vld [vmem:[%s5695_s6 + $0xb8] sm:$0xff] }
 0x21e   : > { %v880_v50 = vadd.f32 %v879_v17, %v878_v62  ;;  %v1399_v27 = vadd.f32 %v1398_v46, %v1397_v3 }
 0x21f   : > { %v860_v57 = vrot.slane %v859_v13, 2  ;;  %v1379_v28 = vrot.slane %v1378_v18, 2  ;;  %v1541_v41 = vpop.f32.mrb[66].mxu0  ;;  %v2054_v0 = vpop.f32.mrb[66].mxu1 }
 0x220   : > { %v881_v19 = vrot.slane %v880_v50, 2  ;;  %v1400_v53 = vrot.slane %v1399_v27, 2  ;;  %v1776_v5 = vsel %vm1744_vm2, %v1541_v41, 0.0  ;;  %v2289_v4 = vsel %vm2257_vm10, %v2054_v0, 0.0  ;;  %v1543_v40 = vpop.f32.mrb[67].mxu0  ;;  %v2056_v42 = vpop.f32.mrb[67].mxu1  ;;  %4814 = vmatmul.mubr.msk.f32.gmra.mrb[172].mxu0 %vm333_vm9, %v5153_v30  ;;  %4854 = vmatmul.mubr.msk.f32.gmra.mrb[172].mxu1 %vm333_vm9, %v5153_v30 }
 0x221   : > { %v861_v34 = vadd.f32 %v860_v57, %v859_v13  ;;  %v1380_v20 = vadd.f32 %v1379_v28, %v1378_v18  ;;  %v1806_v38 = vadd.f32 %v1776_v5, %v1774_v47  ;;  %v2319_v39 = vadd.f32 %v2289_v4, %v2287_v15  ;;  %2699 = vmatprep.mubr.f32.mxu0 %v9294_v33 }
 0x222   : > { %v882_v29 = vadd.f32 %v881_v19, %v880_v50  ;;  %v1401_v60 = vadd.f32 %v1400_v53, %v1399_v27  ;;  %v1777_v36 = vsel %vm1745_vm8, %v1543_v40, 0.0  ;;  %v2290_v52 = vsel %vm2258_vm1, %v2056_v42, 0.0  ;;  %3212 = vmatprep.mubr.f32.mxu1 %v9294_v33 }
 0x223   : > { %v862_v62 = vrot.slane %v861_v34, 1  ;;  %v1381_v3 = vrot.slane %v1380_v20, 1  ;;  %v1827_v63 = vadd.f32 %v1777_v36, %v1775_v59  ;;  %v2340_v37 = vadd.f32 %v2290_v52, %v2288_v32  ;;  %v1547_v2 = vpop.f32.mrb[68].mxu0  ;;  %v2060_v10 = vpop.f32.mrb[68].mxu1 }
 0x224   : > { %v883_v17 = vrot.slane %v882_v29, 1  ;;  %v1402_v46 = vrot.slane %v1401_v60, 1  ;;  %v1778_v47 = vsel %vm1746_vm12, %v1547_v2, 0.0  ;;  %v2291_v15 = vsel %vm2259_vm4, %v2060_v10, 0.0  ;;  %v1549_v8 = vpop.f32.mrb[69].mxu0  ;;  %v2062_v9 = vpop.f32.mrb[69].mxu1  ;;  %4815 = vmatmul.mubr.msk.f32.gmra.mrb[174].mxu0 %vm333_vm9, %v5154_v16  ;;  %4855 = vmatmul.mubr.msk.f32.gmra.mrb[174].mxu1 %vm333_vm9, %v5154_v16 }
 0x225   : > { %v863_v13 = vadd.f32 %v862_v62, %v861_v34  ;;  %v1382_v18 = vadd.f32 %v1381_v3, %v1380_v20  ;;  %v1807_v59 = vadd.f32 %v1806_v38, %v1778_v47  ;;  %v2320_v32 = vadd.f32 %v2319_v39, %v2291_v15  ;;  %2705 = vmatprep.mubr.f32.mxu0 %v9294_v33  ;;  %v5155_v20 = vld [vmem:[%s5695_s6 + $0xc0] sm:$0xff] }
 0x226   : > { %v884_v50 = vadd.f32 %v883_v17, %v882_v29  ;;  %v1403_v27 = vadd.f32 %v1402_v46, %v1401_v60  ;;  %v1779_v57 = vsel %vm1747_vm0, %v1549_v8, 0.0  ;;  %v2292_v28 = vsel %vm9127_vm14, %v2062_v9, 0.0  ;;  %3218 = vmatprep.mubr.f32.mxu1 %v9294_v33  ;;  %v5156_v17 = vld [vmem:[%s5695_s6 + $0xc8] sm:$0xff] }
 0x227   : > { %v7249_v41 = vadd.f32 %v1382_v18, %v863_v13  ;;  %v1828_v0 = vadd.f32 %v1827_v63, %v1779_v57  ;;  %v2341_v19 = vadd.f32 %v2340_v37, %v2292_v28  ;;  %v1553_v53 = vpop.f32.mrb[70].mxu0  ;;  %v2066_v5 = vpop.f32.mrb[70].mxu1  ;;  %vm9130_vm14 = vcmp.eq.s32.totalorder %v7134_v14, %v5532_v26  ;;  %v5157_v57 = vld [vmem:[%s5695_s6 + $0xd0] sm:$0xff] }
 0x228   : > { %v7253_v4 = vadd.f32 %v1403_v27, %v884_v50  ;;  %v1780_v40 = vsel %vm9129_vm11, %v1553_v53, 0.0  ;;  %v2293_v42 = vsel %vm9128_vm6, %v2066_v5, 0.0  ;;  %v1555_v30 = vpop.f32.mrb[71].mxu0  ;;  %v2068_v34 = vpop.f32.mrb[71].mxu1  ;;  %4816 = vmatmul.mubr.msk.f32.gmra.mrb[176].mxu0 %vm333_vm9, %v5155_v20  ;;  %4856 = vmatmul.mubr.msk.f32.gmra.mrb[176].mxu1 %vm333_vm9, %v5155_v20  ;;  %vm9133_vm6 = vcmp.eq.s32.totalorder %v7123_v35, %v6406_v43 }
 0x229   : > { %v1808_v38 = vadd.f32 %v1807_v59, %v1780_v40  ;;  %v2321_v39 = vadd.f32 %v2320_v32, %v2293_v42  ;;  %v1781_v29 = vsel %vm9131_vm5, %v1555_v30, 0.0  ;;  %v2294_v60 = vsel %vm9130_vm14, %v2068_v34, 0.0  ;;  %2711 = vmatprep.mubr.f32.mxu0 %v9294_v33  ;;  %3224 = vmatprep.mubr.f32.mxu1 %v9294_v33 }
 0x22a   : > { %v1829_v36 = vadd.f32 %v1828_v0, %v1781_v29  ;;  %v2342_v52 = vadd.f32 %v2341_v19, %v2294_v60  ;;  %vm9132_vm11 = vcmp.eq.s32.totalorder %v7130_v51, %v6406_v43  ;;  %vm9135_vm14 = vcmp.eq.s32.totalorder %v7127_v6, %v6406_v43  ;;  %v5158_v29 = vld [vmem:[%s5695_s6 + $0xd8] sm:$0xff] }
 0x22b   : > { %v1559_v62 = vpop.f32.mrb[72].mxu0  ;;  %v2072_v3 = vpop.f32.mrb[72].mxu1  ;;  %vm9134_vm5 = vcmp.eq.s32.totalorder %v7134_v14, %v6406_v43 }
 0x22c   : > { %v1782_v63 = vsel %vm9133_vm6, %v1559_v62, 0.0  ;;  %v2295_v37 = vsel %vm9132_vm11, %v2072_v3, 0.0  ;;  %v1561_v2 = vpop.f32.mrb[73].mxu0  ;;  %v2074_v10 = vpop.f32.mrb[73].mxu1  ;;  %4817 = vmatmul.mubr.msk.f32.gmra.mrb[178].mxu0 %vm333_vm9, %v5156_v17  ;;  %4857 = vmatmul.mubr.msk.f32.gmra.mrb[178].mxu1 %vm333_vm9, %v5156_v17  ;;  %vm9137_vm11 = vcmp.eq.s32.totalorder %v7123_v35, %v6435_v24  ;;  %vm9136_vm6 = vcmp.eq.s32.totalorder %v7130_v51, %v6435_v24 }
 0x22d   : > { %v1809_v46 = vadd.f32 %v1808_v38, %v1782_v63  ;;  %v2322_v47 = vadd.f32 %v2321_v39, %v2295_v37  ;;  %v1783_v15 = vsel %vm9135_vm14, %v1561_v2, 0.0  ;;  %v2296_v8 = vsel %vm9134_vm5, %v2074_v10, 0.0  ;;  %2717 = vmatprep.mubr.f32.mxu0 %v9294_v33  ;;  %3230 = vmatprep.mubr.f32.mxu1 %v9294_v33 }
 0x22e   : > { %v1830_v9 = vadd.f32 %v1829_v36, %v1783_v15  ;;  %v2343_v16 = vadd.f32 %v2342_v52, %v2296_v8  ;;  %vm9139_vm5 = vcmp.eq.s32.totalorder %v7127_v6, %v6435_v24  ;;  %vm9138_vm14 = vcmp.eq.s32.totalorder %v7134_v14, %v6435_v24  ;;  %v5159_v15 = vld [vmem:[%s5695_s6 + $0xe0] sm:$0xff] }
 0x22f   : > { %v1565_v13 = vpop.f32.mrb[74].mxu0  ;;  %v2078_v18 = vpop.f32.mrb[74].mxu1 }
 0x230   : > { %v1784_v59 = vsel %vm9137_vm11, %v1565_v13, 0.0  ;;  %v2297_v32 = vsel %vm9136_vm6, %v2078_v18, 0.0  ;;  %v1567_v50 = vpop.f32.mrb[75].mxu0  ;;  %v2080_v27 = vpop.f32.mrb[75].mxu1  ;;  %4818 = vmatmul.mubr.msk.f32.gmra.mrb[180].mxu0 %vm333_vm9, %v5157_v57  ;;  %4858 = vmatmul.mubr.msk.f32.gmra.mrb[180].mxu1 %vm333_vm9, %v5157_v57  ;;  %vm9141_vm6 = vcmp.eq.s32.totalorder %v7123_v35, %v6460_v1  ;;  %vm9140_vm11 = vcmp.eq.s32.totalorder %v7130_v51, %v6460_v1 }
 0x231   : > { %v1810_v28 = vadd.f32 %v1809_v46, %v1784_v59  ;;  %v2323_v0 = vadd.f32 %v2322_v47, %v2297_v32  ;;  %v1785_v19 = vsel %vm9139_vm5, %v1567_v50, 0.0  ;;  %v2298_v53 = vsel %vm9138_vm14, %v2080_v27, 0.0  ;;  %2723 = vmatprep.mubr.f32.mxu0 %v9294_v33  ;;  %3236 = vmatprep.mubr.f32.mxu1 %v9294_v33 }
 0x232   : > { %v1831_v5 = vadd.f32 %v1830_v9, %v1785_v19  ;;  %v2344_v40 = vadd.f32 %v2343_v16, %v2298_v53  ;;  %vm9143_vm14 = vcmp.eq.s32.totalorder %v7127_v6, %v6460_v1  ;;  %vm9142_vm5 = vcmp.eq.s32.totalorder %v7134_v14, %v6460_v1  ;;  %v5160_v19 = vld [vmem:[%s5695_s6 + $0xe8] sm:$0xff] }
 0x233   : > { %v1571_v42 = vpop.f32.mrb[76].mxu0  ;;  %v2084_v30 = vpop.f32.mrb[76].mxu1 }
 0x234   : > { %v1786_v34 = vsel %vm9141_vm6, %v1571_v42, 0.0  ;;  %v2299_v20 = vsel %vm9140_vm11, %v2084_v30, 0.0  ;;  %v1573_v38 = vpop.f32.mrb[77].mxu0  ;;  %v2086_v39 = vpop.f32.mrb[77].mxu1  ;;  %4819 = vmatmul.mubr.msk.f32.gmra.mrb[182].mxu0 %vm333_vm9, %v5158_v29  ;;  %4859 = vmatmul.mubr.msk.f32.gmra.mrb[182].mxu1 %vm333_vm9, %v5158_v29  ;;  %vm9145_vm11 = vcmp.eq.s32.totalorder %v7123_v35, %v6463_v45  ;;  %vm9144_vm6 = vcmp.eq.s32.totalorder %v7130_v51, %v6463_v45 }
 0x235   : > { %v1811_v60 = vadd.f32 %v1810_v28, %v1786_v34  ;;  %v2324_v36 = vadd.f32 %v2323_v0, %v2299_v20  ;;  %v1787_v52 = vsel %vm9143_vm14, %v1573_v38, 0.0  ;;  %v2300_v62 = vsel %vm9142_vm5, %v2086_v39, 0.0  ;;  %2729 = vmatprep.mubr.f32.mxu0 %v9294_v33  ;;  %3242 = vmatprep.mubr.f32.mxu1 %v9294_v33 }
 0x236   : > { %v1832_v3 = vadd.f32 %v1831_v5, %v1787_v52  ;;  %v2345_v63 = vadd.f32 %v2344_v40, %v2300_v62  ;;  %vm9147_vm5 = vcmp.eq.s32.totalorder %v7127_v6, %v6463_v45  ;;  %vm9146_vm14 = vcmp.eq.s32.totalorder %v7134_v14, %v6463_v45  ;;  %v5161_v52 = vld [vmem:[%s5695_s6 + $0xf0] sm:$0xff] }
 0x237   : > { %v1577_v37 = vpop.f32.mrb[78].mxu0  ;;  %v2090_v2 = vpop.f32.mrb[78].mxu1 }
 0x238   : > { %v1788_v10 = vsel %vm9145_vm11, %v1577_v37, 0.0  ;;  %v2301_v17 = vsel %vm9144_vm6, %v2090_v2, 0.0  ;;  %v1579_v46 = vpop.f32.mrb[79].mxu0  ;;  %v2092_v47 = vpop.f32.mrb[79].mxu1  ;;  %4820 = vmatmul.mubr.msk.f32.gmra.mrb[184].mxu0 %vm333_vm9, %v5159_v15  ;;  %4860 = vmatmul.mubr.msk.f32.gmra.mrb[184].mxu1 %vm333_vm9, %v5159_v15  ;;  %vm9149_vm6 = vcmp.eq.s32.totalorder %v7123_v35, %v6470_v31  ;;  %vm9148_vm11 = vcmp.eq.s32.totalorder %v7130_v51, %v6470_v31 }
 0x239   : > { %v1812_v8 = vadd.f32 %v1811_v60, %v1788_v10  ;;  %v2325_v9 = vadd.f32 %v2324_v36, %v2301_v17  ;;  %v1789_v16 = vsel %vm9147_vm5, %v1579_v46, 0.0  ;;  %v2302_v13 = vsel %vm9146_vm14, %v2092_v47, 0.0  ;;  %2735 = vmatprep.mubr.f32.mxu0 %v9294_v33  ;;  %3248 = vmatprep.mubr.f32.mxu1 %v9294_v33 }
 0x23a   : > { %v1833_v18 = vadd.f32 %v1832_v3, %v1789_v16  ;;  %v2346_v59 = vadd.f32 %v2345_v63, %v2302_v13  ;;  %vm9151_vm14 = vcmp.eq.s32.totalorder %v7127_v6, %v6470_v31  ;;  %vm9150_vm5 = vcmp.eq.s32.totalorder %v7134_v14, %v6470_v31  ;;  %v5162_v16 = vld [vmem:[%s5695_s6 + $0xf8] sm:$0xff] }
 0x23b   : > { %v1583_v32 = vpop.f32.mrb[80].mxu0  ;;  %v2096_v50 = vpop.f32.mrb[80].mxu1 }
 0x23c   : > { %v1790_v27 = vsel %vm9149_vm6, %v1583_v32, 0.0  ;;  %v2303_v57 = vsel %vm9148_vm11, %v2096_v50, 0.0  ;;  %v1585_v28 = vpop.f32.mrb[81].mxu0  ;;  %v2098_v0 = vpop.f32.mrb[81].mxu1  ;;  %4821 = vmatmul.mubr.msk.f32.gmra.mrb[186].mxu0 %vm333_vm9, %v5160_v19  ;;  %4861 = vmatmul.mubr.msk.f32.gmra.mrb[186].mxu1 %vm333_vm9, %v5160_v19  ;;  %vm9153_vm11 = vcmp.eq.s32.totalorder %v7123_v35, %v6473_v12  ;;  %vm9152_vm6 = vcmp.eq.s32.totalorder %v7130_v51, %v6473_v12 }
 0x23d   : > { %v1813_v53 = vadd.f32 %v1812_v8, %v1790_v27  ;;  %v2326_v5 = vadd.f32 %v2325_v9, %v2303_v57  ;;  %v1791_v40 = vsel %vm9151_vm14, %v1585_v28, 0.0  ;;  %v2304_v42 = vsel %vm9150_vm5, %v2098_v0, 0.0  ;;  %2741 = vmatprep.mubr.f32.mxu0 %v9294_v33  ;;  %3254 = vmatprep.mubr.f32.mxu1 %v9294_v33 }
 0x23e   : > { %v1834_v30 = vadd.f32 %v1833_v18, %v1791_v40  ;;  %v2347_v34 = vadd.f32 %v2346_v59, %v2304_v42  ;;  %vm9155_vm5 = vcmp.eq.s32.totalorder %v7127_v6, %v6473_v12  ;;  %vm9154_vm14 = vcmp.eq.s32.totalorder %v7134_v14, %v6473_v12  ;;  %v5163_v40 = vld [vmem:[%s5695_s6] sm:$0xff] }
 0x23f   : > { %v1589_v20 = vpop.f32.mrb[82].mxu0  ;;  %v2102_v38 = vpop.f32.mrb[82].mxu1 }
 0x240   : > { %v1792_v39 = vsel %vm9153_vm11, %v1589_v20, 0.0  ;;  %v2305_v29 = vsel %vm9152_vm6, %v2102_v38, 0.0  ;;  %v1591_v60 = vpop.f32.mrb[83].mxu0  ;;  %v2104_v36 = vpop.f32.mrb[83].mxu1  ;;  %4822 = vmatmul.mubr.msk.f32.gmra.mrb[188].mxu0 %vm333_vm9, %v5161_v52  ;;  %4862 = vmatmul.mubr.msk.f32.gmra.mrb[188].mxu1 %vm333_vm9, %v5161_v52  ;;  %vm9157_vm6 = vcmp.eq.s32.totalorder %v7123_v35, %v6498_v48  ;;  %vm9156_vm11 = vcmp.eq.s32.totalorder %v7130_v51, %v6498_v48 }
 0x241   : > { %v1814_v62 = vadd.f32 %v1813_v53, %v1792_v39  ;;  %v2327_v3 = vadd.f32 %v2326_v5, %v2305_v29  ;;  %v1793_v63 = vsel %vm9155_vm5, %v1591_v60, 0.0  ;;  %v2306_v37 = vsel %vm9154_vm14, %v2104_v36, 0.0  ;;  %2747 = vmatprep.mubr.f32.mxu0 %v9294_v33  ;;  %3260 = vmatprep.mubr.f32.mxu1 %v9294_v33 }
 0x242   : > { %v1835_v2 = vadd.f32 %v1834_v30, %v1793_v63  ;;  %v2348_v10 = vadd.f32 %v2347_v34, %v2306_v37  ;;  %vm9159_vm14 = vcmp.eq.s32.totalorder %v7127_v6, %v6498_v48  ;;  %vm9158_vm5 = vcmp.eq.s32.totalorder %v7134_v14, %v6498_v48  ;;  %v5164_v63 = vld [vmem:[%s5695_s6 + $0x8] sm:$0xff] }
 0x243   : > { %v1595_v17 = vpop.f32.mrb[84].mxu0  ;;  %v2108_v46 = vpop.f32.mrb[84].mxu1 }
 0x244   : > { %v1794_v47 = vsel %vm9157_vm6, %v1595_v17, 0.0  ;;  %v2307_v15 = vsel %vm9156_vm11, %v2108_v46, 0.0  ;;  %v1597_v8 = vpop.f32.mrb[85].mxu0  ;;  %v2110_v9 = vpop.f32.mrb[85].mxu1  ;;  %4823 = vmatmul.mubr.msk.f32.gmra.mrb[190].mxu0 %vm333_vm9, %v5162_v16  ;;  %4863 = vmatmul.mubr.msk.f32.gmra.mrb[190].mxu1 %vm333_vm9, %v5162_v16  ;;  %vm9161_vm11 = vcmp.eq.s32.totalorder %v7123_v35, %v6501_v44  ;;  %vm9160_vm6 = vcmp.eq.s32.totalorder %v7130_v51, %v6501_v44 }
 0x245   : > { %v1815_v13 = vadd.f32 %v1814_v62, %v1794_v47  ;;  %v2328_v18 = vadd.f32 %v2327_v3, %v2307_v15  ;;  %v1795_v59 = vsel %vm9159_vm14, %v1597_v8, 0.0  ;;  %v2308_v32 = vsel %vm9158_vm5, %v2110_v9, 0.0  ;;  %3589 = vmatprep.mubr.f32.mxu0 %v9294_v33  ;;  %4102 = vmatprep.mubr.f32.mxu1 %v9294_v33 }
 0x246   : > { %v1836_v50 = vadd.f32 %v1835_v2, %v1795_v59  ;;  %v2349_v27 = vadd.f32 %v2348_v10, %v2308_v32  ;;  %vm9163_vm5 = vcmp.eq.s32.totalorder %v7127_v6, %v6501_v44  ;;  %vm9162_vm14 = vcmp.eq.s32.totalorder %v7134_v14, %v6501_v44  ;;  %v5165_v59 = vld [vmem:[%s5695_s6 + $0x10] sm:$0xff] }
 0x247   : > { %v1601_v57 = vpop.f32.mrb[86].mxu0  ;;  %v2114_v28 = vpop.f32.mrb[86].mxu1 }
 0x248   : > { %v1796_v0 = vsel %vm9161_vm11, %v1601_v57, 0.0  ;;  %v2309_v19 = vsel %vm9160_vm6, %v2114_v28, 0.0  ;;  %v1603_v53 = vpop.f32.mrb[87].mxu0  ;;  %v2116_v5 = vpop.f32.mrb[87].mxu1  ;;  %4872 = vmatmul.mubr.msk.f32.vlgmr.msra.gmra.mrb[192].mxu0 %vm333_vm9, %v5163_v40  ;;  %4912 = vmatmul.mubr.msk.f32.vlgmr.msra.gmra.mrb[192].mxu1 %vm333_vm9, %v5163_v40  ;;  %vm9165_vm6 = vcmp.eq.s32.totalorder %v7123_v35, %v6510_v11  ;;  %vm9164_vm11 = vcmp.eq.s32.totalorder %v7130_v51, %v6510_v11 }
 0x249   : > { %v1816_v42 = vadd.f32 %v1815_v13, %v1796_v0  ;;  %v2329_v30 = vadd.f32 %v2328_v18, %v2309_v19  ;;  %v1797_v34 = vsel %vm9163_vm5, %v1603_v53, 0.0  ;;  %v2310_v20 = vsel %vm9162_vm14, %v2116_v5, 0.0  ;;  %3595 = vmatprep.mubr.f32.mxu0 %v9294_v33  ;;  %4108 = vmatprep.mubr.f32.mxu1 %v9294_v33 }
 0x24a   : > { %v1837_v38 = vadd.f32 %v1836_v50, %v1797_v34  ;;  %v2350_v39 = vadd.f32 %v2349_v27, %v2310_v20  ;;  %vm9167_vm14 = vcmp.eq.s32.totalorder %v7127_v6, %v6510_v11  ;;  %vm9166_vm5 = vcmp.eq.s32.totalorder %v7134_v14, %v6510_v11  ;;  %v5166_v34 = vld [vmem:[%s5695_s6 + $0x18] sm:$0xff] }
 0x24b   : > { %v1607_v29 = vpop.f32.mrb[88].mxu0  ;;  %v2120_v60 = vpop.f32.mrb[88].mxu1 }
 0x24c   : > { %v1798_v36 = vsel %vm9165_vm6, %v1607_v29, 0.0  ;;  %v2311_v52 = vsel %vm9164_vm11, %v2120_v60, 0.0  ;;  %v1609_v62 = vpop.f32.mrb[89].mxu0  ;;  %v2122_v3 = vpop.f32.mrb[89].mxu1  ;;  %4873 = vmatmul.mubr.msk.f32.gmra.mrb[194].mxu0 %vm333_vm9, %v5164_v63  ;;  %4913 = vmatmul.mubr.msk.f32.gmra.mrb[194].mxu1 %vm333_vm9, %v5164_v63  ;;  %vm9169_vm11 = vcmp.eq.s32.totalorder %v7123_v35, %v6762_v58  ;;  %vm9168_vm6 = vcmp.eq.s32.totalorder %v7130_v51, %v6762_v58 }
 0x24d   : > { %v1817_v37 = vadd.f32 %v1816_v42, %v1798_v36  ;;  %v2330_v2 = vadd.f32 %v2329_v30, %v2311_v52  ;;  %v1799_v10 = vsel %vm9167_vm14, %v1609_v62, 0.0  ;;  %v2312_v17 = vsel %vm9166_vm5, %v2122_v3, 0.0  ;;  %3601 = vmatprep.mubr.f32.mxu0 %v9294_v33  ;;  %4114 = vmatprep.mubr.f32.mxu1 %v9294_v33 }
 0x24e   : > { %v1838_v46 = vadd.f32 %v1837_v38, %v1799_v10  ;;  %v2351_v47 = vadd.f32 %v2350_v39, %v2312_v17  ;;  %vm9171_vm5 = vcmp.eq.s32.totalorder %v7127_v6, %v6762_v58  ;;  %vm9170_vm14 = vcmp.eq.s32.totalorder %v7134_v14, %v6762_v58  ;;  %v5167_v10 = vld [vmem:[%s5695_s6 + $0x20] sm:$0xff] }
 0x24f   : > { %v1613_v15 = vpop.f32.mrb[90].mxu0  ;;  %v2126_v8 = vpop.f32.mrb[90].mxu1 }
 0x250   : > { %v1800_v9 = vsel %vm9169_vm11, %v1613_v15, 0.0  ;;  %v2313_v16 = vsel %vm9168_vm6, %v2126_v8, 0.0  ;;  %v1615_v13 = vpop.f32.mrb[91].mxu0  ;;  %v2128_v18 = vpop.f32.mrb[91].mxu1  ;;  %4874 = vmatmul.mubr.msk.f32.gmra.mrb[196].mxu0 %vm333_vm9, %v5165_v59  ;;  %4914 = vmatmul.mubr.msk.f32.gmra.mrb[196].mxu1 %vm333_vm9, %v5165_v59  ;;  %vm9173_vm6 = vcmp.eq.s32.totalorder %v7123_v35, %v6798_v49  ;;  %vm9172_vm11 = vcmp.eq.s32.totalorder %v7130_v51, %v6798_v49 }
 0x251   : > { %v1818_v32 = vadd.f32 %v1817_v37, %v1800_v9  ;;  %v2331_v50 = vadd.f32 %v2330_v2, %v2313_v16  ;;  %v1801_v27 = vsel %vm9171_vm5, %v1615_v13, 0.0  ;;  %v2314_v57 = vsel %vm9170_vm14, %v2128_v18, 0.0  ;;  %3607 = vmatprep.mubr.f32.mxu0 %v9294_v33  ;;  %4120 = vmatprep.mubr.f32.mxu1 %v9294_v33 }
 0x252   : > { %v1839_v28 = vadd.f32 %v1838_v46, %v1801_v27  ;;  %v2352_v0 = vadd.f32 %v2351_v47, %v2314_v57  ;;  %vm9175_vm14 = vcmp.eq.s32.totalorder %v7127_v6, %v6798_v49  ;;  %vm9174_vm5 = vcmp.eq.s32.totalorder %v7134_v14, %v6798_v49 }
 0x253   : > { %v1619_v19 = vpop.f32.mrb[92].mxu0  ;;  %v2132_v53 = vpop.f32.mrb[92].mxu1 }
 0x254   : > { %v1802_v5 = vsel %vm9173_vm6, %v1619_v19, 0.0  ;;  %v2315_v40 = vsel %vm9172_vm11, %v2132_v53, 0.0  ;;  %v1621_v42 = vpop.f32.mrb[93].mxu0  ;;  %v2134_v30 = vpop.f32.mrb[93].mxu1  ;;  %4875 = vmatmul.mubr.msk.f32.gmra.mrb[198].mxu0 %vm333_vm9, %v5166_v34  ;;  %4915 = vmatmul.mubr.msk.f32.gmra.mrb[198].mxu1 %vm333_vm9, %v5166_v34  ;;  %vm1772_vm11 = vcmp.eq.s32.totalorder %v7123_v35, %v6826_v25  ;;  %vm2285_vm6 = vcmp.eq.s32.totalorder %v7130_v51, %v6826_v25  ;;  %v5168_v19 = vld [vmem:[%s5695_s6 + $0x28] sm:$0xff] }
 0x255   : > { %v1819_v20 = vadd.f32 %v1818_v32, %v1802_v5  ;;  %v2332_v38 = vadd.f32 %v2331_v50, %v2315_v40  ;;  %v1803_v39 = vsel %vm9175_vm14, %v1621_v42, 0.0  ;;  %v2316_v29 = vsel %vm9174_vm5, %v2134_v30, 0.0  ;;  %3613 = vmatprep.mubr.f32.mxu0 %v9294_v33  ;;  %4126 = vmatprep.mubr.f32.mxu1 %v9294_v33 }
 0x256   : > { %v1840_v60 = vadd.f32 %v1839_v28, %v1803_v39  ;;  %v2353_v36 = vadd.f32 %v2352_v0, %v2316_v29  ;;  %vm1773_vm5 = vcmp.eq.s32.totalorder %v7127_v6, %v6826_v25  ;;  %vm2286_vm14 = vcmp.eq.s32.totalorder %v7134_v14, %v6826_v25 }
 0x257   : > { %v1625_v52 = vpop.f32.mrb[94].mxu0  ;;  %v2138_v62 = vpop.f32.mrb[94].mxu1 }
 0x258   : > { %v1804_v3 = vsel %vm1772_vm11, %v1625_v52, 0.0  ;;  %v2317_v63 = vsel %vm2285_vm6, %v2138_v62, 0.0  ;;  %v1627_v37 = vpop.f32.mrb[95].mxu0  ;;  %v2140_v2 = vpop.f32.mrb[95].mxu1  ;;  %4876 = vmatmul.mubr.msk.f32.gmra.mrb[200].mxu0 %vm333_vm9, %v5167_v10  ;;  %4916 = vmatmul.mubr.msk.f32.gmra.mrb[200].mxu1 %vm333_vm9, %v5167_v10 }
 0x259   : > { %v1820_v17 = vadd.f32 %v1819_v20, %v1804_v3  ;;  %v2333_v46 = vadd.f32 %v2332_v38, %v2317_v63  ;;  %v1805_v47 = vsel %vm1773_vm5, %v1627_v37, 0.0  ;;  %v2318_v15 = vsel %vm2286_vm14, %v2140_v2, 0.0  ;;  %3619 = vmatprep.mubr.f32.mxu0 %v9294_v33  ;;  %4132 = vmatprep.mubr.f32.mxu1 %v9294_v33  ;;  %v5169_v37 = vld [vmem:[%s5695_s6 + $0x30] sm:$0xff] }
 0x25a   : > { %v1841_v8 = vadd.f32 %v1840_v60, %v1805_v47  ;;  %v2354_v9 = vadd.f32 %v2353_v36, %v2318_v15 }
 0x25b   : > { %v1821_v16 = vrot.slane %v1820_v17, 4  ;;  %v2334_v13 = vrot.slane %v2333_v46, 4  ;;  %v1631_v18 = vpop.f32.mrb[96].mxu0  ;;  %v2144_v59 = vpop.f32.mrb[96].mxu1 }
 0x25c   : > { %v1842_v32 = vrot.slane %v1841_v8, 4  ;;  %v2355_v50 = vrot.slane %v2354_v9, 4  ;;  %v1850_v27 = vsel %vm1742_vm7, %v1631_v18, 0.0  ;;  %v2363_v57 = vsel %vm2255_vm15, %v2144_v59, 0.0  ;;  %v1633_v28 = vpop.f32.mrb[97].mxu0  ;;  %v2146_v0 = vpop.f32.mrb[97].mxu1  ;;  %4877 = vmatmul.mubr.msk.f32.gmra.mrb[202].mxu0 %vm333_vm9, %v5168_v19  ;;  %4917 = vmatmul.mubr.msk.f32.gmra.mrb[202].mxu1 %vm333_vm9, %v5168_v19 }
 0x25d   : > { %v1822_v53 = vadd.f32 %v1821_v16, %v1820_v17  ;;  %v2335_v5 = vadd.f32 %v2334_v13, %v2333_v46  ;;  %v1851_v40 = vsel %vm1743_vm13, %v1633_v28, 0.0  ;;  %v2364_v42 = vsel %vm2256_vm3, %v2146_v0, 0.0  ;;  %3625 = vmatprep.mubr.f32.mxu0 %v9294_v33  ;;  %4138 = vmatprep.mubr.f32.mxu1 %v9294_v33 }
 0x25e   : > { %v1843_v30 = vadd.f32 %v1842_v32, %v1841_v8  ;;  %v2356_v34 = vadd.f32 %v2355_v50, %v2354_v9  ;;  %vm9360_vm7 = vcmp.eq.s32.totalorder %v7134_v14, %v5520_v22  ;;  %vm9361_vm15 = vcmp.eq.s32.totalorder %v7123_v35, %v5532_v26 }
 0x25f   : > { %v1823_v20 = vrot.slane %v1822_v53, 2  ;;  %v2336_v38 = vrot.slane %v2335_v5, 2  ;;  %v1637_v39 = vpop.f32.mrb[98].mxu0  ;;  %v2150_v29 = vpop.f32.mrb[98].mxu1  ;;  %vm9362_vm13 = vcmp.eq.s32.totalorder %v7130_v51, %v5532_v26  ;;  %vm9363_vm3 = vcmp.eq.s32.totalorder %v7127_v6, %v5532_v26 }
 0x260   : > { %v1844_v60 = vrot.slane %v1843_v30, 2  ;;  %v2357_v36 = vrot.slane %v2356_v34, 2  ;;  %v1852_v52 = vsel %vm1744_vm2, %v1637_v39, 0.0  ;;  %v2365_v62 = vsel %vm2257_vm10, %v2150_v29, 0.0  ;;  %v1639_v3 = vpop.f32.mrb[99].mxu0  ;;  %v2152_v63 = vpop.f32.mrb[99].mxu1  ;;  %4878 = vmatmul.mubr.msk.f32.gmra.mrb[204].mxu0 %vm333_vm9, %v5169_v37  ;;  %4918 = vmatmul.mubr.msk.f32.gmra.mrb[204].mxu1 %vm333_vm9, %v5169_v37 }
 0x261   : > { %v1824_v2 = vadd.f32 %v1823_v20, %v1822_v53  ;;  %v2337_v10 = vadd.f32 %v2336_v38, %v2335_v5  ;;  %v1882_v17 = vadd.f32 %v1852_v52, %v1850_v27  ;;  %v2395_v46 = vadd.f32 %v2365_v62, %v2363_v57  ;;  %3631 = vmatprep.mubr.f32.mxu0 %v9294_v33  ;;  %v5170_v5 = vld [vmem:[%s5695_s6 + $0x38] sm:$0xff] }
 0x262   : > { %v1845_v47 = vadd.f32 %v1844_v60, %v1843_v30  ;;  %v2358_v15 = vadd.f32 %v2357_v36, %v2356_v34  ;;  %v1853_v8 = vsel %vm1745_vm8, %v1639_v3, 0.0  ;;  %v2366_v9 = vsel %vm2258_vm1, %v2152_v63, 0.0  ;;  %4144 = vmatprep.mubr.f32.mxu1 %v9294_v33 }
 0x263   : > { %v1825_v16 = vrot.slane %v1824_v2, 1  ;;  %v2338_v13 = vrot.slane %v2337_v10, 1  ;;  %v1903_v18 = vadd.f32 %v1853_v8, %v1851_v40  ;;  %v2416_v59 = vadd.f32 %v2366_v9, %v2364_v42  ;;  %v1643_v32 = vpop.f32.mrb[100].mxu0  ;;  %v2156_v50 = vpop.f32.mrb[100].mxu1 }
 0x264   : > { %v1846_v27 = vrot.slane %v1845_v47, 1  ;;  %v2359_v57 = vrot.slane %v2358_v15, 1  ;;  %v1854_v28 = vsel %vm1746_vm12, %v1643_v32, 0.0  ;;  %v2367_v0 = vsel %vm2259_vm4, %v2156_v50, 0.0  ;;  %v1645_v19 = vpop.f32.mrb[101].mxu0  ;;  %v2158_v53 = vpop.f32.mrb[101].mxu1  ;;  %4879 = vmatmul.mubr.msk.f32.gmra.mrb[206].mxu0 %vm333_vm9, %v5170_v5  ;;  %4919 = vmatmul.mubr.msk.f32.gmra.mrb[206].mxu1 %vm333_vm9, %v5170_v5 }
 0x265   : > { %v1826_v40 = vadd.f32 %v1825_v16, %v1824_v2  ;;  %v1883_v42 = vadd.f32 %v1882_v17, %v1854_v28  ;;  %v2396_v30 = vadd.f32 %v2395_v46, %v2367_v0  ;;  %3637 = vmatprep.mubr.f32.mxu0 %v9294_v33  ;;  %v1855_v20 = vsel %vm1747_vm0, %v1645_v19, 0.0  ;;  %4150 = vmatprep.mubr.f32.mxu1 %v9294_v33  ;;  %v5172_v28 = vld [vmem:[%s5695_s6 + $0x48] sm:$0xff] }
 0x266   : > { %v1847_v34 = vadd.f32 %v1846_v27, %v1845_v47  ;;  %v2368_v38 = vsel %vm9360_vm7, %v2158_v53, 0.0  ;;  %v2339_v29 = vadd.f32 %v2338_v13, %v2337_v10  ;;  %v1904_v60 = vadd.f32 %v1903_v18, %v1855_v20  ;;  %v5171_v47 = vld [vmem:[%s5695_s6 + $0x40] sm:$0xff] }
 0x267   : > { %v1848_v39 = vadd.f32 %v1826_v40, %v6925_v61  ;;  %v2417_v36 = vadd.f32 %v2416_v59, %v2368_v38  ;;  %v1649_v52 = vpop.f32.mrb[102].mxu0  ;;  %v2162_v62 = vpop.f32.mrb[102].mxu1  ;;  %v2360_v63 = vadd.f32 %v2359_v57, %v2358_v15  ;;  %vm9364_vm2 = vcmp.eq.s32.totalorder %v7134_v14, %v5532_v26 }
 0x268   : > { %v1849_v3 = vadd.f32 %v1847_v34, %v6927_v54  ;;  %v1856_v37 = vsel %vm9361_vm15, %v1649_v52, 0.0  ;;  %v2369_v2 = vsel %vm9362_vm13, %v2162_v62, 0.0  ;;  %v1651_v17 = vpop.f32.mrb[103].mxu0  ;;  %v2164_v46 = vpop.f32.mrb[103].mxu1  ;;  %4880 = vmatmul.mubr.msk.f32.gmra.mrb[208].mxu0 %vm333_vm9, %v5171_v47  ;;  %4920 = vmatmul.mubr.msk.f32.gmra.mrb[208].mxu1 %vm333_vm9, %v5171_v47  ;;  %vm9365_vm10 = vcmp.eq.s32.totalorder %v7123_v35, %v6406_v43 }
 0x269   : > { %v7636_v61 = vadd.f32 %v2339_v29, %v1848_v39  ;;  %v1884_v54 = vadd.f32 %v1883_v42, %v1856_v37  ;;  %v2397_v10 = vadd.f32 %v2396_v30, %v2369_v2  ;;  %v1857_v15 = vsel %vm9363_vm3, %v1651_v17, 0.0  ;;  %3643 = vmatprep.mubr.f32.mxu0 %v9294_v33  ;;  %4156 = vmatprep.mubr.f32.mxu1 %v9294_v33 }
 0x26a   : > { %v7643_v8 = vadd.f32 %v2360_v63, %v1849_v3  ;;  %v1905_v9 = vadd.f32 %v1904_v60, %v1857_v15  ;;  %v2370_v16 = vsel %vm9364_vm2, %v2164_v46, 0.0  ;;  %vm9366_vm8 = vcmp.eq.s32.totalorder %v7130_v51, %v6406_v43  ;;  %v5173_v60 = vld [vmem:[%s5695_s6 + $0x50] sm:$0xff]  ;;  %v5174_v15 = vld [vmem:[%s5695_s6 + $0x58] sm:$0xff] }
 0x26b   : > { %v2418_v13 = vadd.f32 %v2417_v36, %v2370_v16  ;;  %v1655_v18 = vpop.f32.mrb[104].mxu0  ;;  %v2168_v59 = vpop.f32.mrb[104].mxu1  ;;  %vm9367_vm1 = vcmp.eq.s32.totalorder %v7127_v6, %v6406_v43  ;;  %vm9368_vm12 = vcmp.eq.s32.totalorder %v7134_v14, %v6406_v43  ;;  %vm9369_vm4 = vcmp.eq.s32.totalorder %v7123_v35, %v6435_v24 }
 0x26c   : > { %v1858_v32 = vsel %vm9365_vm10, %v1655_v18, 0.0  ;;  %v2371_v50 = vsel %vm9366_vm8, %v2168_v59, 0.0  ;;  %v1657_v27 = vpop.f32.mrb[105].mxu0  ;;  %v2170_v57 = vpop.f32.mrb[105].mxu1  ;;  %4881 = vmatmul.mubr.msk.f32.gmra.mrb[210].mxu0 %vm333_vm9, %v5172_v28  ;;  %4921 = vmatmul.mubr.msk.f32.gmra.mrb[210].mxu1 %vm333_vm9, %v5172_v28  ;;  %vm9370_vm0 = vcmp.eq.s32.totalorder %v7130_v51, %v6435_v24  ;;  %vm9371_vm7 = vcmp.eq.s32.totalorder %v7127_v6, %v6435_v24 }
 0x26d   : > { %v1885_v0 = vadd.f32 %v1884_v54, %v1858_v32  ;;  %v2398_v19 = vadd.f32 %v2397_v10, %v2371_v50  ;;  %v1859_v53 = vsel %vm9367_vm1, %v1657_v27, 0.0  ;;  %v2372_v5 = vsel %vm9368_vm12, %v2170_v57, 0.0  ;;  %3649 = vmatprep.mubr.f32.mxu0 %v9294_v33  ;;  %4162 = vmatprep.mubr.f32.mxu1 %v9294_v33 }
 0x26e   : > { %v1906_v40 = vadd.f32 %v1905_v9, %v1859_v53  ;;  %v2419_v42 = vadd.f32 %v2418_v13, %v2372_v5  ;;  %vm9372_vm15 = vcmp.eq.s32.totalorder %v7134_v14, %v6435_v24  ;;  %vm9373_vm13 = vcmp.eq.s32.totalorder %v7123_v35, %v6460_v1  ;;  %v5175_v53 = vld [vmem:[%s5695_s6 + $0x60] sm:$0xff] }
 0x26f   : > { %v1661_v30 = vpop.f32.mrb[106].mxu0  ;;  %v2174_v34 = vpop.f32.mrb[106].mxu1  ;;  %vm9374_vm3 = vcmp.eq.s32.totalorder %v7130_v51, %v6460_v1  ;;  %vm9375_vm2 = vcmp.eq.s32.totalorder %v7127_v6, %v6460_v1  ;;  %vm9376_vm10 = vcmp.eq.s32.totalorder %v7134_v14, %v6460_v1  ;;  %vm9377_vm8 = vcmp.eq.s32.totalorder %v7123_v35, %v6463_v45 }
 0x270   : > { %v1860_v20 = vsel %vm9369_vm4, %v1661_v30, 0.0  ;;  %v2373_v38 = vsel %vm9370_vm0, %v2174_v34, 0.0  ;;  %v1663_v39 = vpop.f32.mrb[107].mxu0  ;;  %v2176_v29 = vpop.f32.mrb[107].mxu1  ;;  %4882 = vmatmul.mubr.msk.f32.gmra.mrb[212].mxu0 %vm333_vm9, %v5173_v60  ;;  %4922 = vmatmul.mubr.msk.f32.gmra.mrb[212].mxu1 %vm333_vm9, %v5173_v60  ;;  %vm9378_vm1 = vcmp.eq.s32.totalorder %v7130_v51, %v6463_v45  ;;  %vm9379_vm12 = vcmp.eq.s32.totalorder %v7127_v6, %v6463_v45 }
 0x271   : > { %v1886_v36 = vadd.f32 %v1885_v0, %v1860_v20  ;;  %v2399_v52 = vadd.f32 %v2398_v19, %v2373_v38  ;;  %v1861_v62 = vsel %vm9371_vm7, %v1663_v39, 0.0  ;;  %v2374_v3 = vsel %vm9372_vm15, %v2176_v29, 0.0  ;;  %3655 = vmatprep.mubr.f32.mxu0 %v9294_v33  ;;  %4168 = vmatprep.mubr.f32.mxu1 %v9294_v33 }
 0x272   : > { %v1907_v63 = vadd.f32 %v1906_v40, %v1861_v62  ;;  %v2420_v37 = vadd.f32 %v2419_v42, %v2374_v3  ;;  %vm9380_vm4 = vcmp.eq.s32.totalorder %v7134_v14, %v6463_v45  ;;  %vm9381_vm0 = vcmp.eq.s32.totalorder %v7123_v35, %v6470_v31  ;;  %v5176_v62 = vld [vmem:[%s5695_s6 + $0x68] sm:$0xff] }
 0x273   : > { %v1667_v2 = vpop.f32.mrb[108].mxu0  ;;  %v2180_v17 = vpop.f32.mrb[108].mxu1  ;;  %vm9382_vm7 = vcmp.eq.s32.totalorder %v7130_v51, %v6470_v31  ;;  %vm9383_vm15 = vcmp.eq.s32.totalorder %v7127_v6, %v6470_v31 }
 0x274   : > { %v1862_v46 = vsel %vm9373_vm13, %v1667_v2, 0.0  ;;  %v2375_v47 = vsel %vm9374_vm3, %v2180_v17, 0.0  ;;  %v1669_v54 = vpop.f32.mrb[109].mxu0  ;;  %v2182_v10 = vpop.f32.mrb[109].mxu1  ;;  %4883 = vmatmul.mubr.msk.f32.gmra.mrb[214].mxu0 %vm333_vm9, %v5174_v15  ;;  %4923 = vmatmul.mubr.msk.f32.gmra.mrb[214].mxu1 %vm333_vm9, %v5174_v15  ;;  %vm9384_vm13 = vcmp.eq.s32.totalorder %v7134_v14, %v6470_v31  ;;  %vm9385_vm3 = vcmp.eq.s32.totalorder %v7123_v35, %v6473_v12 }
 0x275   : > { %v1887_v9 = vadd.f32 %v1886_v36, %v1862_v46  ;;  %v2400_v16 = vadd.f32 %v2399_v52, %v2375_v47  ;;  %v1863_v13 = vsel %vm9375_vm2, %v1669_v54, 0.0  ;;  %v2376_v18 = vsel %vm9376_vm10, %v2182_v10, 0.0  ;;  %3661 = vmatprep.mubr.f32.mxu0 %v9294_v33  ;;  %4174 = vmatprep.mubr.f32.mxu1 %v9294_v33 }
 0x276   : > { %v1908_v59 = vadd.f32 %v1907_v63, %v1863_v13  ;;  %v2421_v32 = vadd.f32 %v2420_v37, %v2376_v18  ;;  %vm9386_vm2 = vcmp.eq.s32.totalorder %v7130_v51, %v6473_v12  ;;  %v5177_v13 = vld [vmem:[%s5695_s6 + $0x70] sm:$0xff]  ;;  %vm9387_vm10 = vcmp.eq.s32.totalorder %v7127_v6, %v6473_v12 }
 0x277   : > { %v1673_v50 = vpop.f32.mrb[110].mxu0  ;;  %v2186_v27 = vpop.f32.mrb[110].mxu1 }
 0x278   : > { %v1864_v57 = vsel %vm9377_vm8, %v1673_v50, 0.0  ;;  %v2377_v28 = vsel %vm9378_vm1, %v2186_v27, 0.0  ;;  %v1675_v0 = vpop.f32.mrb[111].mxu0  ;;  %v2188_v19 = vpop.f32.mrb[111].mxu1  ;;  %4884 = vmatmul.mubr.msk.f32.gmra.mrb[216].mxu0 %vm333_vm9, %v5175_v53  ;;  %4924 = vmatmul.mubr.msk.f32.gmra.mrb[216].mxu1 %vm333_vm9, %v5175_v53  ;;  %vm9388_vm8 = vcmp.eq.s32.totalorder %v7134_v14, %v6473_v12  ;;  %vm9389_vm1 = vcmp.eq.s32.totalorder %v7123_v35, %v6498_v48 }
 0x279   : > { %v1888_v5 = vadd.f32 %v1887_v9, %v1864_v57  ;;  %v2401_v40 = vadd.f32 %v2400_v16, %v2377_v28  ;;  %v1865_v42 = vsel %vm9379_vm12, %v1675_v0, 0.0  ;;  %v2378_v30 = vsel %vm9380_vm4, %v2188_v19, 0.0  ;;  %3667 = vmatprep.mubr.f32.mxu0 %v9294_v33  ;;  %4180 = vmatprep.mubr.f32.mxu1 %v9294_v33 }
 0x27a   : > { %v1909_v34 = vadd.f32 %v1908_v59, %v1865_v42  ;;  %v2422_v20 = vadd.f32 %v2421_v32, %v2378_v30  ;;  %vm9390_vm12 = vcmp.eq.s32.totalorder %v7130_v51, %v6498_v48  ;;  %v5178_v42 = vld [vmem:[%s5695_s6 + $0x78] sm:$0xff]  ;;  %vm9391_vm4 = vcmp.eq.s32.totalorder %v7127_v6, %v6498_v48 }
 0x27b   : > { %v1679_v38 = vpop.f32.mrb[112].mxu0  ;;  %v2192_v39 = vpop.f32.mrb[112].mxu1 }
 0x27c   : > { %v1866_v29 = vsel %vm9381_vm0, %v1679_v38, 0.0  ;;  %v2379_v60 = vsel %vm9382_vm7, %v2192_v39, 0.0  ;;  %v1681_v36 = vpop.f32.mrb[113].mxu0  ;;  %v2194_v52 = vpop.f32.mrb[113].mxu1  ;;  %4885 = vmatmul.mubr.msk.f32.gmra.mrb[218].mxu0 %vm333_vm9, %v5176_v62  ;;  %4925 = vmatmul.mubr.msk.f32.gmra.mrb[218].mxu1 %vm333_vm9, %v5176_v62  ;;  %vm9392_vm0 = vcmp.eq.s32.totalorder %v7134_v14, %v6498_v48  ;;  %vm9393_vm7 = vcmp.eq.s32.totalorder %v7123_v35, %v6501_v44 }
 0x27d   : > { %v1889_v3 = vadd.f32 %v1888_v5, %v1866_v29  ;;  %v2402_v63 = vadd.f32 %v2401_v40, %v2379_v60  ;;  %v1867_v37 = vsel %vm9383_vm15, %v1681_v36, 0.0  ;;  %v2380_v2 = vsel %vm9384_vm13, %v2194_v52, 0.0  ;;  %3673 = vmatprep.mubr.f32.mxu0 %v9294_v33  ;;  %4186 = vmatprep.mubr.f32.mxu1 %v9294_v33 }
 0x27e   : > { %v1910_v17 = vadd.f32 %v1909_v34, %v1867_v37  ;;  %v2423_v46 = vadd.f32 %v2422_v20, %v2380_v2  ;;  %vm9394_vm15 = vcmp.eq.s32.totalorder %v7130_v51, %v6501_v44  ;;  %v5179_v37 = vld [vmem:[%s5695_s6 + $0x80] sm:$0xff]  ;;  %vm9395_vm13 = vcmp.eq.s32.totalorder %v7127_v6, %v6501_v44 }
 0x27f   : > { %v1685_v47 = vpop.f32.mrb[114].mxu0  ;;  %v2198_v54 = vpop.f32.mrb[114].mxu1 }
 0x280   : > { %v1868_v10 = vsel %vm9385_vm3, %v1685_v47, 0.0  ;;  %v2381_v15 = vsel %vm9386_vm2, %v2198_v54, 0.0  ;;  %v1687_v9 = vpop.f32.mrb[115].mxu0  ;;  %v2200_v16 = vpop.f32.mrb[115].mxu1  ;;  %4886 = vmatmul.mubr.msk.f32.gmra.mrb[220].mxu0 %vm333_vm9, %v5177_v13  ;;  %4926 = vmatmul.mubr.msk.f32.gmra.mrb[220].mxu1 %vm333_vm9, %v5177_v13  ;;  %vm9396_vm3 = vcmp.eq.s32.totalorder %v7134_v14, %v6501_v44  ;;  %vm9397_vm2 = vcmp.eq.s32.totalorder %v7123_v35, %v6510_v11 }
 0x281   : > { %v1890_v18 = vadd.f32 %v1889_v3, %v1868_v10  ;;  %v2403_v59 = vadd.f32 %v2402_v63, %v2381_v15  ;;  %v1869_v32 = vsel %vm9387_vm10, %v1687_v9, 0.0  ;;  %v2382_v50 = vsel %vm9388_vm8, %v2200_v16, 0.0  ;;  %3679 = vmatprep.mubr.f32.mxu0 %v9294_v33  ;;  %4192 = vmatprep.mubr.f32.mxu1 %v9294_v33 }
 0x282   : > { %v1911_v27 = vadd.f32 %v1910_v17, %v1869_v32  ;;  %v2424_v57 = vadd.f32 %v2423_v46, %v2382_v50  ;;  %vm9398_vm10 = vcmp.eq.s32.totalorder %v7130_v51, %v6510_v11  ;;  %v5180_v32 = vld [vmem:[%s5695_s6 + $0x88] sm:$0xff]  ;;  %vm9399_vm8 = vcmp.eq.s32.totalorder %v7127_v6, %v6510_v11 }
 0x283   : > { %v1691_v28 = vpop.f32.mrb[116].mxu0  ;;  %v2204_v0 = vpop.f32.mrb[116].mxu1 }
 0x284   : > { %v1870_v19 = vsel %vm9389_vm1, %v1691_v28, 0.0  ;;  %v2383_v53 = vsel %vm9390_vm12, %v2204_v0, 0.0  ;;  %v1693_v5 = vpop.f32.mrb[117].mxu0  ;;  %v2206_v40 = vpop.f32.mrb[117].mxu1  ;;  %4887 = vmatmul.mubr.msk.f32.gmra.mrb[222].mxu0 %vm333_vm9, %v5178_v42  ;;  %4927 = vmatmul.mubr.msk.f32.gmra.mrb[222].mxu1 %vm333_vm9, %v5178_v42  ;;  %vm9400_vm1 = vcmp.eq.s32.totalorder %v7134_v14, %v6510_v11  ;;  %v9403_v42 = vld [vmem:[#allocation9_spill] sm:$0xff]  ;;  %vm9405_vm12 = vcmp.eq.s32.totalorder %v7123_v35, %v6762_v58 }
 0x285   : > { %v1891_v30 = vadd.f32 %v1890_v18, %v1870_v19  ;;  %v2404_v34 = vadd.f32 %v2403_v59, %v2383_v53  ;;  %v1871_v20 = vsel %vm9391_vm4, %v1693_v5, 0.0  ;;  %v2384_v38 = vsel %vm9392_vm0, %v2206_v40, 0.0  ;;  %3685 = vmatprep.mubr.f32.mxu0 %v9294_v33  ;;  %4198 = vmatprep.mubr.f32.mxu1 %v9294_v33  ;;  %v9401_v53 = vld [vmem:[#allocation8_spill] sm:$0xff] }
 0x286   : > { %v1912_v39 = vadd.f32 %v1911_v27, %v1871_v20  ;;  %v2425_v29 = vadd.f32 %v2424_v57, %v2384_v38  ;;  %v9402_v5 = vand.u32 127, %v9401_v53  ;;  %vm9406_vm4 = vcmp.eq.s32.totalorder %v7130_v51, %v6762_v58 }
 0x287   : > { %v1697_v60 = vpop.f32.mrb[118].mxu0  ;;  %v2210_v36 = vpop.f32.mrb[118].mxu1  ;;  %vm9407_vm0 = vcmp.eq.s32.totalorder %v7127_v6, %v6762_v58 }
 0x288   : > { %v1872_v52 = vsel %vm9393_vm7, %v1697_v60, 0.0  ;;  %v2385_v62 = vsel %vm9394_vm15, %v2210_v36, 0.0  ;;  %v1699_v3 = vpop.f32.mrb[119].mxu0  ;;  %v2212_v63 = vpop.f32.mrb[119].mxu1  ;;  %4888 = vmatmul.mubr.msk.f32.gmra.mrb[224].mxu0 %vm333_vm9, %v5179_v37  ;;  %4928 = vmatmul.mubr.msk.f32.gmra.mrb[224].mxu1 %vm333_vm9, %v5179_v37  ;;  %v2757_v40 = vrot.slane %v9402_v5, %v5493_v7  ;;  %vm9408_vm7 = vcmp.eq.s32.totalorder %v7134_v14, %v6762_v58 }
 0x289   : > { %v1892_v2 = vadd.f32 %v1891_v30, %v1872_v52  ;;  %v2405_v17 = vadd.f32 %v2404_v34, %v2385_v62  ;;  %v1873_v46 = vsel %vm9395_vm13, %v1699_v3, 0.0  ;;  %v2386_v47 = vsel %vm9396_vm3, %v2212_v63, 0.0  ;;  %3691 = vmatprep.mubr.f32.mxu0 %v9294_v33  ;;  %4204 = vmatprep.mubr.f32.mxu1 %v9294_v33  ;;  %v5181_v52 = vld [vmem:[%s5695_s6 + $0x90] sm:$0xff] }
 0x28a   : > { %v1913_v54 = vadd.f32 %v1912_v39, %v1873_v46  ;;  %v2426_v10 = vadd.f32 %v2425_v29, %v2386_v47  ;;  %v9404_v30 = vand.u32 127, %v9403_v42  ;;  %v7825_v46 = vrot.slane %v2757_v40, %v5493_v7  ;;  %v9409_v47 = vld [vmem:[#allocation10_spill] sm:$0xff] }
 0x28b   : > { %v1703_v15 = vpop.f32.mrb[120].mxu0  ;;  %v2216_v9 = vpop.f32.mrb[120].mxu1  ;;  %vm9411_vm15 = vcmp.eq.s32.totalorder %v7123_v35, %v6798_v49  ;;  %vm9412_vm13 = vcmp.eq.s32.totalorder %v7130_v51, %v6798_v49  ;;  %vm9413_vm3 = vcmp.eq.s32.totalorder %v7127_v6, %v6798_v49 }
 0x28c   : > { %v1874_v16 = vsel %vm9397_vm2, %v1703_v15, 0.0  ;;  %v2387_v13 = vsel %vm9398_vm10, %v2216_v9, 0.0  ;;  %v1705_v18 = vpop.f32.mrb[121].mxu0  ;;  %v2218_v59 = vpop.f32.mrb[121].mxu1  ;;  %4889 = vmatmul.mubr.msk.f32.gmra.mrb[226].mxu0 %vm333_vm9, %v5180_v32  ;;  %4929 = vmatmul.mubr.msk.f32.gmra.mrb[226].mxu1 %vm333_vm9, %v5180_v32  ;;  %v3270_v34 = vrot.slane %v9404_v30, %v5493_v7  ;;  %v9410_v15 = vld [vmem:[#allocation12_spill] sm:$0xff]  ;;  %vm9414_vm2 = vcmp.eq.s32.totalorder %v7134_v14, %v6798_v49 }
 0x28d   : > { %v1893_v50 = vadd.f32 %v1892_v2, %v1874_v16  ;;  %v2406_v27 = vadd.f32 %v2405_v17, %v2387_v13  ;;  %v1875_v57 = vsel %vm9399_vm8, %v1705_v18, 0.0  ;;  %v2388_v28 = vsel %vm9400_vm1, %v2218_v59, 0.0  ;;  %3697 = vmatprep.mubr.f32.mxu0 %v9294_v33  ;;  %4210 = vmatprep.mubr.f32.mxu1 %v9294_v33 }
 0x28e   : > { %v1914_v0 = vadd.f32 %v1913_v54, %v1875_v57  ;;  %v2427_v19 = vadd.f32 %v2426_v10, %v2388_v28  ;;  %v7829_v54 = vrot.slane %v9409_v47, %v5493_v7  ;;  %v7832_v10 = vrot.slane %v3270_v34, %v5493_v7 }
 0x28f   : > { %v1709_v20 = vpop.f32.mrb[122].mxu0  ;;  %v2222_v38 = vpop.f32.mrb[122].mxu1  ;;  %v7836_v9 = vrot.slane %v9410_v15, %v5493_v7  ;;  %vm2770_vm10 = vcmp.eq.s32.totalorder %v7825_v46, %v5419_v23 }
 0x290   : > { %v1876_v39 = vsel %vm9405_vm12, %v1709_v20, 0.0  ;;  %v2389_v29 = vsel %vm9406_vm4, %v2222_v38, 0.0  ;;  %v1711_v60 = vpop.f32.mrb[123].mxu0  ;;  %v2224_v36 = vpop.f32.mrb[123].mxu1  ;;  %4890 = vmatmul.mubr.msk.f32.gmra.mrb[228].mxu0 %vm333_vm9, %v5181_v52  ;;  %4930 = vmatmul.mubr.msk.f32.gmra.mrb[228].mxu1 %vm333_vm9, %v5181_v52  ;;  %vm3283_vm8 = vcmp.eq.s32.totalorder %v7832_v10, %v5419_v23  ;;  %vm2771_vm1 = vcmp.eq.s32.totalorder %v7829_v54, %v5419_v23 }
 0x291   : > { %v1894_v62 = vadd.f32 %v1893_v50, %v1876_v39  ;;  %v2407_v3 = vadd.f32 %v2406_v27, %v2389_v29  ;;  %v1877_v63 = vsel %vm9407_vm0, %v1711_v60, 0.0  ;;  %v2390_v37 = vsel %vm9408_vm7, %v2224_v36, 0.0  ;;  %3703 = vmatprep.mubr.f32.mxu0 %v9294_v33  ;;  %4216 = vmatprep.mubr.f32.mxu1 %v9294_v33  ;;  %v5182_v27 = vld [vmem:[%s5695_s6 + $0x98] sm:$0xff]  ;;  %v5183_v39 = vld [vmem:[%s5695_s6 + $0xa0] sm:$0xff] }
 0x292   : > { %v1915_v2 = vadd.f32 %v1914_v0, %v1877_v63  ;;  %v2428_v17 = vadd.f32 %v2427_v19, %v2390_v37  ;;  %vm3284_vm12 = vcmp.eq.s32.totalorder %v7836_v9, %v5419_v23  ;;  %vm2772_vm4 = vcmp.eq.s32.totalorder %v7825_v46, %v5517_v21 }
 0x293   : > { %v1715_v16 = vpop.f32.mrb[124].mxu0  ;;  %v2228_v13 = vpop.f32.mrb[124].mxu1  ;;  %vm3285_vm0 = vcmp.eq.s32.totalorder %v7832_v10, %v5517_v21  ;;  %vm2775_vm7 = vcmp.eq.s32.totalorder %v7829_v54, %v5520_v22 }
 0x294   : > { %v1878_v18 = vsel %vm9411_vm15, %v1715_v16, 0.0  ;;  %v2391_v59 = vsel %vm9412_vm13, %v2228_v13, 0.0  ;;  %v1717_v32 = vpop.f32.mrb[125].mxu0  ;;  %v2230_v50 = vpop.f32.mrb[125].mxu1  ;;  %4891 = vmatmul.mubr.msk.f32.gmra.mrb[230].mxu0 %vm333_vm9, %v5182_v27  ;;  %4931 = vmatmul.mubr.msk.f32.gmra.mrb[230].mxu1 %vm333_vm9, %v5182_v27  ;;  %v5184_v16 = vld [vmem:[%s5695_s6 + $0xa8] sm:$0xff]  ;;  %vm3288_vm15 = vcmp.eq.s32.totalorder %v7836_v9, %v5520_v22  ;;  %vm9180_vm13 = vcmp.eq.s32.totalorder %v7825_v46, %v5532_v26 }
 0x295   : > { %v1895_v57 = vadd.f32 %v1894_v62, %v1878_v18  ;;  %v2408_v28 = vadd.f32 %v2407_v3, %v2391_v59  ;;  %v1879_v0 = vsel %vm9413_vm3, %v1717_v32, 0.0  ;;  %v2392_v19 = vsel %vm9414_vm2, %v2230_v50, 0.0  ;;  %3709 = vmatprep.mubr.f32.mxu0 %v9294_v33  ;;  %4222 = vmatprep.mubr.f32.mxu1 %v9294_v33 }
 0x296   : > { %v1916_v53 = vadd.f32 %v1915_v2, %v1879_v0  ;;  %v2429_v5 = vadd.f32 %v2428_v17, %v2392_v19  ;;  %vm9177_vm3 = vcmp.eq.s32.totalorder %v7832_v10, %v5532_v26  ;;  %vm9178_vm2 = vcmp.eq.s32.totalorder %v7829_v54, %v5532_v26 }
 0x297   : > { %v1721_v40 = vpop.f32.mrb[126].mxu0  ;;  %v2234_v42 = vpop.f32.mrb[126].mxu1 }
 0x298   : > { %v1880_v30 = vsel %vm1772_vm11, %v1721_v40, 0.0  ;;  %v2393_v34 = vsel %vm2285_vm6, %v2234_v42, 0.0  ;;  %v1723_v20 = vpop.f32.mrb[127].mxu0  ;;  %v2236_v38 = vpop.f32.mrb[127].mxu1  ;;  %4892 = vmatmul.mubr.msk.f32.gmra.mrb[232].mxu0 %vm333_vm9, %v5183_v39  ;;  %4932 = vmatmul.mubr.msk.f32.gmra.mrb[232].mxu1 %vm333_vm9, %v5183_v39  ;;  %vm2773_vm11 = vcmp.eq.s32.totalorder %v7829_v54, %v5517_v21  ;;  %vm3286_vm6 = vcmp.eq.s32.totalorder %v7836_v9, %v5517_v21 }
 0x299   : > { %v1896_v29 = vadd.f32 %v1895_v57, %v1880_v30  ;;  %v2409_v35 = vadd.f32 %v2408_v28, %v2393_v34  ;;  %v1881_v51 = vsel %vm1773_vm5, %v1723_v20, 0.0  ;;  %v2394_v60 = vsel %vm2286_vm14, %v2236_v38, 0.0  ;;  %3715 = vmatprep.mubr.f32.mxu0 %v9294_v33  ;;  %4228 = vmatprep.mubr.f32.mxu1 %v9294_v33  ;;  %v5185_v20 = vld [vmem:[%s5695_s6 + $0xb0] sm:$0xff] }
 0x29a   : > { %v1917_v36 = vadd.f32 %v1916_v53, %v1881_v51  ;;  %v2430_v52 = vadd.f32 %v2429_v5, %v2394_v60  ;;  %vm2774_vm14 = vcmp.eq.s32.totalorder %v7825_v46, %v5520_v22  ;;  %vm9176_vm5 = vcmp.eq.s32.totalorder %v7832_v10, %v5520_v22 }
 0x29b   : > { %v1897_v62 = vrot.slane %v1896_v29, 4  ;;  %v2410_v6 = vrot.slane %v2409_v35, 4  ;;  %v2563_v3 = vpop.f32.mrb[128].mxu0  ;;  %v3076_v63 = vpop.f32.mrb[128].mxu1 }
 0x29c   : > { %v1918_v14 = vrot.slane %v1917_v36, 4  ;;  %v2431_v37 = vrot.slane %v2430_v52, 4  ;;  %v2802_v2 = vsel %vm2770_vm10, %v2563_v3, 0.0  ;;  %v3315_v17 = vsel %vm3283_vm8, %v3076_v63, 0.0  ;;  %v2565_v47 = vpop.f32.mrb[129].mxu0  ;;  %v3078_v15 = vpop.f32.mrb[129].mxu1  ;;  %4893 = vmatmul.mubr.msk.f32.gmra.mrb[234].mxu0 %vm333_vm9, %v5184_v16  ;;  %4933 = vmatmul.mubr.msk.f32.gmra.mrb[234].mxu1 %vm333_vm9, %v5184_v16 }
 0x29d   : > { %v1898_v13 = vadd.f32 %v1897_v62, %v1896_v29  ;;  %v2411_v18 = vadd.f32 %v2410_v6, %v2409_v35  ;;  %v2803_v59 = vsel %vm2771_vm1, %v2565_v47, 0.0  ;;  %v3316_v32 = vsel %vm3284_vm12, %v3078_v15, 0.0  ;;  %3721 = vmatprep.mubr.f32.mxu0 %v9294_v33  ;;  %4234 = vmatprep.mubr.f32.mxu1 %v9294_v33 }
 0x29e   : > { %v1919_v50 = vadd.f32 %v1918_v14, %v1917_v36  ;;  %v2432_v27 = vadd.f32 %v2431_v37, %v2430_v52 }
 0x29f   : > { %v1899_v57 = vrot.slane %v1898_v13, 2  ;;  %v2412_v28 = vrot.slane %v2411_v18, 2  ;;  %v2569_v0 = vpop.f32.mrb[130].mxu0  ;;  %v3082_v19 = vpop.f32.mrb[130].mxu1 }
 0x2a0   : > { %v1920_v53 = vrot.slane %v1919_v50, 2  ;;  %v2433_v5 = vrot.slane %v2432_v27, 2  ;;  %v2804_v40 = vsel %vm2772_vm4, %v2569_v0, 0.0  ;;  %v3317_v42 = vsel %vm3285_vm0, %v3082_v19, 0.0  ;;  %v2571_v30 = vpop.f32.mrb[131].mxu0  ;;  %v3084_v34 = vpop.f32.mrb[131].mxu1  ;;  %4894 = vmatmul.mubr.msk.f32.gmra.mrb[236].mxu0 %vm333_vm9, %v5185_v20  ;;  %4934 = vmatmul.mubr.msk.f32.gmra.mrb[236].mxu1 %vm333_vm9, %v5185_v20 }
 0x2a1   : > { %v1900_v38 = vadd.f32 %v1899_v57, %v1898_v13  ;;  %v2413_v39 = vadd.f32 %v2412_v28, %v2411_v18  ;;  %v2834_v29 = vadd.f32 %v2804_v40, %v2802_v2  ;;  %v3347_v35 = vadd.f32 %v3317_v42, %v3315_v17  ;;  %3727 = vmatprep.mubr.f32.mxu0 %v9294_v33  ;;  %v5186_v18 = vld [vmem:[%s5695_s6 + $0xb8] sm:$0xff] }
 0x2a2   : > { %v1921_v51 = vadd.f32 %v1920_v53, %v1919_v50  ;;  %v2434_v60 = vadd.f32 %v2433_v5, %v2432_v27  ;;  %v2805_v36 = vsel %vm2773_vm11, %v2571_v30, 0.0  ;;  %v3318_v52 = vsel %vm3286_vm6, %v3084_v34, 0.0  ;;  %4240 = vmatprep.mubr.f32.mxu1 %v9294_v33 }
 0x2a3   : > { %v1901_v62 = vrot.slane %v1900_v38, 1  ;;  %v2414_v6 = vrot.slane %v2413_v39, 1  ;;  %v2855_v3 = vadd.f32 %v2805_v36, %v2803_v59  ;;  %v3368_v63 = vadd.f32 %v3318_v52, %v3316_v32  ;;  %v2575_v14 = vpop.f32.mrb[132].mxu0  ;;  %v3088_v37 = vpop.f32.mrb[132].mxu1 }
 0x2a4   : > { %v1922_v2 = vrot.slane %v1921_v51, 1  ;;  %v2435_v17 = vrot.slane %v2434_v60, 1  ;;  %v2806_v47 = vsel %vm2774_vm14, %v2575_v14, 0.0  ;;  %v3319_v15 = vsel %vm9176_vm5, %v3088_v37, 0.0  ;;  %v2577_v16 = vpop.f32.mrb[133].mxu0  ;;  %v3090_v13 = vpop.f32.mrb[133].mxu1  ;;  %4895 = vmatmul.mubr.msk.f32.gmra.mrb[238].mxu0 %vm333_vm9, %v5186_v18  ;;  %4935 = vmatmul.mubr.msk.f32.gmra.mrb[238].mxu1 %vm333_vm9, %v5186_v18 }
 0x2a5   : > { %v1902_v59 = vadd.f32 %v1901_v62, %v1900_v38  ;;  %v2835_v32 = vadd.f32 %v2834_v29, %v2806_v47  ;;  %v3348_v50 = vadd.f32 %v3347_v35, %v3319_v15  ;;  %3733 = vmatprep.mubr.f32.mxu0 %v9294_v33  ;;  %v2807_v57 = vsel %vm2775_vm7, %v2577_v16, 0.0  ;;  %4246 = vmatprep.mubr.f32.mxu1 %v9294_v33  ;;  %v5188_v47 = vld [vmem:[%s5695_s6 + $0xc8] sm:$0xff] }
 0x2a6   : > { %v1923_v27 = vadd.f32 %v1922_v2, %v1921_v51  ;;  %v3320_v28 = vsel %vm3288_vm15, %v3090_v13, 0.0  ;;  %vm9179_vm5 = vcmp.eq.s32.totalorder %v7836_v9, %v5532_v26  ;;  %v2415_v19 = vadd.f32 %v2414_v6, %v2413_v39  ;;  %v5187_v51 = vld [vmem:[%s5695_s6 + $0xc0] sm:$0xff] }
 0x2a7   : > { %v1924_v0 = vadd.f32 %v1902_v59, %v7249_v41  ;;  %v2856_v53 = vadd.f32 %v2855_v3, %v2807_v57  ;;  %v3369_v5 = vadd.f32 %v3368_v63, %v3320_v28  ;;  %v2581_v40 = vpop.f32.mrb[134].mxu0  ;;  %v3094_v42 = vpop.f32.mrb[134].mxu1  ;;  %v2436_v34 = vadd.f32 %v2435_v17, %v2434_v60 }
 0x2a8   : > { %v1925_v30 = vadd.f32 %v1923_v27, %v7253_v4  ;;  %v2808_v20 = vsel %vm9180_vm13, %v2581_v40, 0.0  ;;  %v3321_v38 = vsel %vm9177_vm3, %v3094_v42, 0.0  ;;  %v2583_v29 = vpop.f32.mrb[135].mxu0  ;;  %v3096_v35 = vpop.f32.mrb[135].mxu1  ;;  %4896 = vmatmul.mubr.msk.f32.gmra.mrb[240].mxu0 %vm333_vm9, %v5187_v51  ;;  %4936 = vmatmul.mubr.msk.f32.gmra.mrb[240].mxu1 %vm333_vm9, %v5187_v51  ;;  %vm9182_vm3 = vcmp.eq.s32.totalorder %v7825_v46, %v6406_v43 }
 0x2a9   : > { %v7966_v41 = vadd.f32 %v2415_v19, %v1924_v0  ;;  %v2836_v39 = vadd.f32 %v2835_v32, %v2808_v20  ;;  %v3349_v4 = vadd.f32 %v3348_v50, %v3321_v38  ;;  %v2809_v60 = vsel %vm9178_vm2, %v2583_v29, 0.0  ;;  %3739 = vmatprep.mubr.f32.mxu0 %v9294_v33  ;;  %4252 = vmatprep.mubr.f32.mxu1 %v9294_v33 }
 0x2aa   : > { %v7973_v36 = vadd.f32 %v2436_v34, %v1925_v30  ;;  %v2857_v52 = vadd.f32 %v2856_v53, %v2809_v60  ;;  %v3322_v62 = vsel %vm9179_vm5, %v3096_v35, 0.0  ;;  %vm9181_vm2 = vcmp.eq.s32.totalorder %v7832_v10, %v6406_v43  ;;  %v5189_v53 = vld [vmem:[%s5695_s6 + $0xd0] sm:$0xff]  ;;  %v5190_v60 = vld [vmem:[%s5695_s6 + $0xd8] sm:$0xff] }
 0x2ab   : > { %v3370_v6 = vadd.f32 %v3369_v5, %v3322_v62  ;;  %v2587_v3 = vpop.f32.mrb[136].mxu0  ;;  %v3100_v63 = vpop.f32.mrb[136].mxu1  ;;  %vm9184_vm5 = vcmp.eq.s32.totalorder %v7829_v54, %v6406_v43  ;;  %vm9183_vm13 = vcmp.eq.s32.totalorder %v7836_v9, %v6406_v43 }
 0x2ac   : > { %v2810_v14 = vsel %vm9182_vm3, %v2587_v3, 0.0  ;;  %v3323_v37 = vsel %vm9181_vm2, %v3100_v63, 0.0  ;;  %v2589_v2 = vpop.f32.mrb[137].mxu0  ;;  %v3102_v17 = vpop.f32.mrb[137].mxu1  ;;  %4897 = vmatmul.mubr.msk.f32.gmra.mrb[242].mxu0 %vm333_vm9, %v5188_v47  ;;  %4937 = vmatmul.mubr.msk.f32.gmra.mrb[242].mxu1 %vm333_vm9, %v5188_v47  ;;  %vm9186_vm2 = vcmp.eq.s32.totalorder %v7825_v46, %v6435_v24  ;;  %vm9185_vm3 = vcmp.eq.s32.totalorder %v7832_v10, %v6435_v24 }
 0x2ad   : > { %v2837_v15 = vadd.f32 %v2836_v39, %v2810_v14  ;;  %v3350_v16 = vadd.f32 %v3349_v4, %v3323_v37  ;;  %v2811_v13 = vsel %vm9184_vm5, %v2589_v2, 0.0  ;;  %v3324_v18 = vsel %vm9183_vm13, %v3102_v17, 0.0  ;;  %3745 = vmatprep.mubr.f32.mxu0 %v9294_v33  ;;  %4258 = vmatprep.mubr.f32.mxu1 %v9294_v33 }
 0x2ae   : > { %v2858_v59 = vadd.f32 %v2857_v52, %v2811_v13  ;;  %v3371_v32 = vadd.f32 %v3370_v6, %v3324_v18  ;;  %vm9188_vm13 = vcmp.eq.s32.totalorder %v7829_v54, %v6435_v24  ;;  %vm9187_vm5 = vcmp.eq.s32.totalorder %v7836_v9, %v6435_v24  ;;  %v5191_v13 = vld [vmem:[%s5695_s6 + $0xe0] sm:$0xff] }
 0x2af   : > { %v2593_v50 = vpop.f32.mrb[138].mxu0  ;;  %v3106_v27 = vpop.f32.mrb[138].mxu1 }
 0x2b0   : > { %v2812_v57 = vsel %vm9186_vm2, %v2593_v50, 0.0  ;;  %v3325_v28 = vsel %vm9185_vm3, %v3106_v27, 0.0  ;;  %v2595_v0 = vpop.f32.mrb[139].mxu0  ;;  %v3108_v19 = vpop.f32.mrb[139].mxu1  ;;  %4898 = vmatmul.mubr.msk.f32.gmra.mrb[244].mxu0 %vm333_vm9, %v5189_v53  ;;  %4938 = vmatmul.mubr.msk.f32.gmra.mrb[244].mxu1 %vm333_vm9, %v5189_v53  ;;  %vm9190_vm3 = vcmp.eq.s32.totalorder %v7825_v46, %v6460_v1  ;;  %vm9189_vm2 = vcmp.eq.s32.totalorder %v7832_v10, %v6460_v1 }
 0x2b1   : > { %v2838_v5 = vadd.f32 %v2837_v15, %v2812_v57  ;;  %v3351_v40 = vadd.f32 %v3350_v16, %v3325_v28  ;;  %v2813_v42 = vsel %vm9188_vm13, %v2595_v0, 0.0  ;;  %v3326_v30 = vsel %vm9187_vm5, %v3108_v19, 0.0  ;;  %3751 = vmatprep.mubr.f32.mxu0 %v9294_v33  ;;  %4264 = vmatprep.mubr.f32.mxu1 %v9294_v33 }
 0x2b2   : > { %v2859_v34 = vadd.f32 %v2858_v59, %v2813_v42  ;;  %v3372_v20 = vadd.f32 %v3371_v32, %v3326_v30  ;;  %vm9192_vm5 = vcmp.eq.s32.totalorder %v7829_v54, %v6460_v1  ;;  %vm9191_vm13 = vcmp.eq.s32.totalorder %v7836_v9, %v6460_v1  ;;  %v5192_v42 = vld [vmem:[%s5695_s6 + $0xe8] sm:$0xff] }
 0x2b3   : > { %v2599_v38 = vpop.f32.mrb[140].mxu0  ;;  %v3112_v29 = vpop.f32.mrb[140].mxu1 }
 0x2b4   : > { %v2814_v35 = vsel %vm9190_vm3, %v2599_v38, 0.0  ;;  %v3327_v51 = vsel %vm9189_vm2, %v3112_v29, 0.0  ;;  %v2601_v39 = vpop.f32.mrb[141].mxu0  ;;  %v3114_v4 = vpop.f32.mrb[141].mxu1  ;;  %4899 = vmatmul.mubr.msk.f32.gmra.mrb[246].mxu0 %vm333_vm9, %v5190_v60  ;;  %4939 = vmatmul.mubr.msk.f32.gmra.mrb[246].mxu1 %vm333_vm9, %v5190_v60  ;;  %vm9194_vm2 = vcmp.eq.s32.totalorder %v7825_v46, %v6463_v45  ;;  %vm9193_vm3 = vcmp.eq.s32.totalorder %v7832_v10, %v6463_v45 }
 0x2b5   : > { %v2839_v52 = vadd.f32 %v2838_v5, %v2814_v35  ;;  %v3352_v62 = vadd.f32 %v3351_v40, %v3327_v51  ;;  %v2815_v6 = vsel %vm9192_vm5, %v2601_v39, 0.0  ;;  %v3328_v3 = vsel %vm9191_vm13, %v3114_v4, 0.0  ;;  %3757 = vmatprep.mubr.f32.mxu0 %v9294_v33  ;;  %4270 = vmatprep.mubr.f32.mxu1 %v9294_v33 }
 0x2b6   : > { %v2860_v63 = vadd.f32 %v2859_v34, %v2815_v6  ;;  %v3373_v14 = vadd.f32 %v3372_v20, %v3328_v3  ;;  %vm9196_vm13 = vcmp.eq.s32.totalorder %v7829_v54, %v6463_v45  ;;  %vm9195_vm5 = vcmp.eq.s32.totalorder %v7836_v9, %v6463_v45  ;;  %v5193_v6 = vld [vmem:[%s5695_s6 + $0xf0] sm:$0xff] }
 0x2b7   : > { %v2605_v37 = vpop.f32.mrb[142].mxu0  ;;  %v3118_v2 = vpop.f32.mrb[142].mxu1 }
 0x2b8   : > { %v2816_v17 = vsel %vm9194_vm2, %v2605_v37, 0.0  ;;  %v3329_v47 = vsel %vm9193_vm3, %v3118_v2, 0.0  ;;  %v2607_v15 = vpop.f32.mrb[143].mxu0  ;;  %v3120_v16 = vpop.f32.mrb[143].mxu1  ;;  %4900 = vmatmul.mubr.msk.f32.gmra.mrb[248].mxu0 %vm333_vm9, %v5191_v13  ;;  %4940 = vmatmul.mubr.msk.f32.gmra.mrb[248].mxu1 %vm333_vm9, %v5191_v13  ;;  %vm9198_vm3 = vcmp.eq.s32.totalorder %v7825_v46, %v6470_v31  ;;  %vm9197_vm2 = vcmp.eq.s32.totalorder %v7832_v10, %v6470_v31 }
 0x2b9   : > { %v2840_v18 = vadd.f32 %v2839_v52, %v2816_v17  ;;  %v3353_v59 = vadd.f32 %v3352_v62, %v3329_v47  ;;  %v2817_v32 = vsel %vm9196_vm13, %v2607_v15, 0.0  ;;  %v3330_v50 = vsel %vm9195_vm5, %v3120_v16, 0.0  ;;  %3763 = vmatprep.mubr.f32.mxu0 %v9294_v33  ;;  %4276 = vmatprep.mubr.f32.mxu1 %v9294_v33 }
 0x2ba   : > { %v2861_v27 = vadd.f32 %v2860_v63, %v2817_v32  ;;  %v3374_v57 = vadd.f32 %v3373_v14, %v3330_v50  ;;  %vm9200_vm5 = vcmp.eq.s32.totalorder %v7829_v54, %v6470_v31  ;;  %vm9199_vm13 = vcmp.eq.s32.totalorder %v7836_v9, %v6470_v31 }
 0x2bb   : > { %v2611_v28 = vpop.f32.mrb[144].mxu0  ;;  %v3124_v0 = vpop.f32.mrb[144].mxu1 }
 0x2bc   : > { %v2818_v19 = vsel %vm9198_vm3, %v2611_v28, 0.0  ;;  %v3331_v53 = vsel %vm9197_vm2, %v3124_v0, 0.0  ;;  %v2613_v5 = vpop.f32.mrb[145].mxu0  ;;  %v3126_v40 = vpop.f32.mrb[145].mxu1  ;;  %4901 = vmatmul.mubr.msk.f32.gmra.mrb[250].mxu0 %vm333_vm9, %v5192_v42  ;;  %4941 = vmatmul.mubr.msk.f32.gmra.mrb[250].mxu1 %vm333_vm9, %v5192_v42  ;;  %vm9202_vm2 = vcmp.eq.s32.totalorder %v7825_v46, %v6473_v12  ;;  %vm9201_vm3 = vcmp.eq.s32.totalorder %v7832_v10, %v6473_v12 }
 0x2bd   : > { %v2841_v30 = vadd.f32 %v2840_v18, %v2818_v19  ;;  %v3354_v34 = vadd.f32 %v3353_v59, %v3331_v53  ;;  %v2819_v20 = vsel %vm9200_vm5, %v2613_v5, 0.0  ;;  %v3332_v38 = vsel %vm9199_vm13, %v3126_v40, 0.0  ;;  %3769 = vmatprep.mubr.f32.mxu0 %v9294_v33  ;;  %4282 = vmatprep.mubr.f32.mxu1 %v9294_v33  ;;  %v5194_v59 = vld [vmem:[%s5695_s6 + $0xf8] sm:$0xff] }
 0x2be   : > { %v2862_v29 = vadd.f32 %v2861_v27, %v2819_v20  ;;  %v3375_v35 = vadd.f32 %v3374_v57, %v3332_v38  ;;  %vm9204_vm13 = vcmp.eq.s32.totalorder %v7829_v54, %v6473_v12  ;;  %vm9203_vm5 = vcmp.eq.s32.totalorder %v7836_v9, %v6473_v12 }
 0x2bf   : > { %v2617_v51 = vpop.f32.mrb[146].mxu0  ;;  %v3130_v39 = vpop.f32.mrb[146].mxu1 }
 0x2c0   : > { %v2820_v4 = vsel %vm9202_vm2, %v2617_v51, 0.0  ;;  %v3333_v60 = vsel %vm9201_vm3, %v3130_v39, 0.0  ;;  %v2619_v52 = vpop.f32.mrb[147].mxu0  ;;  %v3132_v62 = vpop.f32.mrb[147].mxu1  ;;  %4902 = vmatmul.mubr.msk.f32.gmra.mrb[252].mxu0 %vm333_vm9, %v5193_v6  ;;  %4942 = vmatmul.mubr.msk.f32.gmra.mrb[252].mxu1 %vm333_vm9, %v5193_v6  ;;  %vm2790_vm3 = vcmp.eq.s32.totalorder %v7825_v46, %v6498_v48  ;;  %vm9205_vm2 = vcmp.eq.s32.totalorder %v7832_v10, %v6498_v48 }
 0x2c1   : > { %v2842_v3 = vadd.f32 %v2841_v30, %v2820_v4  ;;  %v3355_v63 = vadd.f32 %v3354_v34, %v3333_v60  ;;  %v2821_v14 = vsel %vm9204_vm13, %v2619_v52, 0.0  ;;  %v3334_v37 = vsel %vm9203_vm5, %v3132_v62, 0.0  ;;  %3775 = vmatprep.mubr.f32.mxu0 %v9294_v33  ;;  %4288 = vmatprep.mubr.f32.mxu1 %v9294_v33 }
 0x2c2   : > { %v2863_v2 = vadd.f32 %v2862_v29, %v2821_v14  ;;  %v3376_v17 = vadd.f32 %v3375_v35, %v3334_v37  ;;  %vm9207_vm5 = vcmp.eq.s32.totalorder %v7829_v54, %v6498_v48  ;;  %vm9206_vm13 = vcmp.eq.s32.totalorder %v7836_v9, %v6498_v48 }
 0x2c3   : > { %v2623_v47 = vpop.f32.mrb[148].mxu0  ;;  %v3136_v15 = vpop.f32.mrb[148].mxu1 }
 0x2c4   : > { %v2822_v16 = vsel %vm2790_vm3, %v2623_v47, 0.0  ;;  %v3335_v13 = vsel %vm9205_vm2, %v3136_v15, 0.0  ;;  %v2625_v18 = vpop.f32.mrb[149].mxu0  ;;  %v3138_v33 = vpop.f32.mrb[149].mxu1  ;;  %4903 = vmatmul.mubr.msk.f32.gmra.mrb[254].mxu0 %vm333_vm9, %v5194_v59  ;;  %4943 = vmatmul.mubr.msk.f32.gmra.mrb[254].mxu1 %vm333_vm9, %v5194_v59  ;;  %vm9209_vm2 = vcmp.eq.s32.totalorder %v7825_v46, %v6501_v44  ;;  %vm9208_vm9 = vcmp.eq.s32.totalorder %v7832_v10, %v6501_v44 }
 0x2c5   : > { %v2843_v32 = vadd.f32 %v2842_v3, %v2822_v16  ;;  %v3356_v50 = vadd.f32 %v3355_v63, %v3335_v13  ;;  %v2823_v27 = vsel %vm9207_vm5, %v2625_v18, 0.0  ;;  %v3336_v57 = vsel %vm9206_vm13, %v3138_v33, 0.0 }
 0x2c6   : > { %v2864_v28 = vadd.f32 %v2863_v2, %v2823_v27  ;;  %v3377_v0 = vadd.f32 %v3376_v17, %v3336_v57  ;;  %vm9211_vm13 = vcmp.eq.s32.totalorder %v7829_v54, %v6501_v44  ;;  %vm9210_vm5 = vcmp.eq.s32.totalorder %v7836_v9, %v6501_v44 }
 0x2c7   : > { %v2629_v19 = vpop.f32.mrb[150].mxu0  ;;  %v3142_v53 = vpop.f32.mrb[150].mxu1 }
 0x2c8   : > { %v2824_v5 = vsel %vm9209_vm2, %v2629_v19, 0.0  ;;  %v3337_v40 = vsel %vm9208_vm9, %v3142_v53, 0.0  ;;  %v2631_v42 = vpop.f32.mrb[151].mxu0  ;;  %v3144_v30 = vpop.f32.mrb[151].mxu1  ;;  %vm9213_vm9 = vcmp.eq.s32.totalorder %v7825_v46, %v6510_v11  ;;  %vm9212_vm2 = vcmp.eq.s32.totalorder %v7832_v10, %v6510_v11 }
 0x2c9   : > { %v2844_v34 = vadd.f32 %v2843_v32, %v2824_v5  ;;  %v3357_v20 = vadd.f32 %v3356_v50, %v3337_v40  ;;  %v2825_v38 = vsel %vm9211_vm13, %v2631_v42, 0.0  ;;  %v3338_v29 = vsel %vm9210_vm5, %v3144_v30, 0.0 }
 0x2ca   : > { %v2865_v35 = vadd.f32 %v2864_v28, %v2825_v38  ;;  %v3378_v51 = vadd.f32 %v3377_v0, %v3338_v29  ;;  %vm9215_vm5 = vcmp.eq.s32.totalorder %v7829_v54, %v6510_v11  ;;  %vm9214_vm13 = vcmp.eq.s32.totalorder %v7836_v9, %v6510_v11 }
 0x2cb   : > { %v2635_v39 = vpop.f32.mrb[152].mxu0  ;;  %v3148_v4 = vpop.f32.mrb[152].mxu1 }
 0x2cc   : > { %v2826_v60 = vsel %vm9213_vm9, %v2635_v39, 0.0  ;;  %v3339_v52 = vsel %vm9212_vm2, %v3148_v4, 0.0  ;;  %v2637_v62 = vpop.f32.mrb[153].mxu0  ;;  %v3150_v6 = vpop.f32.mrb[153].mxu1  ;;  %vm9217_vm2 = vcmp.eq.s32.totalorder %v7825_v46, %v6762_v58  ;;  %vm9216_vm9 = vcmp.eq.s32.totalorder %v7832_v10, %v6762_v58 }
 0x2cd   : > { %v2845_v3 = vadd.f32 %v2844_v34, %v2826_v60  ;;  %v3358_v63 = vadd.f32 %v3357_v20, %v3339_v52  ;;  %v2827_v14 = vsel %vm9215_vm5, %v2637_v62, 0.0  ;;  %v3340_v37 = vsel %vm9214_vm13, %v3150_v6, 0.0 }
 0x2ce   : > { %v2866_v2 = vadd.f32 %v2865_v35, %v2827_v14  ;;  %v3379_v17 = vadd.f32 %v3378_v51, %v3340_v37  ;;  %vm9219_vm13 = vcmp.eq.s32.totalorder %v7829_v54, %v6762_v58  ;;  %vm9218_vm5 = vcmp.eq.s32.totalorder %v7836_v9, %v6762_v58 }
 0x2cf   : > { %v2641_v47 = vpop.f32.mrb[154].mxu0  ;;  %v3154_v15 = vpop.f32.mrb[154].mxu1 }
 0x2d0   : > { %v2828_v16 = vsel %vm9217_vm2, %v2641_v47, 0.0  ;;  %v3341_v13 = vsel %vm9216_vm9, %v3154_v15, 0.0  ;;  %v2643_v18 = vpop.f32.mrb[155].mxu0  ;;  %v3156_v33 = vpop.f32.mrb[155].mxu1  ;;  %vm9221_vm9 = vcmp.eq.s32.totalorder %v7825_v46, %v6798_v49  ;;  %vm9220_vm2 = vcmp.eq.s32.totalorder %v7832_v10, %v6798_v49 }
 0x2d1   : > { %v2846_v59 = vadd.f32 %v2845_v3, %v2828_v16  ;;  %v3359_v32 = vadd.f32 %v3358_v63, %v3341_v13  ;;  %v2829_v50 = vsel %vm9219_vm13, %v2643_v18, 0.0  ;;  %v3342_v27 = vsel %vm9218_vm5, %v3156_v33, 0.0 }
 0x2d2   : > { %v2867_v57 = vadd.f32 %v2866_v2, %v2829_v50  ;;  %v3380_v28 = vadd.f32 %v3379_v17, %v3342_v27  ;;  %vm9223_vm5 = vcmp.eq.s32.totalorder %v7829_v54, %v6798_v49  ;;  %vm9222_vm13 = vcmp.eq.s32.totalorder %v7836_v9, %v6798_v49 }
 0x2d3   : > { %v2647_v0 = vpop.f32.mrb[156].mxu0  ;;  %v3160_v19 = vpop.f32.mrb[156].mxu1 }
 0x2d4   : > { %v2830_v53 = vsel %vm9221_vm9, %v2647_v0, 0.0  ;;  %v3343_v5 = vsel %vm9220_vm2, %v3160_v19, 0.0  ;;  %v2649_v40 = vpop.f32.mrb[157].mxu0  ;;  %v3162_v42 = vpop.f32.mrb[157].mxu1  ;;  %vm2800_vm2 = vcmp.eq.s32.totalorder %v7825_v46, %v6826_v25  ;;  %vm3313_vm9 = vcmp.eq.s32.totalorder %v7832_v10, %v6826_v25 }
 0x2d5   : > { %v2847_v30 = vadd.f32 %v2846_v59, %v2830_v53  ;;  %v3360_v34 = vadd.f32 %v3359_v32, %v3343_v5  ;;  %v2831_v20 = vsel %vm9223_vm5, %v2649_v40, 0.0  ;;  %v3344_v38 = vsel %vm9222_vm13, %v3162_v42, 0.0 }
 0x2d6   : > { %v2868_v29 = vadd.f32 %v2867_v57, %v2831_v20  ;;  %v3381_v35 = vadd.f32 %v3380_v28, %v3344_v38  ;;  %vm2801_vm13 = vcmp.eq.s32.totalorder %v7829_v54, %v6826_v25  ;;  %vm3314_vm5 = vcmp.eq.s32.totalorder %v7836_v9, %v6826_v25 }
 0x2d7   : > { %v2653_v51 = vpop.f32.mrb[158].mxu0  ;;  %v3166_v39 = vpop.f32.mrb[158].mxu1 }
 0x2d8   : > { %v2832_v4 = vsel %vm2800_vm2, %v2653_v51, 0.0  ;;  %v3345_v60 = vsel %vm3313_vm9, %v3166_v39, 0.0  ;;  %v2655_v52 = vpop.f32.mrb[159].mxu0  ;;  %v3168_v62 = vpop.f32.mrb[159].mxu1 }
 0x2d9   : > { %v2848_v6 = vadd.f32 %v2847_v30, %v2832_v4  ;;  %v3361_v3 = vadd.f32 %v3360_v34, %v3345_v60  ;;  %v2833_v63 = vsel %vm2801_vm13, %v2655_v52, 0.0  ;;  %v3346_v14 = vsel %vm3314_vm5, %v3168_v62, 0.0 }
 0x2da   : > { %v2869_v37 = vadd.f32 %v2868_v29, %v2833_v63  ;;  %v3382_v2 = vadd.f32 %v3381_v35, %v3346_v14 }
 0x2db   : > { %v2849_v17 = vrot.slane %v2848_v6, 4  ;;  %v3362_v47 = vrot.slane %v3361_v3, 4  ;;  %v2659_v15 = vpop.f32.mrb[160].mxu0  ;;  %v3172_v16 = vpop.f32.mrb[160].mxu1 }
 0x2dc   : > { %v2870_v13 = vrot.slane %v2869_v37, 4  ;;  %v3383_v18 = vrot.slane %v3382_v2, 4  ;;  %v2878_v33 = vsel %vm2770_vm10, %v2659_v15, 0.0  ;;  %v3391_v59 = vsel %vm3283_vm8, %v3172_v16, 0.0  ;;  %v2661_v32 = vpop.f32.mrb[161].mxu0  ;;  %v3174_v50 = vpop.f32.mrb[161].mxu1 }
 0x2dd   : > { %v2850_v27 = vadd.f32 %v2849_v17, %v2848_v6  ;;  %v3363_v57 = vadd.f32 %v3362_v47, %v3361_v3  ;;  %v2879_v28 = vsel %vm2771_vm1, %v2661_v32, 0.0  ;;  %v3392_v0 = vsel %vm3284_vm12, %v3174_v50, 0.0 }
 0x2de   : > { %v2871_v19 = vadd.f32 %v2870_v13, %v2869_v37  ;;  %v3384_v53 = vadd.f32 %v3383_v18, %v3382_v2  ;;  %vm9415_vm10 = vcmp.eq.s32.totalorder %v7832_v10, %v5520_v22  ;;  %vm9416_vm8 = vcmp.eq.s32.totalorder %v7825_v46, %v5532_v26 }
 0x2df   : > { %v2851_v5 = vrot.slane %v2850_v27, 2  ;;  %v3364_v40 = vrot.slane %v3363_v57, 2  ;;  %v2665_v42 = vpop.f32.mrb[162].mxu0  ;;  %v3178_v30 = vpop.f32.mrb[162].mxu1  ;;  %vm9417_vm1 = vcmp.eq.s32.totalorder %v7832_v10, %v5532_v26  ;;  %vm9418_vm12 = vcmp.eq.s32.totalorder %v7829_v54, %v5532_v26 }
 0x2e0   : > { %v2872_v34 = vrot.slane %v2871_v19, 2  ;;  %v3385_v20 = vrot.slane %v3384_v53, 2  ;;  %v2880_v38 = vsel %vm2772_vm4, %v2665_v42, 0.0  ;;  %v3393_v29 = vsel %vm3285_vm0, %v3178_v30, 0.0  ;;  %v2667_v35 = vpop.f32.mrb[163].mxu0  ;;  %v3180_v51 = vpop.f32.mrb[163].mxu1 }
 0x2e1   : > { %v2852_v39 = vadd.f32 %v2851_v5, %v2850_v27  ;;  %v3365_v4 = vadd.f32 %v3364_v40, %v3363_v57  ;;  %v2910_v60 = vadd.f32 %v2880_v38, %v2878_v33  ;;  %v3423_v52 = vadd.f32 %v3393_v29, %v3391_v59 }
 0x2e2   : > { %v2873_v62 = vadd.f32 %v2872_v34, %v2871_v19  ;;  %v3386_v6 = vadd.f32 %v3385_v20, %v3384_v53  ;;  %v2881_v3 = vsel %vm2773_vm11, %v2667_v35, 0.0  ;;  %v3394_v63 = vsel %vm3286_vm6, %v3180_v51, 0.0 }
 0x2e3   : > { %v2853_v14 = vrot.slane %v2852_v39, 1  ;;  %v3366_v37 = vrot.slane %v3365_v4, 1  ;;  %v2931_v2 = vadd.f32 %v2881_v3, %v2879_v28  ;;  %v3444_v17 = vadd.f32 %v3394_v63, %v3392_v0  ;;  %v2671_v47 = vpop.f32.mrb[164].mxu0  ;;  %v3184_v15 = vpop.f32.mrb[164].mxu1 }
 0x2e4   : > { %v2874_v16 = vrot.slane %v2873_v62, 1  ;;  %v3387_v13 = vrot.slane %v3386_v6, 1  ;;  %v2882_v18 = vsel %vm2774_vm14, %v2671_v47, 0.0  ;;  %v3395_v33 = vsel %vm9415_vm10, %v3184_v15, 0.0  ;;  %v2673_v59 = vpop.f32.mrb[165].mxu0  ;;  %v3186_v32 = vpop.f32.mrb[165].mxu1 }
 0x2e5   : > { %v2854_v50 = vadd.f32 %v2853_v14, %v2852_v39  ;;  %v2911_v27 = vadd.f32 %v2910_v60, %v2882_v18  ;;  %v3424_v57 = vadd.f32 %v3423_v52, %v3395_v33  ;;  %v2883_v28 = vsel %vm2775_vm7, %v2673_v59, 0.0 }
 0x2e6   : > { %v2875_v19 = vadd.f32 %v2874_v16, %v2873_v62  ;;  %v3396_v0 = vsel %vm3288_vm15, %v3186_v32, 0.0  ;;  %v3367_v5 = vadd.f32 %v3366_v37, %v3365_v4  ;;  %v2932_v40 = vadd.f32 %v2931_v2, %v2883_v28 }
 0x2e7   : > { %v2876_v53 = vadd.f32 %v2854_v50, %v7636_v61  ;;  %v3445_v42 = vadd.f32 %v3444_v17, %v3396_v0  ;;  %v2677_v30 = vpop.f32.mrb[166].mxu0  ;;  %v3190_v34 = vpop.f32.mrb[166].mxu1  ;;  %v3388_v38 = vadd.f32 %v3387_v13, %v3386_v6  ;;  %vm9419_vm4 = vcmp.eq.s32.totalorder %v7836_v9, %v5532_v26 }
 0x2e8   : > { %v2877_v20 = vadd.f32 %v2875_v19, %v7643_v8  ;;  %v2884_v29 = vsel %vm9416_vm8, %v2677_v30, 0.0  ;;  %v3397_v35 = vsel %vm9417_vm1, %v3190_v34, 0.0  ;;  %v2679_v51 = vpop.f32.mrb[167].mxu0  ;;  %v3192_v39 = vpop.f32.mrb[167].mxu1  ;;  %vm9420_vm0 = vcmp.eq.s32.totalorder %v7825_v46, %v6406_v43 }
 0x2e9   : > { %v8295_v60 = vadd.f32 %v3367_v5, %v2876_v53  ;;  %v2912_v61 = vadd.f32 %v2911_v27, %v2884_v29  ;;  %v3425_v4 = vadd.f32 %v3424_v57, %v3397_v35  ;;  %v2885_v52 = vsel %vm9418_vm12, %v2679_v51, 0.0 }
 0x2ea   : > { %v8300_v8 = vadd.f32 %v3388_v38, %v2877_v20  ;;  %v2933_v62 = vadd.f32 %v2932_v40, %v2885_v52  ;;  %v3398_v6 = vsel %vm9419_vm4, %v3192_v39, 0.0  ;;  %vm9421_vm11 = vcmp.eq.s32.totalorder %v7832_v10, %v6406_v43 }
 0x2eb   : > { %v3446_v3 = vadd.f32 %v3445_v42, %v3398_v6  ;;  %v2683_v63 = vpop.f32.mrb[168].mxu0  ;;  %v3196_v14 = vpop.f32.mrb[168].mxu1  ;;  %vm9422_vm6 = vcmp.eq.s32.totalorder %v7829_v54, %v6406_v43  ;;  %vm9423_vm14 = vcmp.eq.s32.totalorder %v7836_v9, %v6406_v43  ;;  %vm9424_vm7 = vcmp.eq.s32.totalorder %v7825_v46, %v6435_v24 }
 0x2ec   : > { %v2886_v37 = vsel %vm9420_vm0, %v2683_v63, 0.0  ;;  %v3399_v2 = vsel %vm9421_vm11, %v3196_v14, 0.0  ;;  %v2685_v17 = vpop.f32.mrb[169].mxu0  ;;  %v3198_v47 = vpop.f32.mrb[169].mxu1  ;;  %vm9425_vm15 = vcmp.eq.s32.totalorder %v7832_v10, %v6435_v24  ;;  %vm9426_vm10 = vcmp.eq.s32.totalorder %v7829_v54, %v6435_v24 }
 0x2ed   : > { %v2913_v15 = vadd.f32 %v2912_v61, %v2886_v37  ;;  %v3426_v16 = vadd.f32 %v3425_v4, %v3399_v2  ;;  %v2887_v13 = vsel %vm9422_vm6, %v2685_v17, 0.0  ;;  %v3400_v18 = vsel %vm9423_vm14, %v3198_v47, 0.0 }
 0x2ee   : > { %v2934_v33 = vadd.f32 %v2933_v62, %v2887_v13  ;;  %v3447_v59 = vadd.f32 %v3446_v3, %v3400_v18  ;;  %vm9427_vm8 = vcmp.eq.s32.totalorder %v7836_v9, %v6435_v24  ;;  %vm9428_vm1 = vcmp.eq.s32.totalorder %v7825_v46, %v6460_v1 }
 0x2ef   : > { %v2689_v32 = vpop.f32.mrb[170].mxu0  ;;  %v3202_v50 = vpop.f32.mrb[170].mxu1  ;;  %vm9429_vm12 = vcmp.eq.s32.totalorder %v7832_v10, %v6460_v1  ;;  %vm9430_vm4 = vcmp.eq.s32.totalorder %v7829_v54, %v6460_v1  ;;  %vm9431_vm0 = vcmp.eq.s32.totalorder %v7836_v9, %v6460_v1  ;;  %vm9432_vm11 = vcmp.eq.s32.totalorder %v7825_v46, %v6463_v45 }
 0x2f0   : > { %v2888_v27 = vsel %vm9424_vm7, %v2689_v32, 0.0  ;;  %v3401_v57 = vsel %vm9425_vm15, %v3202_v50, 0.0  ;;  %v2691_v19 = vpop.f32.mrb[171].mxu0  ;;  %v3204_v28 = vpop.f32.mrb[171].mxu1  ;;  %vm9433_vm6 = vcmp.eq.s32.totalorder %v7832_v10, %v6463_v45  ;;  %vm9434_vm14 = vcmp.eq.s32.totalorder %v7829_v54, %v6463_v45 }
 0x2f1   : > { %v2914_v0 = vadd.f32 %v2913_v15, %v2888_v27  ;;  %v3427_v53 = vadd.f32 %v3426_v16, %v3401_v57  ;;  %v2889_v5 = vsel %vm9426_vm10, %v2691_v19, 0.0  ;;  %v3402_v40 = vsel %vm9427_vm8, %v3204_v28, 0.0 }
 0x2f2   : > { %v2935_v42 = vadd.f32 %v2934_v33, %v2889_v5  ;;  %v3448_v30 = vadd.f32 %v3447_v59, %v3402_v40  ;;  %vm9435_vm7 = vcmp.eq.s32.totalorder %v7836_v9, %v6463_v45  ;;  %vm9436_vm15 = vcmp.eq.s32.totalorder %v7825_v46, %v6470_v31 }
 0x2f3   : > { %v2695_v34 = vpop.f32.mrb[172].mxu0  ;;  %v3208_v20 = vpop.f32.mrb[172].mxu1  ;;  %vm9437_vm10 = vcmp.eq.s32.totalorder %v7832_v10, %v6470_v31  ;;  %vm9438_vm8 = vcmp.eq.s32.totalorder %v7829_v54, %v6470_v31 }
 0x2f4   : > { %v2890_v38 = vsel %vm9428_vm1, %v2695_v34, 0.0  ;;  %v3403_v29 = vsel %vm9429_vm12, %v3208_v20, 0.0  ;;  %v2697_v35 = vpop.f32.mrb[173].mxu0  ;;  %v3210_v51 = vpop.f32.mrb[173].mxu1  ;;  %vm9439_vm1 = vcmp.eq.s32.totalorder %v7836_v9, %v6470_v31  ;;  %vm9440_vm12 = vcmp.eq.s32.totalorder %v7825_v46, %v6473_v12 }
 0x2f5   : > { %v2915_v39 = vadd.f32 %v2914_v0, %v2890_v38  ;;  %v3428_v61 = vadd.f32 %v3427_v53, %v3403_v29  ;;  %v2891_v4 = vsel %vm9430_vm4, %v2697_v35, 0.0  ;;  %v3404_v52 = vsel %vm9431_vm0, %v3210_v51, 0.0 }
 0x2f6   : > { %v2936_v62 = vadd.f32 %v2935_v42, %v2891_v4  ;;  %v3449_v6 = vadd.f32 %v3448_v30, %v3404_v52  ;;  %vm9441_vm4 = vcmp.eq.s32.totalorder %v7832_v10, %v6473_v12  ;;  %vm9442_vm0 = vcmp.eq.s32.totalorder %v7829_v54, %v6473_v12 }
 0x2f7   : > { %v2701_v3 = vpop.f32.mrb[174].mxu0  ;;  %v3214_v63 = vpop.f32.mrb[174].mxu1 }
 0x2f8   : > { %v2892_v14 = vsel %vm9432_vm11, %v2701_v3, 0.0  ;;  %v3405_v37 = vsel %vm9433_vm6, %v3214_v63, 0.0  ;;  %v2703_v2 = vpop.f32.mrb[175].mxu0  ;;  %v3216_v17 = vpop.f32.mrb[175].mxu1  ;;  %vm9443_vm11 = vcmp.eq.s32.totalorder %v7836_v9, %v6473_v12  ;;  %vm9444_vm6 = vcmp.eq.s32.totalorder %v7832_v10, %v6498_v48 }
 0x2f9   : > { %v2916_v47 = vadd.f32 %v2915_v39, %v2892_v14  ;;  %v3429_v15 = vadd.f32 %v3428_v61, %v3405_v37  ;;  %v2893_v16 = vsel %vm9434_vm14, %v2703_v2, 0.0  ;;  %v3406_v13 = vsel %vm9435_vm7, %v3216_v17, 0.0 }
 0x2fa   : > { %v2937_v18 = vadd.f32 %v2936_v62, %v2893_v16  ;;  %v3450_v33 = vadd.f32 %v3449_v6, %v3406_v13  ;;  %vm9445_vm14 = vcmp.eq.s32.totalorder %v7829_v54, %v6498_v48  ;;  %vm9446_vm7 = vcmp.eq.s32.totalorder %v7836_v9, %v6498_v48 }
 0x2fb   : > { %v2707_v59 = vpop.f32.mrb[176].mxu0  ;;  %v3220_v32 = vpop.f32.mrb[176].mxu1 }
 0x2fc   : > { %v2894_v50 = vsel %vm9436_vm15, %v2707_v59, 0.0  ;;  %v3407_v27 = vsel %vm9437_vm10, %v3220_v32, 0.0  ;;  %v2709_v57 = vpop.f32.mrb[177].mxu0  ;;  %v3222_v19 = vpop.f32.mrb[177].mxu1  ;;  %vm9448_vm15 = vcmp.eq.s32.totalorder %v7832_v10, %v6501_v44  ;;  %vm9449_vm10 = vcmp.eq.s32.totalorder %v7829_v54, %v6501_v44 }
 0x2fd   : > { %v2917_v28 = vadd.f32 %v2916_v47, %v2894_v50  ;;  %v3430_v0 = vadd.f32 %v3429_v15, %v3407_v27  ;;  %v2895_v53 = vsel %vm9438_vm8, %v2709_v57, 0.0  ;;  %v3408_v5 = vsel %vm9439_vm1, %v3222_v19, 0.0 }
 0x2fe   : > { %v2938_v40 = vadd.f32 %v2937_v18, %v2895_v53  ;;  %v3451_v42 = vadd.f32 %v3450_v33, %v3408_v5  ;;  %vm9450_vm8 = vcmp.eq.s32.totalorder %v7836_v9, %v6501_v44  ;;  %vm9451_vm1 = vcmp.eq.s32.totalorder %v7825_v46, %v6510_v11 }
 0x2ff   : > { %v2713_v30 = vpop.f32.mrb[178].mxu0  ;;  %v3226_v34 = vpop.f32.mrb[178].mxu1 }
 0x300   : > { %v2896_v20 = vsel %vm9440_vm12, %v2713_v30, 0.0  ;;  %v3409_v38 = vsel %vm9441_vm4, %v3226_v34, 0.0  ;;  %v2715_v29 = vpop.f32.mrb[179].mxu0  ;;  %v3228_v35 = vpop.f32.mrb[179].mxu1  ;;  %vm9452_vm12 = vcmp.eq.s32.totalorder %v7832_v10, %v6510_v11  ;;  %vm9453_vm4 = vcmp.eq.s32.totalorder %v7829_v54, %v6510_v11 }
 0x301   : > { %v2918_v51 = vadd.f32 %v2917_v28, %v2896_v20  ;;  %v3431_v39 = vadd.f32 %v3430_v0, %v3409_v38  ;;  %v2897_v61 = vsel %vm9442_vm0, %v2715_v29, 0.0  ;;  %v3410_v4 = vsel %vm9443_vm11, %v3228_v35, 0.0 }
 0x302   : > { %v2939_v52 = vadd.f32 %v2938_v40, %v2897_v61  ;;  %v3452_v62 = vadd.f32 %v3451_v42, %v3410_v4  ;;  %vm9454_vm0 = vcmp.eq.s32.totalorder %v7836_v9, %v6510_v11  ;;  %vm9457_vm11 = vcmp.eq.s32.totalorder %v7825_v46, %v6762_v58 }
 0x303   : > { %v2719_v6 = vpop.f32.mrb[180].mxu0  ;;  %v3232_v3 = vpop.f32.mrb[180].mxu1 }
 0x304   : > { %v2898_v63 = vsel %vm2790_vm3, %v2719_v6, 0.0  ;;  %v3411_v14 = vsel %vm9444_vm6, %v3232_v3, 0.0  ;;  %v2721_v37 = vpop.f32.mrb[181].mxu0  ;;  %v3234_v2 = vpop.f32.mrb[181].mxu1  ;;  %vm9447_vm3 = vcmp.eq.s32.totalorder %v7825_v46, %v6501_v44  ;;  %v9456_v3 = vand.u32 127, %v5459_v56 }
 0x305   : > { %v2919_v17 = vadd.f32 %v2918_v51, %v2898_v63  ;;  %v3432_v47 = vadd.f32 %v3431_v39, %v3411_v14  ;;  %v2899_v15 = vsel %vm9445_vm14, %v2721_v37, 0.0  ;;  %v3412_v16 = vsel %vm9446_vm7, %v3234_v2, 0.0 }
 0x306   : > { %v2940_v13 = vadd.f32 %v2939_v52, %v2899_v15  ;;  %v3453_v18 = vadd.f32 %v3452_v62, %v3412_v16  ;;  %v9455_v62 = vand.u32 127, %v5457_v55  ;;  %v4298_v63 = vrot.slane %v9456_v3, %v5493_v7 }
 0x307   : > { %v2725_v33 = vpop.f32.mrb[182].mxu0  ;;  %v3238_v59 = vpop.f32.mrb[182].mxu1  ;;  %vm9458_vm6 = vcmp.eq.s32.totalorder %v7832_v10, %v6762_v58  ;;  %vm9459_vm14 = vcmp.eq.s32.totalorder %v7829_v54, %v6762_v58  ;;  %vm9460_vm7 = vcmp.eq.s32.totalorder %v7836_v9, %v6762_v58 }
 0x308   : > { %v2900_v32 = vsel %vm9447_vm3, %v2725_v33, 0.0  ;;  %v3413_v50 = vsel %vm9448_vm15, %v3238_v59, 0.0  ;;  %v2727_v27 = vpop.f32.mrb[183].mxu0  ;;  %v3240_v57 = vpop.f32.mrb[183].mxu1  ;;  %v3785_v6 = vrot.slane %v9455_v62, %v5493_v7  ;;  %vm9463_vm3 = vcmp.eq.s32.totalorder %v7825_v46, %v6798_v49 }
 0x309   : > { %v2920_v19 = vadd.f32 %v2919_v17, %v2900_v32  ;;  %v3433_v28 = vadd.f32 %v3432_v47, %v3413_v50  ;;  %v2901_v0 = vsel %vm9449_vm10, %v2727_v27, 0.0  ;;  %v3414_v53 = vsel %vm9450_vm8, %v3240_v57, 0.0  ;;  %v9461_v32 = vld [vmem:[#allocation13_spill] sm:$0xff]  ;;  %v9462_v57 = vld [vmem:[#allocation14_spill] sm:$0xff] }
 0x30a   : > { %v2941_v5 = vadd.f32 %v2940_v13, %v2901_v0  ;;  %v3454_v40 = vadd.f32 %v3453_v18, %v3414_v53  ;;  %v8432_v59 = vrot.slane %v3785_v6, %v5493_v7  ;;  %v8436_v50 = vrot.slane %v9461_v32, %v5493_v7 }
 0x30b   : > { %v2731_v42 = vpop.f32.mrb[184].mxu0  ;;  %v3244_v30 = vpop.f32.mrb[184].mxu1  ;;  %v8439_v27 = vrot.slane %v4298_v63, %v5493_v7  ;;  %vm9464_vm15 = vcmp.eq.s32.totalorder %v7832_v10, %v6798_v49  ;;  %vm9465_vm10 = vcmp.eq.s32.totalorder %v7829_v54, %v6798_v49  ;;  %vm9466_vm8 = vcmp.eq.s32.totalorder %v7836_v9, %v6798_v49 }
 0x30c   : > { %v2902_v34 = vsel %vm9451_vm1, %v2731_v42, 0.0  ;;  %v3415_v20 = vsel %vm9452_vm12, %v3244_v30, 0.0  ;;  %v2733_v38 = vpop.f32.mrb[185].mxu0  ;;  %v3246_v29 = vpop.f32.mrb[185].mxu1  ;;  %vm3798_vm1 = vcmp.eq.s32.totalorder %v8432_v59, %v5419_v23 }
 0x30d   : > { %v2921_v35 = vadd.f32 %v2920_v19, %v2902_v34  ;;  %v3434_v51 = vadd.f32 %v3433_v28, %v3415_v20  ;;  %v2903_v39 = vsel %vm9453_vm4, %v2733_v38, 0.0  ;;  %v3416_v61 = vsel %vm9454_vm0, %v3246_v29, 0.0 }
 0x30e   : > { %v2942_v4 = vadd.f32 %v2941_v5, %v2903_v39  ;;  %v3455_v52 = vadd.f32 %v3454_v40, %v3416_v61  ;;  %v8443_v19 = vrot.slane %v9462_v57, %v5493_v7  ;;  %vm4311_vm12 = vcmp.eq.s32.totalorder %v8439_v27, %v5419_v23 }
 0x30f   : > { %v2737_v14 = vpop.f32.mrb[186].mxu0  ;;  %v3250_v37 = vpop.f32.mrb[186].mxu1  ;;  %vm3799_vm4 = vcmp.eq.s32.totalorder %v8436_v50, %v5419_v23 }
 0x310   : > { %v2904_v2 = vsel %vm9457_vm11, %v2737_v14, 0.0  ;;  %v3417_v17 = vsel %vm9458_vm6, %v3250_v37, 0.0  ;;  %v2739_v47 = vpop.f32.mrb[187].mxu0  ;;  %v3252_v15 = vpop.f32.mrb[187].mxu1  ;;  %vm4312_vm0 = vcmp.eq.s32.totalorder %v8443_v19, %v5419_v23  ;;  %vm3800_vm11 = vcmp.eq.s32.totalorder %v8432_v59, %v5517_v21 }
 0x311   : > { %v2922_v16 = vadd.f32 %v2921_v35, %v2904_v2  ;;  %v3435_v13 = vadd.f32 %v3434_v51, %v3417_v17  ;;  %v2905_v55 = vsel %vm9459_vm14, %v2739_v47, 0.0  ;;  %v3418_v56 = vsel %vm9460_vm7, %v3252_v15, 0.0 }
 0x312   : > { %v2943_v18 = vadd.f32 %v2942_v4, %v2905_v55  ;;  %v3456_v33 = vadd.f32 %v3455_v52, %v3418_v56  ;;  %vm4313_vm6 = vcmp.eq.s32.totalorder %v8439_v27, %v5517_v21  ;;  %vm3802_vm14 = vcmp.eq.s32.totalorder %v8432_v59, %v5520_v22 }
 0x313   : > { %v2743_v28 = vpop.f32.mrb[188].mxu0  ;;  %v3256_v0 = vpop.f32.mrb[188].mxu1  ;;  %vm4316_vm7 = vcmp.eq.s32.totalorder %v8443_v19, %v5520_v22 }
 0x314   : > { %v2906_v53 = vsel %vm9463_vm3, %v2743_v28, 0.0  ;;  %v3419_v5 = vsel %vm9464_vm15, %v3256_v0, 0.0  ;;  %v2745_v40 = vpop.f32.mrb[189].mxu0  ;;  %v3258_v42 = vpop.f32.mrb[189].mxu1  ;;  %vm9225_vm3 = vcmp.eq.s32.totalorder %v8432_v59, %v5532_v26  ;;  %vm9224_vm15 = vcmp.eq.s32.totalorder %v8439_v27, %v5532_v26 }
 0x315   : > { %v2923_v30 = vadd.f32 %v2922_v16, %v2906_v53  ;;  %v3436_v34 = vadd.f32 %v3435_v13, %v3419_v5  ;;  %v2907_v20 = vsel %vm9465_vm10, %v2745_v40, 0.0  ;;  %v3420_v7 = vsel %vm9466_vm8, %v3258_v42, 0.0 }
 0x316   : > { %v2944_v38 = vadd.f32 %v2943_v18, %v2907_v20  ;;  %v3457_v29 = vadd.f32 %v3456_v33, %v3420_v7  ;;  %vm9227_vm10 = vcmp.eq.s32.totalorder %v8436_v50, %v5532_v26  ;;  %vm9226_vm8 = vcmp.eq.s32.totalorder %v8443_v19, %v5532_v26 }
 0x317   : > { %v2749_v35 = vpop.f32.mrb[190].mxu0  ;;  %v3262_v51 = vpop.f32.mrb[190].mxu1 }
 0x318   : > { %v2908_v39 = vsel %vm2800_vm2, %v2749_v35, 0.0  ;;  %v3421_v61 = vsel %vm3313_vm9, %v3262_v51, 0.0  ;;  %v2751_v4 = vpop.f32.mrb[191].mxu0  ;;  %v3264_v52 = vpop.f32.mrb[191].mxu1  ;;  %vm3801_vm2 = vcmp.eq.s32.totalorder %v8436_v50, %v5517_v21  ;;  %vm4314_vm9 = vcmp.eq.s32.totalorder %v8443_v19, %v5517_v21 }
 0x319   : > { %v2924_v62 = vadd.f32 %v2923_v30, %v2908_v39  ;;  %v3437_v6 = vadd.f32 %v3436_v34, %v3421_v61  ;;  %v2909_v3 = vsel %vm2801_vm13, %v2751_v4, 0.0  ;;  %v3422_v46 = vsel %vm3314_vm5, %v3264_v52, 0.0 }
 0x31a   : > { %v2945_v10 = vadd.f32 %v2944_v38, %v2909_v3  ;;  %v3458_v63 = vadd.f32 %v3457_v29, %v3422_v46  ;;  %vm4315_vm13 = vcmp.eq.s32.totalorder %v8439_v27, %v5520_v22  ;;  %vm3803_vm5 = vcmp.eq.s32.totalorder %v8436_v50, %v5520_v22 }
 0x31b   : > { %v2925_v14 = vrot.slane %v2924_v62, 4  ;;  %v3438_v37 = vrot.slane %v3437_v6, 4  ;;  %v3591_v2 = vpop.f32.mrb[192].mxu0  ;;  %v4104_v17 = vpop.f32.mrb[192].mxu1 }
 0x31c   : > { %v2946_v54 = vrot.slane %v2945_v10, 4  ;;  %v3459_v9 = vrot.slane %v3458_v63, 4  ;;  %v3830_v47 = vsel %vm3798_vm1, %v3591_v2, 0.0  ;;  %v4343_v15 = vsel %vm4311_vm12, %v4104_v17, 0.0  ;;  %v3593_v16 = vpop.f32.mrb[193].mxu0  ;;  %v4106_v13 = vpop.f32.mrb[193].mxu1 }
 0x31d   : > { %v2926_v55 = vadd.f32 %v2925_v14, %v2924_v62  ;;  %v3439_v56 = vadd.f32 %v3438_v37, %v3437_v6  ;;  %v3831_v18 = vsel %vm3799_vm4, %v3593_v16, 0.0  ;;  %v4344_v33 = vsel %vm4312_vm0, %v4106_v13, 0.0 }
 0x31e   : > { %v2947_v32 = vadd.f32 %v2946_v54, %v2945_v10  ;;  %v3460_v57 = vadd.f32 %v3459_v9, %v3458_v63 }
 0x31f   : > { %v2927_v28 = vrot.slane %v2926_v55, 2  ;;  %v3440_v0 = vrot.slane %v3439_v56, 2  ;;  %v3597_v53 = vpop.f32.mrb[194].mxu0  ;;  %v4110_v5 = vpop.f32.mrb[194].mxu1 }
 0x320   : > { %v2948_v40 = vrot.slane %v2947_v32, 2  ;;  %v3461_v42 = vrot.slane %v3460_v57, 2  ;;  %v3832_v30 = vsel %vm3800_vm11, %v3597_v53, 0.0  ;;  %v4345_v34 = vsel %vm4313_vm6, %v4110_v5, 0.0  ;;  %v3599_v20 = vpop.f32.mrb[195].mxu0  ;;  %v4112_v7 = vpop.f32.mrb[195].mxu1 }
 0x321   : > { %v2928_v38 = vadd.f32 %v2927_v28, %v2926_v55  ;;  %v3441_v29 = vadd.f32 %v3440_v0, %v3439_v56  ;;  %v3862_v35 = vadd.f32 %v3832_v30, %v3830_v47  ;;  %v4375_v51 = vadd.f32 %v4345_v34, %v4343_v15 }
 0x322   : > { %v2949_v39 = vadd.f32 %v2948_v40, %v2947_v32  ;;  %v3462_v61 = vadd.f32 %v3461_v42, %v3460_v57  ;;  %v3833_v4 = vsel %vm3801_vm2, %v3599_v20, 0.0  ;;  %v4346_v52 = vsel %vm4314_vm9, %v4112_v7, 0.0 }
 0x323   : > { %v2929_v62 = vrot.slane %v2928_v38, 1  ;;  %v3442_v6 = vrot.slane %v3441_v29, 1  ;;  %v3883_v3 = vadd.f32 %v3833_v4, %v3831_v18  ;;  %v4396_v46 = vadd.f32 %v4346_v52, %v4344_v33  ;;  %v3603_v10 = vpop.f32.mrb[196].mxu0  ;;  %v4116_v63 = vpop.f32.mrb[196].mxu1 }
 0x324   : > { %v2950_v14 = vrot.slane %v2949_v39, 1  ;;  %v3463_v37 = vrot.slane %v3462_v61, 1  ;;  %v3834_v2 = vsel %vm3802_vm14, %v3603_v10, 0.0  ;;  %v4347_v17 = vsel %vm4315_vm13, %v4116_v63, 0.0  ;;  %v3605_v54 = vpop.f32.mrb[197].mxu0  ;;  %v4118_v9 = vpop.f32.mrb[197].mxu1 }
 0x325   : > { %v2930_v47 = vadd.f32 %v2929_v62, %v2928_v38  ;;  %v3863_v15 = vadd.f32 %v3862_v35, %v3834_v2  ;;  %v4376_v16 = vadd.f32 %v4375_v51, %v4347_v17  ;;  %v3835_v55 = vsel %vm3803_vm5, %v3605_v54, 0.0 }
 0x326   : > { %v2951_v13 = vadd.f32 %v2950_v14, %v2949_v39  ;;  %v4348_v56 = vsel %vm4316_vm7, %v4118_v9, 0.0  ;;  %v3443_v33 = vadd.f32 %v3442_v6, %v3441_v29  ;;  %v3884_v32 = vadd.f32 %v3883_v3, %v3835_v55 }
 0x327   : > { %v2952_v18 = vadd.f32 %v2930_v47, %v7966_v41  ;;  %v4397_v57 = vadd.f32 %v4396_v46, %v4348_v56  ;;  %v3609_v28 = vpop.f32.mrb[198].mxu0  ;;  %v4122_v0 = vpop.f32.mrb[198].mxu1  ;;  %v3464_v5 = vadd.f32 %v3463_v37, %v3462_v61 }
 0x328   : > { %v2953_v53 = vadd.f32 %v2951_v13, %v7973_v36  ;;  %v3836_v40 = vsel %vm9225_vm3, %v3609_v28, 0.0  ;;  %v4349_v42 = vsel %vm9224_vm15, %v4122_v0, 0.0  ;;  %v3611_v30 = vpop.f32.mrb[199].mxu0  ;;  %v4124_v34 = vpop.f32.mrb[199].mxu1  ;;  %vm9229_vm15 = vcmp.eq.s32.totalorder %v8432_v59, %v6406_v43 }
 0x329   : > { %v8545_v20 = vadd.f32 %v3443_v33, %v2952_v18  ;;  %v3864_v41 = vadd.f32 %v3863_v15, %v3836_v40  ;;  %v4377_v7 = vadd.f32 %v4376_v16, %v4349_v42  ;;  %v3837_v38 = vsel %vm9227_vm10, %v3611_v30, 0.0 }
 0x32a   : > { %v8550_v36 = vadd.f32 %v3464_v5, %v2953_v53  ;;  %v3885_v29 = vadd.f32 %v3884_v32, %v3837_v38  ;;  %v4350_v35 = vsel %vm9226_vm8, %v4124_v34, 0.0  ;;  %vm9228_vm3 = vcmp.eq.s32.totalorder %v8439_v27, %v6406_v43 }
 0x32b   : > { %v4398_v51 = vadd.f32 %v4397_v57, %v4350_v35  ;;  %v3615_v39 = vpop.f32.mrb[200].mxu0  ;;  %v4128_v61 = vpop.f32.mrb[200].mxu1  ;;  %vm9231_vm8 = vcmp.eq.s32.totalorder %v8436_v50, %v6406_v43  ;;  %vm9230_vm10 = vcmp.eq.s32.totalorder %v8443_v19, %v6406_v43 }
 0x32c   : > { %v3838_v4 = vsel %vm9229_vm15, %v3615_v39, 0.0  ;;  %v4351_v52 = vsel %vm9228_vm3, %v4128_v61, 0.0  ;;  %v3617_v62 = vpop.f32.mrb[201].mxu0  ;;  %v4130_v6 = vpop.f32.mrb[201].mxu1  ;;  %vm9233_vm3 = vcmp.eq.s32.totalorder %v8432_v59, %v6435_v24  ;;  %vm9232_vm15 = vcmp.eq.s32.totalorder %v8439_v27, %v6435_v24 }
 0x32d   : > { %v3865_v3 = vadd.f32 %v3864_v41, %v3838_v4  ;;  %v4378_v46 = vadd.f32 %v4377_v7, %v4351_v52  ;;  %v3839_v10 = vsel %vm9231_vm8, %v3617_v62, 0.0  ;;  %v4352_v63 = vsel %vm9230_vm10, %v4130_v6, 0.0 }
 0x32e   : > { %v3886_v14 = vadd.f32 %v3885_v29, %v3839_v10  ;;  %v4399_v37 = vadd.f32 %v4398_v51, %v4352_v63  ;;  %vm9235_vm10 = vcmp.eq.s32.totalorder %v8436_v50, %v6435_v24  ;;  %vm9234_vm8 = vcmp.eq.s32.totalorder %v8443_v19, %v6435_v24 }
 0x32f   : > { %v3621_v2 = vpop.f32.mrb[202].mxu0  ;;  %v4134_v17 = vpop.f32.mrb[202].mxu1 }
 0x330   : > { %v3840_v54 = vsel %vm9233_vm3, %v3621_v2, 0.0  ;;  %v4353_v9 = vsel %vm9232_vm15, %v4134_v17, 0.0  ;;  %v3623_v47 = vpop.f32.mrb[203].mxu0  ;;  %v4136_v15 = vpop.f32.mrb[203].mxu1  ;;  %vm9237_vm15 = vcmp.eq.s32.totalorder %v8432_v59, %v6460_v1  ;;  %vm9236_vm3 = vcmp.eq.s32.totalorder %v8439_v27, %v6460_v1 }
 0x331   : > { %v3866_v16 = vadd.f32 %v3865_v3, %v3840_v54  ;;  %v4379_v13 = vadd.f32 %v4378_v46, %v4353_v9  ;;  %v3841_v55 = vsel %vm9235_vm10, %v3623_v47, 0.0  ;;  %v4354_v56 = vsel %vm9234_vm8, %v4136_v15, 0.0 }
 0x332   : > { %v3887_v18 = vadd.f32 %v3886_v14, %v3841_v55  ;;  %v4400_v33 = vadd.f32 %v4399_v37, %v4354_v56  ;;  %vm9239_vm8 = vcmp.eq.s32.totalorder %v8436_v50, %v6460_v1  ;;  %vm9238_vm10 = vcmp.eq.s32.totalorder %v8443_v19, %v6460_v1 }
 0x333   : > { %v3627_v32 = vpop.f32.mrb[204].mxu0  ;;  %v4140_v57 = vpop.f32.mrb[204].mxu1 }
 0x334   : > { %v3842_v28 = vsel %vm9237_vm15, %v3627_v32, 0.0  ;;  %v4355_v0 = vsel %vm9236_vm3, %v4140_v57, 0.0  ;;  %v3629_v53 = vpop.f32.mrb[205].mxu0  ;;  %v4142_v5 = vpop.f32.mrb[205].mxu1  ;;  %vm9241_vm3 = vcmp.eq.s32.totalorder %v8432_v59, %v6463_v45  ;;  %vm9240_vm15 = vcmp.eq.s32.totalorder %v8439_v27, %v6463_v45 }
 0x335   : > { %v3867_v40 = vadd.f32 %v3866_v16, %v3842_v28  ;;  %v4380_v42 = vadd.f32 %v4379_v13, %v4355_v0  ;;  %v3843_v30 = vsel %vm9239_vm8, %v3629_v53, 0.0  ;;  %v4356_v34 = vsel %vm9238_vm10, %v4142_v5, 0.0 }
 0x336   : > { %v3888_v41 = vadd.f32 %v3887_v18, %v3843_v30  ;;  %v4401_v7 = vadd.f32 %v4400_v33, %v4356_v34  ;;  %vm9243_vm10 = vcmp.eq.s32.totalorder %v8436_v50, %v6463_v45  ;;  %vm9242_vm8 = vcmp.eq.s32.totalorder %v8443_v19, %v6463_v45 }
 0x337   : > { %v3633_v38 = vpop.f32.mrb[206].mxu0  ;;  %v4146_v29 = vpop.f32.mrb[206].mxu1 }
 0x338   : > { %v3844_v35 = vsel %vm9241_vm3, %v3633_v38, 0.0  ;;  %v4357_v51 = vsel %vm9240_vm15, %v4146_v29, 0.0  ;;  %v3635_v39 = vpop.f32.mrb[207].mxu0  ;;  %v4148_v61 = vpop.f32.mrb[207].mxu1  ;;  %vm9245_vm15 = vcmp.eq.s32.totalorder %v8432_v59, %v6470_v31  ;;  %vm9244_vm3 = vcmp.eq.s32.totalorder %v8439_v27, %v6470_v31 }
 0x339   : > { %v3868_v4 = vadd.f32 %v3867_v40, %v3844_v35  ;;  %v4381_v52 = vadd.f32 %v4380_v42, %v4357_v51  ;;  %v3845_v62 = vsel %vm9243_vm10, %v3635_v39, 0.0  ;;  %v4358_v6 = vsel %vm9242_vm8, %v4148_v61, 0.0 }
 0x33a   : > { %v3889_v3 = vadd.f32 %v3888_v41, %v3845_v62  ;;  %v4402_v46 = vadd.f32 %v4401_v7, %v4358_v6  ;;  %vm9247_vm8 = vcmp.eq.s32.totalorder %v8436_v50, %v6470_v31  ;;  %vm9246_vm10 = vcmp.eq.s32.totalorder %v8443_v19, %v6470_v31 }
 0x33b   : > { %v3639_v10 = vpop.f32.mrb[208].mxu0  ;;  %v4152_v63 = vpop.f32.mrb[208].mxu1 }
 0x33c   : > { %v3846_v14 = vsel %vm9245_vm15, %v3639_v10, 0.0  ;;  %v4359_v37 = vsel %vm9244_vm3, %v4152_v63, 0.0  ;;  %v3641_v2 = vpop.f32.mrb[209].mxu0  ;;  %v4154_v17 = vpop.f32.mrb[209].mxu1  ;;  %vm9249_vm3 = vcmp.eq.s32.totalorder %v8432_v59, %v6473_v12  ;;  %vm9248_vm15 = vcmp.eq.s32.totalorder %v8439_v27, %v6473_v12 }
 0x33d   : > { %v3869_v54 = vadd.f32 %v3868_v4, %v3846_v14  ;;  %v4382_v9 = vadd.f32 %v4381_v52, %v4359_v37  ;;  %v3847_v47 = vsel %vm9247_vm8, %v3641_v2, 0.0  ;;  %v4360_v15 = vsel %vm9246_vm10, %v4154_v17, 0.0 }
 0x33e   : > { %v3890_v16 = vadd.f32 %v3889_v3, %v3847_v47  ;;  %v4403_v13 = vadd.f32 %v4402_v46, %v4360_v15  ;;  %vm9251_vm10 = vcmp.eq.s32.totalorder %v8436_v50, %v6473_v12  ;;  %vm9250_vm8 = vcmp.eq.s32.totalorder %v8443_v19, %v6473_v12 }
 0x33f   : > { %v3645_v55 = vpop.f32.mrb[210].mxu0  ;;  %v4158_v56 = vpop.f32.mrb[210].mxu1 }
 0x340   : > { %v3848_v18 = vsel %vm9249_vm3, %v3645_v55, 0.0  ;;  %v4361_v33 = vsel %vm9248_vm15, %v4158_v56, 0.0  ;;  %v3647_v32 = vpop.f32.mrb[211].mxu0  ;;  %v4160_v57 = vpop.f32.mrb[211].mxu1  ;;  %vm9253_vm15 = vcmp.eq.s32.totalorder %v8432_v59, %v6498_v48  ;;  %vm9252_vm3 = vcmp.eq.s32.totalorder %v8439_v27, %v6498_v48 }
 0x341   : > { %v3870_v28 = vadd.f32 %v3869_v54, %v3848_v18  ;;  %v4383_v0 = vadd.f32 %v4382_v9, %v4361_v33  ;;  %v3849_v53 = vsel %vm9251_vm10, %v3647_v32, 0.0  ;;  %v4362_v5 = vsel %vm9250_vm8, %v4160_v57, 0.0 }
 0x342   : > { %v3891_v40 = vadd.f32 %v3890_v16, %v3849_v53  ;;  %v4404_v42 = vadd.f32 %v4403_v13, %v4362_v5  ;;  %vm9255_vm8 = vcmp.eq.s32.totalorder %v8436_v50, %v6498_v48  ;;  %vm9254_vm10 = vcmp.eq.s32.totalorder %v8443_v19, %v6498_v48 }
 0x343   : > { %v3651_v30 = vpop.f32.mrb[212].mxu0  ;;  %v4164_v34 = vpop.f32.mrb[212].mxu1 }
 0x344   : > { %v3850_v41 = vsel %vm9253_vm15, %v3651_v30, 0.0  ;;  %v4363_v7 = vsel %vm9252_vm3, %v4164_v34, 0.0  ;;  %v3653_v38 = vpop.f32.mrb[213].mxu0  ;;  %v4166_v29 = vpop.f32.mrb[213].mxu1  ;;  %vm9257_vm3 = vcmp.eq.s32.totalorder %v8432_v59, %v6501_v44  ;;  %vm9256_vm15 = vcmp.eq.s32.totalorder %v8439_v27, %v6501_v44 }
 0x345   : > { %v3871_v35 = vadd.f32 %v3870_v28, %v3850_v41  ;;  %v4384_v51 = vadd.f32 %v4383_v0, %v4363_v7  ;;  %v3851_v39 = vsel %vm9255_vm8, %v3653_v38, 0.0  ;;  %v4364_v61 = vsel %vm9254_vm10, %v4166_v29, 0.0 }
 0x346   : > { %v3892_v4 = vadd.f32 %v3891_v40, %v3851_v39  ;;  %v4405_v52 = vadd.f32 %v4404_v42, %v4364_v61  ;;  %vm9259_vm10 = vcmp.eq.s32.totalorder %v8436_v50, %v6501_v44  ;;  %vm9258_vm8 = vcmp.eq.s32.totalorder %v8443_v19, %v6501_v44 }
 0x347   : > { %v3657_v62 = vpop.f32.mrb[214].mxu0  ;;  %v4170_v6 = vpop.f32.mrb[214].mxu1 }
 0x348   : > { %v3852_v3 = vsel %vm9257_vm3, %v3657_v62, 0.0  ;;  %v4365_v46 = vsel %vm9256_vm15, %v4170_v6, 0.0  ;;  %v3659_v10 = vpop.f32.mrb[215].mxu0  ;;  %v4172_v63 = vpop.f32.mrb[215].mxu1  ;;  %vm9261_vm15 = vcmp.eq.s32.totalorder %v8432_v59, %v6510_v11  ;;  %vm9260_vm3 = vcmp.eq.s32.totalorder %v8439_v27, %v6510_v11 }
 0x349   : > { %v3872_v14 = vadd.f32 %v3871_v35, %v3852_v3  ;;  %v4385_v37 = vadd.f32 %v4384_v51, %v4365_v46  ;;  %v3853_v2 = vsel %vm9259_vm10, %v3659_v10, 0.0  ;;  %v4366_v17 = vsel %vm9258_vm8, %v4172_v63, 0.0 }
 0x34a   : > { %v3893_v54 = vadd.f32 %v3892_v4, %v3853_v2  ;;  %v4406_v9 = vadd.f32 %v4405_v52, %v4366_v17  ;;  %vm9263_vm8 = vcmp.eq.s32.totalorder %v8436_v50, %v6510_v11  ;;  %vm9262_vm10 = vcmp.eq.s32.totalorder %v8443_v19, %v6510_v11 }
 0x34b   : > { %v3663_v47 = vpop.f32.mrb[216].mxu0  ;;  %v4176_v15 = vpop.f32.mrb[216].mxu1 }
 0x34c   : > { %v3854_v16 = vsel %vm9261_vm15, %v3663_v47, 0.0  ;;  %v4367_v13 = vsel %vm9260_vm3, %v4176_v15, 0.0  ;;  %v3665_v55 = vpop.f32.mrb[217].mxu0  ;;  %v4178_v56 = vpop.f32.mrb[217].mxu1  ;;  %vm9265_vm3 = vcmp.eq.s32.totalorder %v8432_v59, %v6762_v58  ;;  %vm9264_vm15 = vcmp.eq.s32.totalorder %v8439_v27, %v6762_v58 }
 0x34d   : > { %v3873_v18 = vadd.f32 %v3872_v14, %v3854_v16  ;;  %v4386_v33 = vadd.f32 %v4385_v37, %v4367_v13  ;;  %v3855_v32 = vsel %vm9263_vm8, %v3665_v55, 0.0  ;;  %v4368_v57 = vsel %vm9262_vm10, %v4178_v56, 0.0 }
 0x34e   : > { %v3894_v28 = vadd.f32 %v3893_v54, %v3855_v32  ;;  %v4407_v0 = vadd.f32 %v4406_v9, %v4368_v57  ;;  %vm9267_vm10 = vcmp.eq.s32.totalorder %v8436_v50, %v6762_v58  ;;  %vm9266_vm8 = vcmp.eq.s32.totalorder %v8443_v19, %v6762_v58 }
 0x34f   : > { %v3669_v53 = vpop.f32.mrb[218].mxu0  ;;  %v4182_v5 = vpop.f32.mrb[218].mxu1 }
 0x350   : > { %v3856_v40 = vsel %vm9265_vm3, %v3669_v53, 0.0  ;;  %v4369_v42 = vsel %vm9264_vm15, %v4182_v5, 0.0  ;;  %v3671_v30 = vpop.f32.mrb[219].mxu0  ;;  %v4184_v34 = vpop.f32.mrb[219].mxu1  ;;  %vm9269_vm15 = vcmp.eq.s32.totalorder %v8432_v59, %v6798_v49  ;;  %vm9268_vm3 = vcmp.eq.s32.totalorder %v8439_v27, %v6798_v49 }
 0x351   : > { %v3874_v41 = vadd.f32 %v3873_v18, %v3856_v40  ;;  %v4387_v7 = vadd.f32 %v4386_v33, %v4369_v42  ;;  %v3857_v38 = vsel %vm9267_vm10, %v3671_v30, 0.0  ;;  %v4370_v29 = vsel %vm9266_vm8, %v4184_v34, 0.0 }
 0x352   : > { %v3895_v35 = vadd.f32 %v3894_v28, %v3857_v38  ;;  %v4408_v51 = vadd.f32 %v4407_v0, %v4370_v29  ;;  %vm9271_vm8 = vcmp.eq.s32.totalorder %v8436_v50, %v6798_v49  ;;  %vm9270_vm10 = vcmp.eq.s32.totalorder %v8443_v19, %v6798_v49 }
 0x353   : > { %v3675_v39 = vpop.f32.mrb[220].mxu0  ;;  %v4188_v61 = vpop.f32.mrb[220].mxu1 }
 0x354   : > { %v3858_v4 = vsel %vm9269_vm15, %v3675_v39, 0.0  ;;  %v4371_v52 = vsel %vm9268_vm3, %v4188_v61, 0.0  ;;  %v3677_v62 = vpop.f32.mrb[221].mxu0  ;;  %v4190_v6 = vpop.f32.mrb[221].mxu1  ;;  %vm3828_vm3 = vcmp.eq.s32.totalorder %v8432_v59, %v6826_v25  ;;  %vm4341_vm15 = vcmp.eq.s32.totalorder %v8439_v27, %v6826_v25 }
 0x355   : > { %v3875_v3 = vadd.f32 %v3874_v41, %v3858_v4  ;;  %v4388_v46 = vadd.f32 %v4387_v7, %v4371_v52  ;;  %v3859_v10 = vsel %vm9271_vm8, %v3677_v62, 0.0  ;;  %v4372_v63 = vsel %vm9270_vm10, %v4190_v6, 0.0 }
 0x356   : > { %v3896_v14 = vadd.f32 %v3895_v35, %v3859_v10  ;;  %v4409_v37 = vadd.f32 %v4408_v51, %v4372_v63  ;;  %vm3829_vm10 = vcmp.eq.s32.totalorder %v8436_v50, %v6826_v25  ;;  %vm4342_vm8 = vcmp.eq.s32.totalorder %v8443_v19, %v6826_v25 }
 0x357   : > { %v3681_v2 = vpop.f32.mrb[222].mxu0  ;;  %v4194_v17 = vpop.f32.mrb[222].mxu1 }
 0x358   : > { %v3860_v54 = vsel %vm3828_vm3, %v3681_v2, 0.0  ;;  %v4373_v9 = vsel %vm4341_vm15, %v4194_v17, 0.0  ;;  %v3683_v47 = vpop.f32.mrb[223].mxu0  ;;  %v4196_v15 = vpop.f32.mrb[223].mxu1 }
 0x359   : > { %v3876_v16 = vadd.f32 %v3875_v3, %v3860_v54  ;;  %v4389_v13 = vadd.f32 %v4388_v46, %v4373_v9  ;;  %v3861_v55 = vsel %vm3829_vm10, %v3683_v47, 0.0  ;;  %v4374_v56 = vsel %vm4342_vm8, %v4196_v15, 0.0 }
 0x35a   : > { %v3897_v18 = vadd.f32 %v3896_v14, %v3861_v55  ;;  %v4410_v33 = vadd.f32 %v4409_v37, %v4374_v56 }
 0x35b   : > { %v3877_v32 = vrot.slane %v3876_v16, 4  ;;  %v4390_v57 = vrot.slane %v4389_v13, 4  ;;  %v3687_v28 = vpop.f32.mrb[224].mxu0  ;;  %v4200_v0 = vpop.f32.mrb[224].mxu1 }
 0x35c   : > { %v3898_v53 = vrot.slane %v3897_v18, 4  ;;  %v4411_v5 = vrot.slane %v4410_v33, 4  ;;  %v3906_v40 = vsel %vm3798_vm1, %v3687_v28, 0.0  ;;  %v4419_v42 = vsel %vm4311_vm12, %v4200_v0, 0.0  ;;  %v3689_v30 = vpop.f32.mrb[225].mxu0  ;;  %v4202_v34 = vpop.f32.mrb[225].mxu1 }
 0x35d   : > { %v3878_v41 = vadd.f32 %v3877_v32, %v3876_v16  ;;  %v4391_v7 = vadd.f32 %v4390_v57, %v4389_v13  ;;  %v3907_v38 = vsel %vm3799_vm4, %v3689_v30, 0.0  ;;  %v4420_v29 = vsel %vm4312_vm0, %v4202_v34, 0.0 }
 0x35e   : > { %v3899_v35 = vadd.f32 %v3898_v53, %v3897_v18  ;;  %v4412_v51 = vadd.f32 %v4411_v5, %v4410_v33  ;;  %vm9467_vm1 = vcmp.eq.s32.totalorder %v8432_v59, %v5532_v26  ;;  %vm9468_vm12 = vcmp.eq.s32.totalorder %v8439_v27, %v5532_v26 }
 0x35f   : > { %v3879_v39 = vrot.slane %v3878_v41, 2  ;;  %v4392_v61 = vrot.slane %v4391_v7, 2  ;;  %v3693_v4 = vpop.f32.mrb[226].mxu0  ;;  %v4206_v52 = vpop.f32.mrb[226].mxu1  ;;  %vm9469_vm4 = vcmp.eq.s32.totalorder %v8436_v50, %v5532_v26  ;;  %vm9470_vm0 = vcmp.eq.s32.totalorder %v8443_v19, %v5532_v26 }
 0x360   : > { %v3900_v62 = vrot.slane %v3899_v35, 2  ;;  %v4413_v6 = vrot.slane %v4412_v51, 2  ;;  %v3908_v3 = vsel %vm3800_vm11, %v3693_v4, 0.0  ;;  %v4421_v46 = vsel %vm4313_vm6, %v4206_v52, 0.0  ;;  %v3695_v10 = vpop.f32.mrb[227].mxu0  ;;  %v4208_v63 = vpop.f32.mrb[227].mxu1 }
 0x361   : > { %v3880_v23 = vadd.f32 %v3879_v39, %v3878_v41  ;;  %v4393_v14 = vadd.f32 %v4392_v61, %v4391_v7  ;;  %v3938_v37 = vadd.f32 %v3908_v3, %v3906_v40  ;;  %v4451_v2 = vadd.f32 %v4421_v46, %v4419_v42 }
 0x362   : > { %v3901_v17 = vadd.f32 %v3900_v62, %v3899_v35  ;;  %v4414_v54 = vadd.f32 %v4413_v6, %v4412_v51  ;;  %v3909_v9 = vsel %vm3801_vm2, %v3695_v10, 0.0  ;;  %v4422_v47 = vsel %vm4314_vm9, %v4208_v63, 0.0 }
 0x363   : > { %v3881_v15 = vrot.slane %v3880_v23, 1  ;;  %v4394_v16 = vrot.slane %v4393_v14, 1  ;;  %v3959_v13 = vadd.f32 %v3909_v9, %v3907_v38  ;;  %v4472_v55 = vadd.f32 %v4422_v47, %v4420_v29  ;;  %v3699_v56 = vpop.f32.mrb[228].mxu0  ;;  %v4212_v18 = vpop.f32.mrb[228].mxu1 }
 0x364   : > { %v3902_v33 = vrot.slane %v3901_v17, 1  ;;  %v4415_v32 = vrot.slane %v4414_v54, 1  ;;  %v3910_v57 = vsel %vm3802_vm14, %v3699_v56, 0.0  ;;  %v4423_v28 = vsel %vm4315_vm13, %v4212_v18, 0.0  ;;  %v3701_v0 = vpop.f32.mrb[229].mxu0  ;;  %v4214_v53 = vpop.f32.mrb[229].mxu1 }
 0x365   : > { %v3882_v21 = vadd.f32 %v3881_v15, %v3880_v23  ;;  %v3939_v5 = vadd.f32 %v3938_v37, %v3910_v57  ;;  %v4452_v40 = vadd.f32 %v4451_v2, %v4423_v28  ;;  %v3911_v30 = vsel %vm3803_vm5, %v3701_v0, 0.0 }
 0x366   : > { %v3903_v42 = vadd.f32 %v3902_v33, %v3901_v17  ;;  %v4424_v34 = vsel %vm4316_vm7, %v4214_v53, 0.0  ;;  %v4395_v7 = vadd.f32 %v4394_v16, %v4393_v14  ;;  %v3960_v38 = vadd.f32 %v3959_v13, %v3911_v30 }
 0x367   : > { %v3904_v41 = vadd.f32 %v3882_v21, %v8295_v60  ;;  %v4473_v29 = vadd.f32 %v4472_v55, %v4424_v34  ;;  %v3705_v35 = vpop.f32.mrb[230].mxu0  ;;  %v4218_v51 = vpop.f32.mrb[230].mxu1  ;;  %v4416_v61 = vadd.f32 %v4415_v32, %v4414_v54  ;;  %vm9471_vm11 = vcmp.eq.s32.totalorder %v8432_v59, %v6406_v43 }
 0x368   : > { %v3905_v39 = vadd.f32 %v3903_v42, %v8300_v8  ;;  %v3912_v4 = vsel %vm9467_vm1, %v3705_v35, 0.0  ;;  %v4425_v52 = vsel %vm9468_vm12, %v4218_v51, 0.0  ;;  %v3707_v22 = vpop.f32.mrb[231].mxu0  ;;  %v4220_v62 = vpop.f32.mrb[231].mxu1  ;;  %vm9472_vm6 = vcmp.eq.s32.totalorder %v8439_v27, %v6406_v43 }
 0x369   : > { %v8839_v6 = vadd.f32 %v4395_v7, %v3904_v41  ;;  %v3940_v60 = vadd.f32 %v3939_v5, %v3912_v4  ;;  %v4453_v3 = vadd.f32 %v4452_v40, %v4425_v52  ;;  %v3913_v46 = vsel %vm9469_vm4, %v3707_v22, 0.0 }
 0x36a   : > { %v8844_v8 = vadd.f32 %v4416_v61, %v3905_v39  ;;  %v3961_v10 = vadd.f32 %v3960_v38, %v3913_v46  ;;  %v4426_v63 = vsel %vm9470_vm0, %v4220_v62, 0.0  ;;  %vm9473_vm2 = vcmp.eq.s32.totalorder %v8436_v50, %v6406_v43 }
 0x36b   : > { %v4474_v23 = vadd.f32 %v4473_v29, %v4426_v63  ;;  %v3711_v14 = vpop.f32.mrb[232].mxu0  ;;  %v4224_v37 = vpop.f32.mrb[232].mxu1  ;;  %vm9474_vm9 = vcmp.eq.s32.totalorder %v8443_v19, %v6406_v43  ;;  %vm9475_vm14 = vcmp.eq.s32.totalorder %v8432_v59, %v6435_v24  ;;  %vm9476_vm13 = vcmp.eq.s32.totalorder %v8439_v27, %v6435_v24 }
 0x36c   : > { %v3914_v2 = vsel %vm9471_vm11, %v3711_v14, 0.0  ;;  %v4427_v17 = vsel %vm9472_vm6, %v4224_v37, 0.0  ;;  %v3713_v54 = vpop.f32.mrb[233].mxu0  ;;  %v4226_v9 = vpop.f32.mrb[233].mxu1  ;;  %vm9477_vm5 = vcmp.eq.s32.totalorder %v8436_v50, %v6435_v24  ;;  %vm9478_vm7 = vcmp.eq.s32.totalorder %v8443_v19, %v6435_v24 }
 0x36d   : > { %v3941_v47 = vadd.f32 %v3940_v60, %v3914_v2  ;;  %v4454_v15 = vadd.f32 %v4453_v3, %v4427_v17  ;;  %v3915_v26 = vsel %vm9473_vm2, %v3713_v54, 0.0  ;;  %v4428_v16 = vsel %vm9474_vm9, %v4226_v9, 0.0 }
 0x36e   : > { %v3962_v13 = vadd.f32 %v3961_v10, %v3915_v26  ;;  %v4475_v55 = vadd.f32 %v4474_v23, %v4428_v16  ;;  %vm9479_vm1 = vcmp.eq.s32.totalorder %v8432_v59, %v6460_v1  ;;  %vm9480_vm12 = vcmp.eq.s32.totalorder %v8439_v27, %v6460_v1 }
 0x36f   : > { %v3717_v56 = vpop.f32.mrb[234].mxu0  ;;  %v4230_v18 = vpop.f32.mrb[234].mxu1  ;;  %vm9481_vm4 = vcmp.eq.s32.totalorder %v8436_v50, %v6460_v1  ;;  %vm9482_vm0 = vcmp.eq.s32.totalorder %v8443_v19, %v6460_v1  ;;  %vm9483_vm11 = vcmp.eq.s32.totalorder %v8432_v59, %v6463_v45  ;;  %vm9484_vm6 = vcmp.eq.s32.totalorder %v8439_v27, %v6463_v45 }
 0x370   : > { %v3916_v33 = vsel %vm9475_vm14, %v3717_v56, 0.0  ;;  %v4429_v32 = vsel %vm9476_vm13, %v4230_v18, 0.0  ;;  %v3719_v57 = vpop.f32.mrb[235].mxu0  ;;  %v4232_v28 = vpop.f32.mrb[235].mxu1  ;;  %vm9485_vm2 = vcmp.eq.s32.totalorder %v8436_v50, %v6463_v45  ;;  %vm9486_vm9 = vcmp.eq.s32.totalorder %v8443_v19, %v6463_v45 }
 0x371   : > { %v3942_v0 = vadd.f32 %v3941_v47, %v3916_v33  ;;  %v4455_v53 = vadd.f32 %v4454_v15, %v4429_v32  ;;  %v3917_v43 = vsel %vm9477_vm5, %v3719_v57, 0.0  ;;  %v4430_v21 = vsel %vm9478_vm7, %v4232_v28, 0.0 }
 0x372   : > { %v3963_v5 = vadd.f32 %v3962_v13, %v3917_v43  ;;  %v4476_v40 = vadd.f32 %v4475_v55, %v4430_v21  ;;  %vm9487_vm14 = vcmp.eq.s32.totalorder %v8432_v59, %v6470_v31  ;;  %vm9488_vm13 = vcmp.eq.s32.totalorder %v8439_v27, %v6470_v31 }
 0x373   : > { %v3723_v42 = vpop.f32.mrb[236].mxu0  ;;  %v4236_v30 = vpop.f32.mrb[236].mxu1  ;;  %vm9489_vm5 = vcmp.eq.s32.totalorder %v8436_v50, %v6470_v31  ;;  %vm9490_vm7 = vcmp.eq.s32.totalorder %v8443_v19, %v6470_v31 }
 0x374   : > { %v3918_v34 = vsel %vm9479_vm1, %v3723_v42, 0.0  ;;  %v4431_v41 = vsel %vm9480_vm12, %v4236_v30, 0.0  ;;  %v3725_v7 = vpop.f32.mrb[237].mxu0  ;;  %v4238_v38 = vpop.f32.mrb[237].mxu1  ;;  %vm9491_vm1 = vcmp.eq.s32.totalorder %v8432_v59, %v6473_v12  ;;  %vm9492_vm12 = vcmp.eq.s32.totalorder %v8439_v27, %v6473_v12 }
 0x375   : > { %v3943_v29 = vadd.f32 %v3942_v0, %v3918_v34  ;;  %v4456_v35 = vadd.f32 %v4455_v53, %v4431_v41  ;;  %v3919_v24 = vsel %vm9481_vm4, %v3725_v7, 0.0  ;;  %v4432_v51 = vsel %vm9482_vm0, %v4238_v38, 0.0 }
 0x376   : > { %v3964_v39 = vadd.f32 %v3963_v5, %v3919_v24  ;;  %v4477_v61 = vadd.f32 %v4476_v40, %v4432_v51  ;;  %vm9493_vm4 = vcmp.eq.s32.totalorder %v8436_v50, %v6473_v12  ;;  %vm9494_vm0 = vcmp.eq.s32.totalorder %v8443_v19, %v6473_v12 }
 0x377   : > { %v3729_v4 = vpop.f32.mrb[238].mxu0  ;;  %v4242_v52 = vpop.f32.mrb[238].mxu1 }
 0x378   : > { %v3920_v22 = vsel %vm9483_vm11, %v3729_v4, 0.0  ;;  %v4433_v62 = vsel %vm9484_vm6, %v4242_v52, 0.0  ;;  %v3731_v60 = vpop.f32.mrb[239].mxu0  ;;  %v4244_v3 = vpop.f32.mrb[239].mxu1  ;;  %vm9495_vm11 = vcmp.eq.s32.totalorder %v8432_v59, %v6498_v48  ;;  %vm9496_vm6 = vcmp.eq.s32.totalorder %v8439_v27, %v6498_v48 }
 0x379   : > { %v3944_v46 = vadd.f32 %v3943_v29, %v3920_v22  ;;  %v4457_v10 = vadd.f32 %v4456_v35, %v4433_v62  ;;  %v3921_v1 = vsel %vm9485_vm2, %v3731_v60, 0.0  ;;  %v4434_v63 = vsel %vm9486_vm9, %v4244_v3, 0.0 }
 0x37a   : > { %v3965_v23 = vadd.f32 %v3964_v39, %v3921_v1  ;;  %v4478_v14 = vadd.f32 %v4477_v61, %v4434_v63  ;;  %vm9497_vm2 = vcmp.eq.s32.totalorder %v8436_v50, %v6498_v48  ;;  %vm9498_vm9 = vcmp.eq.s32.totalorder %v8443_v19, %v6498_v48 }
 0x37b   : > { %v3735_v37 = vpop.f32.mrb[240].mxu0  ;;  %v4248_v2 = vpop.f32.mrb[240].mxu1 }
 0x37c   : > { %v3922_v17 = vsel %vm9487_vm14, %v3735_v37, 0.0  ;;  %v4435_v54 = vsel %vm9488_vm13, %v4248_v2, 0.0  ;;  %v3737_v9 = vpop.f32.mrb[241].mxu0  ;;  %v4250_v47 = vpop.f32.mrb[241].mxu1  ;;  %vm9499_vm14 = vcmp.eq.s32.totalorder %v8432_v59, %v6501_v44  ;;  %vm9500_vm13 = vcmp.eq.s32.totalorder %v8439_v27, %v6501_v44 }
 0x37d   : > { %v3945_v15 = vadd.f32 %v3944_v46, %v3922_v17  ;;  %v4458_v26 = vadd.f32 %v4457_v10, %v4435_v54  ;;  %v3923_v45 = vsel %vm9489_vm5, %v3737_v9, 0.0  ;;  %v4436_v16 = vsel %vm9490_vm7, %v4250_v47, 0.0 }
 0x37e   : > { %v3966_v13 = vadd.f32 %v3965_v23, %v3923_v45  ;;  %v4479_v55 = vadd.f32 %v4478_v14, %v4436_v16  ;;  %vm9501_vm5 = vcmp.eq.s32.totalorder %v8436_v50, %v6501_v44  ;;  %vm9502_vm7 = vcmp.eq.s32.totalorder %v8443_v19, %v6501_v44 }
 0x37f   : > { %v3741_v56 = vpop.f32.mrb[242].mxu0  ;;  %v4254_v18 = vpop.f32.mrb[242].mxu1 }
 0x380   : > { %v3924_v33 = vsel %vm9491_vm1, %v3741_v56, 0.0  ;;  %v4437_v32 = vsel %vm9492_vm12, %v4254_v18, 0.0  ;;  %v3743_v57 = vpop.f32.mrb[243].mxu0  ;;  %v4256_v28 = vpop.f32.mrb[243].mxu1  ;;  %vm9503_vm1 = vcmp.eq.s32.totalorder %v8432_v59, %v6510_v11  ;;  %vm9504_vm12 = vcmp.eq.s32.totalorder %v8439_v27, %v6510_v11 }
 0x381   : > { %v3946_v0 = vadd.f32 %v3945_v15, %v3924_v33  ;;  %v4459_v53 = vadd.f32 %v4458_v26, %v4437_v32  ;;  %v3925_v31 = vsel %vm9493_vm4, %v3743_v57, 0.0  ;;  %v4438_v43 = vsel %vm9494_vm0, %v4256_v28, 0.0 }
 0x382   : > { %v3967_v21 = vadd.f32 %v3966_v13, %v3925_v31  ;;  %v4480_v5 = vadd.f32 %v4479_v55, %v4438_v43  ;;  %vm9505_vm4 = vcmp.eq.s32.totalorder %v8436_v50, %v6510_v11  ;;  %vm9506_vm0 = vcmp.eq.s32.totalorder %v8443_v19, %v6510_v11 }
 0x383   : > { %v3747_v40 = vpop.f32.mrb[244].mxu0  ;;  %v4260_v42 = vpop.f32.mrb[244].mxu1 }
 0x384   : > { %v3926_v30 = vsel %vm9495_vm11, %v3747_v40, 0.0  ;;  %v4439_v34 = vsel %vm9496_vm6, %v4260_v42, 0.0  ;;  %v3749_v41 = vpop.f32.mrb[245].mxu0  ;;  %v4262_v7 = vpop.f32.mrb[245].mxu1  ;;  %vm9507_vm11 = vcmp.eq.s32.totalorder %v8432_v59, %v6762_v58  ;;  %vm9508_vm6 = vcmp.eq.s32.totalorder %v8439_v27, %v6762_v58 }
 0x385   : > { %v3947_v38 = vadd.f32 %v3946_v0, %v3926_v30  ;;  %v4460_v29 = vadd.f32 %v4459_v53, %v4439_v34  ;;  %v3927_v12 = vsel %vm9497_vm2, %v3749_v41, 0.0  ;;  %v4440_v35 = vsel %vm9498_vm9, %v4262_v7, 0.0 }
 0x386   : > { %v3968_v24 = vadd.f32 %v3967_v21, %v3927_v12  ;;  %v4481_v51 = vadd.f32 %v4480_v5, %v4440_v35  ;;  %vm9509_vm2 = vcmp.eq.s32.totalorder %v8436_v50, %v6762_v58  ;;  %vm9510_vm9 = vcmp.eq.s32.totalorder %v8443_v19, %v6762_v58 }
 0x387   : > { %v3753_v39 = vpop.f32.mrb[246].mxu0  ;;  %v4266_v61 = vpop.f32.mrb[246].mxu1 }
 0x388   : > { %v3928_v4 = vsel %vm9499_vm14, %v3753_v39, 0.0  ;;  %v4441_v52 = vsel %vm9500_vm13, %v4266_v61, 0.0  ;;  %v3755_v22 = vpop.f32.mrb[247].mxu0  ;;  %v4268_v62 = vpop.f32.mrb[247].mxu1  ;;  %vm9511_vm14 = vcmp.eq.s32.totalorder %v8432_v59, %v6798_v49  ;;  %vm9512_vm13 = vcmp.eq.s32.totalorder %v8439_v27, %v6798_v49 }
 0x389   : > { %v3948_v60 = vadd.f32 %v3947_v38, %v3928_v4  ;;  %v4461_v3 = vadd.f32 %v4460_v29, %v4441_v52  ;;  %v3929_v48 = vsel %vm9501_vm5, %v3755_v22, 0.0  ;;  %v4442_v46 = vsel %vm9502_vm7, %v4268_v62, 0.0 }
 0x38a   : > { %v3969_v10 = vadd.f32 %v3968_v24, %v3929_v48  ;;  %v4482_v1 = vadd.f32 %v4481_v51, %v4442_v46  ;;  %vm9513_vm5 = vcmp.eq.s32.totalorder %v8436_v50, %v6798_v49  ;;  %vm9514_vm7 = vcmp.eq.s32.totalorder %v8443_v19, %v6798_v49 }
 0x38b   : > { %v3759_v63 = vpop.f32.mrb[248].mxu0  ;;  %v4272_v23 = vpop.f32.mrb[248].mxu1 }
 0x38c   : > { %v3930_v14 = vsel %vm9503_vm1, %v3759_v63, 0.0  ;;  %v4443_v37 = vsel %vm9504_vm12, %v4272_v23, 0.0  ;;  %v3761_v2 = vpop.f32.mrb[249].mxu0  ;;  %v4274_v17 = vpop.f32.mrb[249].mxu1 }
 0x38d   : > { %v3949_v54 = vadd.f32 %v3948_v60, %v3930_v14  ;;  %v4462_v9 = vadd.f32 %v4461_v3, %v4443_v37  ;;  %v3931_v44 = vsel %vm9505_vm4, %v3761_v2, 0.0  ;;  %v4444_v47 = vsel %vm9506_vm0, %v4274_v17, 0.0 }
 0x38e   : > { %v3970_v15 = vadd.f32 %v3969_v10, %v3931_v44  ;;  %v4483_v26 = vadd.f32 %v4482_v1, %v4444_v47 }
 0x38f   : > { %v3765_v45 = vpop.f32.mrb[250].mxu0  ;;  %v4278_v16 = vpop.f32.mrb[250].mxu1 }
 0x390   : > { %v3932_v13 = vsel %vm9507_vm11, %v3765_v45, 0.0  ;;  %v4445_v55 = vsel %vm9508_vm6, %v4278_v16, 0.0  ;;  %v3767_v56 = vpop.f32.mrb[251].mxu0  ;;  %v4280_v18 = vpop.f32.mrb[251].mxu1 }
 0x391   : > { %v3950_v33 = vadd.f32 %v3949_v54, %v3932_v13  ;;  %v4463_v32 = vadd.f32 %v4462_v9, %v4445_v55  ;;  %v3933_v11 = vsel %vm9509_vm2, %v3767_v56, 0.0  ;;  %v4446_v57 = vsel %vm9510_vm9, %v4280_v18, 0.0 }
 0x392   : > { %v3971_v28 = vadd.f32 %v3970_v15, %v3933_v11  ;;  %v4484_v0 = vadd.f32 %v4483_v26, %v4446_v57 }
 0x393   : > { %v3771_v53 = vpop.f32.mrb[252].mxu0  ;;  %v4284_v31 = vpop.f32.mrb[252].mxu1 }
 0x394   : > { %v3934_v43 = vsel %vm9511_vm14, %v3771_v53, 0.0  ;;  %v4447_v21 = vsel %vm9512_vm13, %v4284_v31, 0.0  ;;  %v3773_v5 = vpop.f32.mrb[253].mxu0  ;;  %v4286_v40 = vpop.f32.mrb[253].mxu1 }
 0x395   : > { %v3951_v42 = vadd.f32 %v3950_v33, %v3934_v43  ;;  %v4464_v30 = vadd.f32 %v4463_v32, %v4447_v21  ;;  %v3935_v58 = vsel %vm9513_vm5, %v3773_v5, 0.0  ;;  %v4448_v34 = vsel %vm9514_vm7, %v4286_v40, 0.0 }
 0x396   : > { %v3972_v41 = vadd.f32 %v3971_v28, %v3935_v58  ;;  %v4485_v7 = vadd.f32 %v4484_v0, %v4448_v34 }
 0x397   : > { %v3777_v38 = vpop.f32.mrb[254].mxu0  ;;  %v4290_v29 = vpop.f32.mrb[254].mxu1 }
 0x398   : > { %v3936_v12 = vsel %vm3828_vm3, %v3777_v38, 0.0  ;;  %v4449_v35 = vsel %vm4341_vm15, %v4290_v29, 0.0  ;;  %v3779_v24 = vpop.f32.mrb[255].mxu0  ;;  %v4292_v51 = vpop.f32.mrb[255].mxu1  ;;  %vm4495_vm3 = vcmask 1040384  }
 0x399   : > { %v3952_v39 = vadd.f32 %v3951_v42, %v3936_v12  ;;  %v4465_v61 = vadd.f32 %v4464_v30, %v4449_v35  ;;  %v3937_v49 = vsel %vm3829_vm10, %v3779_v24, 0.0  ;;  %v4450_v4 = vsel %vm4342_vm8, %v4292_v51, 0.0 }
 0x39a   : > { %v3973_v52 = vadd.f32 %v3972_v41, %v3937_v49  ;;  %v4486_v59 = vadd.f32 %v4485_v7, %v4450_v4 }
 0x39b   : > { %v3953_v22 = vrot.slane %v3952_v39, 4  ;;  %v4466_v62 = vrot.slane %v4465_v61, 4 }
 0x39c   : > { %v3974_v60 = vrot.slane %v3973_v52, 4  ;;  %v4487_v27 = vrot.slane %v4486_v59, 4 }
 0x39d   : > { %v3954_v3 = vadd.f32 %v3953_v22, %v3952_v39  ;;  %v4467_v48 = vadd.f32 %v4466_v62, %v4465_v61 }
 0x39e   : > { %v3975_v46 = vadd.f32 %v3974_v60, %v3973_v52  ;;  %v4488_v10 = vadd.f32 %v4487_v27, %v4486_v59 }
 0x39f   : > { %v3955_v1 = vrot.slane %v3954_v3, 2  ;;  %v4468_v63 = vrot.slane %v4467_v48, 2 }
 0x3a0   : > { %v3976_v50 = vrot.slane %v3975_v46, 2  ;;  %v4489_v23 = vrot.slane %v4488_v10, 2 }
 0x3a1   : > { %v3956_v14 = vadd.f32 %v3955_v1, %v3954_v3  ;;  %v4469_v25 = vadd.f32 %v4468_v63, %v4467_v48 }
 0x3a2   : > { %v3977_v19 = vadd.f32 %v3976_v50, %v3975_v46  ;;  %v4490_v37 = vadd.f32 %v4489_v23, %v4488_v10 }
 0x3a3   : > { %v3957_v2 = vrot.slane %v3956_v14, 1  ;;  %v4470_v17 = vrot.slane %v4469_v25, 1 }
 0x3a4   : > { %v3978_v54 = vrot.slane %v3977_v19, 1  ;;  %v4491_v9 = vrot.slane %v4490_v37, 1 }
 0x3a5   : > { %v3958_v44 = vadd.f32 %v3957_v2, %v3956_v14  ;;  %v4471_v26 = vadd.f32 %v4470_v17, %v4469_v25 }
 0x3a6   : > { %v3979_v47 = vadd.f32 %v3978_v54, %v3977_v19  ;;  %v4492_v16 = vadd.f32 %v4491_v9, %v4490_v37 }
 0x3a7   : > { %v3980_v15 = vadd.f32 %v3958_v44, %v8545_v20 }
 0x3a8   : > { %v3981_v45 = vadd.f32 %v3979_v47, %v8550_v36 }
 0x3a9   : > { %v4493_v13 = vadd.f32 %v4471_v26, %v3980_v15 }
 0x3aa   : > { %v4494_v55 = vadd.f32 %v4492_v16, %v3981_v45 }
 0x3ab   : > { %v4496_v56 = vsel %vm4495_vm3, %v8839_v6, %v4493_v13 }
 0x3ac   : > { %v4497_v18 = vsel %vm4495_vm3, %v8844_v8, %v4494_v55 }
 0x3ad   : > { %v4500_v33 = vcombine.low %v4496_v56, %v4497_v18 }
 0x3af   : > { %4944 = vst.sshfl [vmem:[%s173_s14] sm:$0x33 pattern:$0x76325410] %v4500_v33 }
 0x3b0   : > { %5220 = shalt.err (!%p5217_p12)
}
 0x3b1   : > { %s5221_s5 = scalar_lea.hbm %s9003_s24, 64  ;;  %s5225_s9 = scalar_lea.hbm %s9059_s3, 512 }
 0x3b2   : > { %p5222_p0 = scmp.ne.s32.totalorder %s9003_s24, %s5221_s5  ;;  %p5226_p3 = scmp.lt.u32.totalorder %s9003_s24, %s9059_s3 }
 0x3b3   : > { %p5227_p4 = scmp.lt.u32.totalorder %s5225_s9, %s5221_s5  ;;  %p5229_p6 = scmp.lt.u32.totalorder %s5221_s5, %s9003_s24 }
 0x3b4   : > { %p5223_p1 = pnand %p5222_p0, %p5382_p8 }
 0x3b5   : > { %p5228_p5 = por %p5227_p4, %p5226_p3 }
 0x3b6   : > { %p5224_p2 = pneg %p5223_p1 }
 0x3b7   : > { %p5230_p7 = por %p5229_p6, %p5228_p5 }
 0x3b9   : > { %p5231_p9 = pnand %p5230_p7, %p5224_p2 }
 0x3bb   : > { %5234 = shalt.err (!%p5231_p9)
}
 0x3bc   : > { %5054 = dma.vmem_to_hbm [thread:$0]  (%p5382_p8), %s9005_s15, 64, %s9003_s24, %s4511_s10  }
 0x3bd PF: > { %p5060_p10 = scmp.ge.s32.totalorder %s5303_s23, 2  ;;  %s4539_s13 = sand.u32 1, %s5275_s17  }
 0x3be   : > { %s4540_s14 = scalar_lea.sflag [#allocation5], %s4539_s13 }
 0x3bf   : > { %p5057_p11 = pnand %p5060_p10, %p5391_p13 }
 0x3c1   : > { %5270 = dma.done.wait (!%p5057_p11), %s4540_s14, 64  }
 0x3c2   : > { %5272 = vsyncadd (!%p5057_p11), %s4540_s14, 4294967232  ;;  %s22_s23 = sadd.s32 1, %s5303_s23   ;;  %s9515_s17 = smov %s5279_s18 }
 0x3c3   : > { %p19_p12 = scmp.ge.s32.totalorder %s22_s23, 10   ;;  %s9516_s18 = smov %s5283_s0 }
 0x3c4   : > { %s9517_s0 = smov %s5400_s7  ;;  %s9518_s19 = smov %s5295_s21 }
 0x3c5   : > { %s9519_s20 = smov %s5299_s22  ;;  %s9520_s21 = smov %s9523_s26 }
 0x3c6   : > { %s9521_s22 = smov %s9527_s27  ;;  %21 = sbr.rel (!%p19_p12) target bundleno = 20 (0x14), region = 66 }
 0x3cd   :  { %4545 = vsyncpa [#allocation5], 1 }
 0x3ce   :  { %4547 = vsyncpa [#allocation5 + $0x1], 1 }

</bundles_post_ra>
